<compile_context>
chip_gen: v5e
topology: v5e:2x2
jax: 0.10.0
libtpu: 0.0.40
codegen_flags: <defaults>
</compile_context>

<pallas_src>
import functools

import numpy as np

import jax
import jax.numpy as jnp
from jax import lax
from jax.experimental import pallas as pl
from jax.experimental.pallas import tpu as pltpu


_DOT_DTYPE = jnp.bfloat16   # MXU input dtype (accumulate + epilogues stay f32)


# ----------------------------------------------------------------------------
# Precomputed 0/1 spatial-gather matrices (constants of the module, not data).
# G[tap*OH*OW + p, q] = 1 iff output pixel p of tap (di, dj) reads input pixel
# q (zero-padding handled by simply having an all-zero row).
# ----------------------------------------------------------------------------
def _gather_matrix(in_hw, out_hw, stride):
    ih, iw = in_hw
    oh, ow = out_hw
    g = np.zeros((9, oh * ow, ih * iw), np.float32)
    for di in range(3):
        for dj in range(3):
            t = di * 3 + dj
            for i in range(oh):
                h = stride * i + di - 1
                if not (0 <= h < ih):
                    continue
                for j in range(ow):
                    w = stride * j + dj - 1
                    if 0 <= w < iw:
                        g[t, i * ow + j, h * iw + w] = 1.0
    return g.reshape(9 * oh * ow, ih * iw)


_G2_NP = _gather_matrix((16, 16), (8, 8), 2)   # conv2: (576, 256)
_G6_NP = _gather_matrix((8, 8), (8, 8), 1)     # conv6: (576, 64)


# ----------------------------------------------------------------------------
# Mish with reduced EUP pressure:
#   tanh(softplus(y)) = t*(t+2) / (t*(t+2) + 2),  t = exp(y)
# One exp + one (Newton-refined) approx reciprocal instead of exp+log1p+tanh.
# Guarded against exp overflow: for y > 20, mish(y) == y to f32 precision.
# ----------------------------------------------------------------------------
def _mish(y):
    t = jnp.exp(jnp.minimum(y, 20.0))
    u = t * (t + 2.0)
    d = u + 2.0
    r = pl.reciprocal(d, approx=True)
    r = r * (2.0 - d * r)                 # one Newton step -> ~f32 accuracy
    return jnp.where(y > 20.0, y, y * u * r)


def _dot(a, b):
    return jnp.dot(a.astype(_DOT_DTYPE), b, preferred_element_type=jnp.float32)


# ----------------------------------------------------------------------------
# The fused kernel: one grid step == one batch element, everything in VMEM.
# ----------------------------------------------------------------------------
def _downsample1_kernel(x_ref,                      # (1, 256, 32)  bf16 im2col
                        g2_ref,                     # (576, 256)    bf16
                        g6_ref,                     # (576, 64)     bf16
                        w1_ref, b1_ref,             # (32, 32), (1, 32)
                        w2_ref, b2_ref,             # (9, 32, 64), (1, 64)
                        w34_ref, b34_ref,           # (64, 128), (1, 128)
                        w5_ref, b5_ref,             # (128, 32), (1, 32)
                        w6_ref, b6_ref,             # (9, 32, 64), (1, 64)
                        w7_ref, b7_ref,             # (64, 64), (1, 64)
                        w8a_ref, w8b_ref, b8_ref,   # (64, 64), (128, 64), (1, 64)
                        out_ref):                   # (1, 64, 64)
    f32 = jnp.float32

    # ---- conv1: 3x3/s1, 3->32 on 16x16 -- ONE dot over host-built im2col ----
    a1 = _mish(jnp.dot(x_ref[0], w1_ref[...], preferred_element_type=f32)
               + b1_ref[...]).astype(_DOT_DTYPE)                 # (256, 32)

    # ---- conv2: 3x3/s2, 32->64, 16x16 -> 8x8 --------------------------------
    # Spatial gather (stride 2 + shift + zero pad) as one big constant-matrix
    # dot, then 9 aligned row-block tap dots accumulated in f32.
    cols = jnp.dot(g2_ref[...], a1,
                   preferred_element_type=f32).astype(_DOT_DTYPE)  # (576, 32)
    acc = jnp.zeros((64, 64), f32)
    for tap in range(9):
        acc = acc + jnp.dot(cols[tap * 64:(tap + 1) * 64], w2_ref[tap],
                            preferred_element_type=f32)
    a2 = _mish(acc + b2_ref[...]).astype(_DOT_DTYPE)             # (64, 64)

    # ---- conv3 + conv4 merged into one 128-lane-wide matmul -----------------
    # Channel order [conv4 | conv3]  ->  x4 = a34[:, :64], x3 = a34[:, 64:].
    a34_f = _mish(_dot(a2, w34_ref[...]) + b34_ref[...])         # (64, 128) f32
    x4 = a34_f[:, :64]                                           # residual, f32
    a34 = a34_f.astype(_DOT_DTYPE)

    # ---- conv5: 1x1, x4 -> 32 (weight rows for the x3 half are zero) --------
    a5 = _mish(_dot(a34, w5_ref[...]) + b5_ref[...]).astype(_DOT_DTYPE)

    # ---- conv6: 3x3/s1, 32->64 on 8x8, residual added AFTER Mish ------------
    cols = jnp.dot(g6_ref[...], a5,
                   preferred_element_type=f32).astype(_DOT_DTYPE)  # (576, 32)
    acc = jnp.zeros((64, 64), f32)
    for tap in range(9):
        acc = acc + jnp.dot(cols[tap * 64:(tap + 1) * 64], w6_ref[tap],
                            preferred_element_type=f32)
    x6 = (_mish(acc + b6_ref[...]) + x4).astype(_DOT_DTYPE)      # (64, 64)

    # ---- conv7: 1x1, 64->64 --------------------------------------------------
    x7 = _mish(_dot(x6, w7_ref[...]) + b7_ref[...]).astype(_DOT_DTYPE)

    # ---- conv8: 1x1 over cat([x7, x3], C)  ==  split-K sum of two dots -------
    acc = _dot(x7, w8a_ref[...]) + _dot(a34, w8b_ref[...])
    out_ref[0] = _mish(acc + b8_ref[...]).astype(out_ref.dtype)


# ----------------------------------------------------------------------------
# Parameter construction (deterministic, BN folded into conv weight/bias).
# ----------------------------------------------------------------------------
_LAYER_CFG = {
    "conv1": (3, 32, 3, 1),
    "conv2": (32, 64, 3, 2),
    "conv3": (64, 64, 1, 1),
    "conv4": (64, 64, 1, 1),
    "conv5": (64, 32, 1, 1),
    "conv6": (32, 64, 3, 1),
    "conv7": (64, 64, 1, 1),
    "conv8": (128, 64, 1, 1),
}


def make_params(key):
    params = {}
    eps = 1e-5
    for name, (cin, cout, k, s) in _LAYER_CFG.items():
        key, kw, kg, kb, km, kv = jax.random.split(key, 6)
        fan_in = cin * k * k
        w = jax.random.normal(kw, (k, k, cin, cout), jnp.float32) * (fan_in ** -0.5)
        gamma = 1.0 + 0.1 * jax.random.normal(kg, (cout,), jnp.float32)
        beta = 0.1 * jax.random.normal(kb, (cout,), jnp.float32)
        mean = 0.1 * jax.random.normal(km, (cout,), jnp.float32)
        var = jnp.abs(jax.random.normal(kv, (cout,), jnp.float32)) + 0.5
        scale = gamma / jnp.sqrt(var + eps)
        w_folded = w * scale                  # broadcast over last (Cout) axis
        b_folded = beta - mean * scale
        params[name] = (w_folded, b_folded, k, s)
    return params


def _pack_kernel_args(params):
    """Rearrange folded HWIO weights into the kernel's layouts (bf16 MXU side,
    f32 biases).  conv1 weight padded K 27->32; conv3/conv4 merged (order
    [conv4|conv3]); conv5/conv8 weights zero-padded so x3/x4 never have to be
    repacked in-kernel."""
    dt = _DOT_DTYPE

    def get(name):
        w, b, _, _ = params[name]
        return w, b

    w1, b1 = get("conv1")
    w2, b2 = get("conv2")
    w3, b3 = get("conv3")
    w4, b4 = get("conv4")
    w5, b5 = get("conv5")
    w6, b6 = get("conv6")
    w7, b7 = get("conv7")
    w8, b8 = get("conv8")

    w1p = jnp.concatenate([w1.reshape(27, 32), jnp.zeros((5, 32), jnp.float32)],
                          axis=0)
    w8m = w8.reshape(128, 64)
    return (
        w1p.astype(dt), b1.reshape(1, 32),
        w2.reshape(9, 32, 64).astype(dt), b2.reshape(1, 64),
        # merged conv3/conv4 (conv4 first so x4 = a34[:, :64])
        jnp.concatenate([w4.reshape(64, 64), w3.reshape(64, 64)], axis=1).astype(dt),
        jnp.concatenate([b4, b3], axis=0).reshape(1, 128),
        # conv5 reads only the x4 half of a34 -> zero rows for the x3 half
        jnp.concatenate([w5.reshape(64, 32), jnp.zeros((64, 32), jnp.float32)],
                        axis=0).astype(dt),
        b5.reshape(1, 32),
        w6.reshape(9, 32, 64).astype(dt), b6.reshape(1, 64),
        w7.reshape(64, 64).astype(dt), b7.reshape(1, 64),
        # conv8 split-K: first 64 input channels act on x7, last 64 on x3
        w8m[:64].astype(dt),
        jnp.concatenate([jnp.zeros((64, 64), jnp.float32), w8m[64:]],
                        axis=0).astype(dt),
        b8.reshape(1, 64),
    )


def _const_spec(shape):
    zeros = (0,) * len(shape)
    return pl.BlockSpec(shape, lambda n, _z=zeros: _z)


# ----------------------------------------------------------------------------
# DownSample1 forward: one pallas_call for the whole block.
# Input is NCHW (like the PyTorch module), output is NCHW (N, 64, 8, 8).
# ----------------------------------------------------------------------------
def downsample1_forward(params, x_nchw):
    N, C, H, W = x_nchw.shape
    assert (C, H, W) == (3, 16, 16), (C, H, W)

    # Tiny host-side im2col of the raw input so conv1 is a single aligned dot.
    x = jnp.transpose(x_nchw, (0, 2, 3, 1))                      # NHWC
    xp = jnp.pad(x, ((0, 0), (1, 1), (1, 1), (0, 0)))            # (N, 18, 18, 3)
    patches = [xp[:, di:di + 16, dj:dj + 16, :]
               for di in range(3) for dj in range(3)]
    col = jnp.concatenate(patches, axis=-1).reshape(N, 256, 27)  # (N, 256, 27)
    col = jnp.pad(col, ((0, 0), (0, 0), (0, 5))).astype(_DOT_DTYPE)  # K->32

    g2 = jnp.asarray(_G2_NP, _DOT_DTYPE)                         # (576, 256)
    g6 = jnp.asarray(_G6_NP, _DOT_DTYPE)                         # (576, 64)

    args = (col, g2, g6) + _pack_kernel_args(params)

    in_specs = [pl.BlockSpec((1, 256, 32), lambda n: (n, 0, 0))]
    for a in args[1:]:
        in_specs.append(_const_spec(a.shape))
    out_spec = pl.BlockSpec((1, 64, 64), lambda n: (n, 0, 0))

    out = pl.pallas_call(
        _downsample1_kernel,
        out_shape=jax.ShapeDtypeStruct((N, 64, 64), jnp.float32),
        grid_spec=pltpu.PrefetchScalarGridSpec(
            num_scalar_prefetch=0,
            grid=(N,),
            in_specs=in_specs,
            out_specs=out_spec,
        ),
        compiler_params=pltpu.CompilerParams(
            dimension_semantics=("parallel",),   # v7x: one batch element per TC
        ),
    )(*args)

    out = out.reshape(N, 8, 8, 64)                               # (H*W,C) -> HWC
    return jnp.transpose(out, (0, 3, 1, 2))                      # NCHW


# ----------------------------------------------------------------------------
# Pure-JAX reference (lax.conv).  It mirrors the kernel's MXU precision policy
# (bf16 conv inputs, f32 accumulation/epilogue) but uses the exact
# tanh(softplus) Mish, so the comparison checks the kernel's math, not bf16
# rounding noise.
# ----------------------------------------------------------------------------
def downsample1_reference(params, x_nchw):
    x = jnp.transpose(x_nchw, (0, 2, 3, 1))

    def cba(name, x, residual=None):
        w, b, k, s = params[name]
        pad = (k - 1) // 2
        y = lax.conv_general_dilated(
            x.astype(_DOT_DTYPE), w.astype(_DOT_DTYPE), (s, s),
            ((pad, pad), (pad, pad)),
            dimension_numbers=("NHWC", "HWIO", "NHWC"),
            preferred_element_type=jnp.float32,
        )
        y = y + b
        y = y * jnp.tanh(jax.nn.softplus(y))
        if residual is not None:
            y = y + residual
        return y

    x1 = cba("conv1", x)
    x2 = cba("conv2", x1)
    x3 = cba("conv3", x2)
    x4 = cba("conv4", x2)
    x5 = cba("conv5", x4)
    x6 = cba("conv6", x5, residual=x4)        # residual after activation
    x7 = cba("conv7", x6)
    x7 = jnp.concatenate([x7, x3], axis=-1)   # torch.cat(dim=1) -> channel axis
    x8 = cba("conv8", x7)
    return jnp.transpose(x8, (0, 3, 1, 2))


if __name__ == "__main__":
    key = jax.random.PRNGKey(0)
    kp, kx = jax.random.split(key)
    params = make_params(kp)

    # Same input as the PyTorch module: (2, 3, 16, 16) NCHW.
    x = jax.random.normal(kx, (2, 3, 16, 16), jnp.float32)

    fwd = jax.jit(functools.partial(downsample1_forward, params))
    out = jax.block_until_ready(fwd(x))
    assert out.shape == (2, 64, 8, 8), out.shape

    ref = jax.block_until_ready(downsample1_reference(params, x))
    assert jnp.all(jnp.isfinite(out))
    max_err = float(jnp.max(jnp.abs(out - ref)))
    assert jnp.allclose(out, ref, atol=2e-2, rtol=2e-2), max_err

    print("KERNEL_OK")
</pallas_src>

<mosaic_0001>
module attributes {stable_mosaic.version = 11 : i64} {
  func.func @_downsample1_kernel(%arg0: i32, %arg1: memref<1x256x32xbf16, #tpu.memory_space<vmem>>, %arg2: memref<576x256xbf16, #tpu.memory_space<vmem>>, %arg3: memref<576x64xbf16, #tpu.memory_space<vmem>>, %arg4: memref<32x32xbf16, #tpu.memory_space<vmem>>, %arg5: memref<1x32xf32, #tpu.memory_space<vmem>>, %arg6: memref<9x32x64xbf16, #tpu.memory_space<vmem>>, %arg7: memref<1x64xf32, #tpu.memory_space<vmem>>, %arg8: memref<64x128xbf16, #tpu.memory_space<vmem>>, %arg9: memref<1x128xf32, #tpu.memory_space<vmem>>, %arg10: memref<128x32xbf16, #tpu.memory_space<vmem>>, %arg11: memref<1x32xf32, #tpu.memory_space<vmem>>, %arg12: memref<9x32x64xbf16, #tpu.memory_space<vmem>>, %arg13: memref<1x64xf32, #tpu.memory_space<vmem>>, %arg14: memref<64x64xbf16, #tpu.memory_space<vmem>>, %arg15: memref<1x64xf32, #tpu.memory_space<vmem>>, %arg16: memref<64x64xbf16, #tpu.memory_space<vmem>>, %arg17: memref<128x64xbf16, #tpu.memory_space<vmem>>, %arg18: memref<1x64xf32, #tpu.memory_space<vmem>>, %arg19: memref<1x64x64xf32, #tpu.memory_space<vmem>>) attributes {dimension_semantics = [#tpu.dimension_semantics<parallel>], iteration_bounds = array<i64: 2>, scalar_prefetch = 0 : i64, scratch_operands = 0 : i64, tpu.core_type = #tpu.core_type<tc>, window_params = [{transform_indices = @transform_0, window_bounds = array<i64: 1, 256, 32>}, {pipeline_mode = #tpu.pipeline_mode<synchronous>, transform_indices = @transform_1, window_bounds = array<i64: 576, 256>}, {pipeline_mode = #tpu.pipeline_mode<synchronous>, transform_indices = @transform_2, window_bounds = array<i64: 576, 64>}, {pipeline_mode = #tpu.pipeline_mode<synchronous>, transform_indices = @transform_3, window_bounds = array<i64: 32, 32>}, {pipeline_mode = #tpu.pipeline_mode<synchronous>, transform_indices = @transform_4, window_bounds = array<i64: 1, 32>}, {pipeline_mode = #tpu.pipeline_mode<synchronous>, transform_indices = @transform_5, window_bounds = array<i64: 9, 32, 64>}, {pipeline_mode = #tpu.pipeline_mode<synchronous>, transform_indices = @transform_6, window_bounds = array<i64: 1, 64>}, {pipeline_mode = #tpu.pipeline_mode<synchronous>, transform_indices = @transform_7, window_bounds = array<i64: 64, 128>}, {pipeline_mode = #tpu.pipeline_mode<synchronous>, transform_indices = @transform_8, window_bounds = array<i64: 1, 128>}, {pipeline_mode = #tpu.pipeline_mode<synchronous>, transform_indices = @transform_9, window_bounds = array<i64: 128, 32>}, {pipeline_mode = #tpu.pipeline_mode<synchronous>, transform_indices = @transform_10, window_bounds = array<i64: 1, 32>}, {pipeline_mode = #tpu.pipeline_mode<synchronous>, transform_indices = @transform_11, window_bounds = array<i64: 9, 32, 64>}, {pipeline_mode = #tpu.pipeline_mode<synchronous>, transform_indices = @transform_12, window_bounds = array<i64: 1, 64>}, {pipeline_mode = #tpu.pipeline_mode<synchronous>, transform_indices = @transform_13, window_bounds = array<i64: 64, 64>}, {pipeline_mode = #tpu.pipeline_mode<synchronous>, transform_indices = @transform_14, window_bounds = array<i64: 1, 64>}, {pipeline_mode = #tpu.pipeline_mode<synchronous>, transform_indices = @transform_15, window_bounds = array<i64: 64, 64>}, {pipeline_mode = #tpu.pipeline_mode<synchronous>, transform_indices = @transform_16, window_bounds = array<i64: 128, 64>}, {pipeline_mode = #tpu.pipeline_mode<synchronous>, transform_indices = @transform_17, window_bounds = array<i64: 1, 64>}, {transform_indices = @transform_18, window_bounds = array<i64: 1, 64, 64>}]} {
    %c0 = arith.constant 0 : index
    %c0_0 = arith.constant 0 : index
    %c0_1 = arith.constant 0 : index
    %0 = vector.load %arg1[%c0, %c0_0, %c0_1] : memref<1x256x32xbf16, #tpu.memory_space<vmem>>, vector<1x256x32xbf16>
    %1 = vector.shape_cast %0 : vector<1x256x32xbf16> to vector<256x32xbf16>
    %c0_2 = arith.constant 0 : index
    %c0_3 = arith.constant 0 : index
    %2 = vector.load %arg4[%c0_2, %c0_3] : memref<32x32xbf16, #tpu.memory_space<vmem>>, vector<32x32xbf16>
    %cst = arith.constant dense<0.000000e+00> : vector<256x32xf32>
    %3 = tpu.matmul %1, %2, %cst {dimension_numbers = #tpu.dot_dimension_numbers<[1], [0], [0], [1], [0, 0, 1, 1], [], []>} : vector<256x32xbf16>, vector<32x32xbf16>, vector<256x32xf32> -> vector<256x32xf32>
    %c0_4 = arith.constant 0 : index
    %c0_5 = arith.constant 0 : index
    %4 = vector.load %arg5[%c0_4, %c0_5] : memref<1x32xf32, #tpu.memory_space<vmem>>, vector<1x32xf32>
    %5 = vector.broadcast %4 : vector<1x32xf32> to vector<256x32xf32>
    %6 = arith.addf %3, %5 : vector<256x32xf32>
    %cst_6 = arith.constant 2.000000e+01 : f32
    %7 = vector.broadcast %cst_6 : f32 to vector<256x32xf32>
    %8 = arith.minimumf %6, %7 : vector<256x32xf32>
    %9 = math.exp %8 : vector<256x32xf32>
    %cst_7 = arith.constant 2.000000e+00 : f32
    %10 = vector.broadcast %cst_7 : f32 to vector<256x32xf32>
    %11 = arith.addf %9, %10 : vector<256x32xf32>
    %12 = arith.mulf %9, %11 : vector<256x32xf32>
    %cst_8 = arith.constant 2.000000e+00 : f32
    %13 = vector.broadcast %cst_8 : f32 to vector<256x32xf32>
    %14 = arith.addf %12, %13 : vector<256x32xf32>
    %15 = tpu.reciprocal %14 {approx = true} : vector<256x32xf32> -> vector<256x32xf32>
    %16 = arith.mulf %14, %15 : vector<256x32xf32>
    %cst_9 = arith.constant 2.000000e+00 : f32
    %17 = vector.broadcast %cst_9 : f32 to vector<256x32xf32>
    %18 = arith.subf %17, %16 : vector<256x32xf32>
    %19 = arith.mulf %15, %18 : vector<256x32xf32>
    %cst_10 = arith.constant 2.000000e+01 : f32
    %20 = vector.broadcast %cst_10 : f32 to vector<256x32xf32>
    %21 = arith.cmpf ogt, %6, %20 : vector<256x32xf32>
    %22 = arith.mulf %6, %12 : vector<256x32xf32>
    %23 = arith.mulf %22, %19 : vector<256x32xf32>
    %24 = arith.select %21, %6, %23 : vector<256x32xi1>, vector<256x32xf32>
    %25 = arith.truncf %24 : vector<256x32xf32> to vector<256x32xbf16>
    %c0_11 = arith.constant 0 : index
    %c0_12 = arith.constant 0 : index
    %26 = vector.load %arg2[%c0_11, %c0_12] : memref<576x256xbf16, #tpu.memory_space<vmem>>, vector<576x256xbf16>
    %cst_13 = arith.constant dense<0.000000e+00> : vector<576x32xf32>
    %27 = tpu.matmul %26, %25, %cst_13 {dimension_numbers = #tpu.dot_dimension_numbers<[1], [0], [0], [1], [0, 0, 1, 1], [], []>} : vector<576x256xbf16>, vector<256x32xbf16>, vector<576x32xf32> -> vector<576x32xf32>
    %28 = arith.truncf %27 : vector<576x32xf32> to vector<576x32xbf16>
    %cst_14 = arith.constant 0.000000e+00 : f32
    %29 = vector.broadcast %cst_14 : f32 to vector<64x64xf32>
    %30 = vector.extract_strided_slice %28 {offsets = [0, 0], sizes = [64, 32], strides = [1, 1]} : vector<576x32xbf16> to vector<64x32xbf16>
    %c0_15 = arith.constant 0 : index
    %c0_16 = arith.constant 0 : index
    %c0_17 = arith.constant 0 : index
    %31 = vector.load %arg6[%c0_15, %c0_16, %c0_17] : memref<9x32x64xbf16, #tpu.memory_space<vmem>>, vector<1x32x64xbf16>
    %32 = vector.shape_cast %31 : vector<1x32x64xbf16> to vector<32x64xbf16>
    %cst_18 = arith.constant dense<0.000000e+00> : vector<64x64xf32>
    %33 = tpu.matmul %30, %32, %cst_18 {dimension_numbers = #tpu.dot_dimension_numbers<[1], [0], [0], [1], [0, 0, 1, 1], [], []>} : vector<64x32xbf16>, vector<32x64xbf16>, vector<64x64xf32> -> vector<64x64xf32>
    %34 = arith.addf %29, %33 : vector<64x64xf32>
    %35 = vector.extract_strided_slice %28 {offsets = [64, 0], sizes = [64, 32], strides = [1, 1]} : vector<576x32xbf16> to vector<64x32xbf16>
    %c1 = arith.constant 1 : index
    %c0_19 = arith.constant 0 : index
    %c0_20 = arith.constant 0 : index
    %36 = vector.load %arg6[%c1, %c0_19, %c0_20] : memref<9x32x64xbf16, #tpu.memory_space<vmem>>, vector<1x32x64xbf16>
    %37 = vector.shape_cast %36 : vector<1x32x64xbf16> to vector<32x64xbf16>
    %cst_21 = arith.constant dense<0.000000e+00> : vector<64x64xf32>
    %38 = tpu.matmul %35, %37, %cst_21 {dimension_numbers = #tpu.dot_dimension_numbers<[1], [0], [0], [1], [0, 0, 1, 1], [], []>} : vector<64x32xbf16>, vector<32x64xbf16>, vector<64x64xf32> -> vector<64x64xf32>
    %39 = arith.addf %34, %38 : vector<64x64xf32>
    %40 = vector.extract_strided_slice %28 {offsets = [128, 0], sizes = [64, 32], strides = [1, 1]} : vector<576x32xbf16> to vector<64x32xbf16>
    %c2 = arith.constant 2 : index
    %c0_22 = arith.constant 0 : index
    %c0_23 = arith.constant 0 : index
    %41 = vector.load %arg6[%c2, %c0_22, %c0_23] : memref<9x32x64xbf16, #tpu.memory_space<vmem>>, vector<1x32x64xbf16>
    %42 = vector.shape_cast %41 : vector<1x32x64xbf16> to vector<32x64xbf16>
    %cst_24 = arith.constant dense<0.000000e+00> : vector<64x64xf32>
    %43 = tpu.matmul %40, %42, %cst_24 {dimension_numbers = #tpu.dot_dimension_numbers<[1], [0], [0], [1], [0, 0, 1, 1], [], []>} : vector<64x32xbf16>, vector<32x64xbf16>, vector<64x64xf32> -> vector<64x64xf32>
    %44 = arith.addf %39, %43 : vector<64x64xf32>
    %45 = vector.extract_strided_slice %28 {offsets = [192, 0], sizes = [64, 32], strides = [1, 1]} : vector<576x32xbf16> to vector<64x32xbf16>
    %c3 = arith.constant 3 : index
    %c0_25 = arith.constant 0 : index
    %c0_26 = arith.constant 0 : index
    %46 = vector.load %arg6[%c3, %c0_25, %c0_26] : memref<9x32x64xbf16, #tpu.memory_space<vmem>>, vector<1x32x64xbf16>
    %47 = vector.shape_cast %46 : vector<1x32x64xbf16> to vector<32x64xbf16>
    %cst_27 = arith.constant dense<0.000000e+00> : vector<64x64xf32>
    %48 = tpu.matmul %45, %47, %cst_27 {dimension_numbers = #tpu.dot_dimension_numbers<[1], [0], [0], [1], [0, 0, 1, 1], [], []>} : vector<64x32xbf16>, vector<32x64xbf16>, vector<64x64xf32> -> vector<64x64xf32>
    %49 = arith.addf %44, %48 : vector<64x64xf32>
    %50 = vector.extract_strided_slice %28 {offsets = [256, 0], sizes = [64, 32], strides = [1, 1]} : vector<576x32xbf16> to vector<64x32xbf16>
    %c4 = arith.constant 4 : index
    %c0_28 = arith.constant 0 : index
    %c0_29 = arith.constant 0 : index
    %51 = vector.load %arg6[%c4, %c0_28, %c0_29] : memref<9x32x64xbf16, #tpu.memory_space<vmem>>, vector<1x32x64xbf16>
    %52 = vector.shape_cast %51 : vector<1x32x64xbf16> to vector<32x64xbf16>
    %cst_30 = arith.constant dense<0.000000e+00> : vector<64x64xf32>
    %53 = tpu.matmul %50, %52, %cst_30 {dimension_numbers = #tpu.dot_dimension_numbers<[1], [0], [0], [1], [0, 0, 1, 1], [], []>} : vector<64x32xbf16>, vector<32x64xbf16>, vector<64x64xf32> -> vector<64x64xf32>
    %54 = arith.addf %49, %53 : vector<64x64xf32>
    %55 = vector.extract_strided_slice %28 {offsets = [320, 0], sizes = [64, 32], strides = [1, 1]} : vector<576x32xbf16> to vector<64x32xbf16>
    %c5 = arith.constant 5 : index
    %c0_31 = arith.constant 0 : index
    %c0_32 = arith.constant 0 : index
    %56 = vector.load %arg6[%c5, %c0_31, %c0_32] : memref<9x32x64xbf16, #tpu.memory_space<vmem>>, vector<1x32x64xbf16>
    %57 = vector.shape_cast %56 : vector<1x32x64xbf16> to vector<32x64xbf16>
    %cst_33 = arith.constant dense<0.000000e+00> : vector<64x64xf32>
    %58 = tpu.matmul %55, %57, %cst_33 {dimension_numbers = #tpu.dot_dimension_numbers<[1], [0], [0], [1], [0, 0, 1, 1], [], []>} : vector<64x32xbf16>, vector<32x64xbf16>, vector<64x64xf32> -> vector<64x64xf32>
    %59 = arith.addf %54, %58 : vector<64x64xf32>
    %60 = vector.extract_strided_slice %28 {offsets = [384, 0], sizes = [64, 32], strides = [1, 1]} : vector<576x32xbf16> to vector<64x32xbf16>
    %c6 = arith.constant 6 : index
    %c0_34 = arith.constant 0 : index
    %c0_35 = arith.constant 0 : index
    %61 = vector.load %arg6[%c6, %c0_34, %c0_35] : memref<9x32x64xbf16, #tpu.memory_space<vmem>>, vector<1x32x64xbf16>
    %62 = vector.shape_cast %61 : vector<1x32x64xbf16> to vector<32x64xbf16>
    %cst_36 = arith.constant dense<0.000000e+00> : vector<64x64xf32>
    %63 = tpu.matmul %60, %62, %cst_36 {dimension_numbers = #tpu.dot_dimension_numbers<[1], [0], [0], [1], [0, 0, 1, 1], [], []>} : vector<64x32xbf16>, vector<32x64xbf16>, vector<64x64xf32> -> vector<64x64xf32>
    %64 = arith.addf %59, %63 : vector<64x64xf32>
    %65 = vector.extract_strided_slice %28 {offsets = [448, 0], sizes = [64, 32], strides = [1, 1]} : vector<576x32xbf16> to vector<64x32xbf16>
    %c7 = arith.constant 7 : index
    %c0_37 = arith.constant 0 : index
    %c0_38 = arith.constant 0 : index
    %66 = vector.load %arg6[%c7, %c0_37, %c0_38] : memref<9x32x64xbf16, #tpu.memory_space<vmem>>, vector<1x32x64xbf16>
    %67 = vector.shape_cast %66 : vector<1x32x64xbf16> to vector<32x64xbf16>
    %cst_39 = arith.constant dense<0.000000e+00> : vector<64x64xf32>
    %68 = tpu.matmul %65, %67, %cst_39 {dimension_numbers = #tpu.dot_dimension_numbers<[1], [0], [0], [1], [0, 0, 1, 1], [], []>} : vector<64x32xbf16>, vector<32x64xbf16>, vector<64x64xf32> -> vector<64x64xf32>
    %69 = arith.addf %64, %68 : vector<64x64xf32>
    %70 = vector.extract_strided_slice %28 {offsets = [512, 0], sizes = [64, 32], strides = [1, 1]} : vector<576x32xbf16> to vector<64x32xbf16>
    %c8 = arith.constant 8 : index
    %c0_40 = arith.constant 0 : index
    %c0_41 = arith.constant 0 : index
    %71 = vector.load %arg6[%c8, %c0_40, %c0_41] : memref<9x32x64xbf16, #tpu.memory_space<vmem>>, vector<1x32x64xbf16>
    %72 = vector.shape_cast %71 : vector<1x32x64xbf16> to vector<32x64xbf16>
    %cst_42 = arith.constant dense<0.000000e+00> : vector<64x64xf32>
    %73 = tpu.matmul %70, %72, %cst_42 {dimension_numbers = #tpu.dot_dimension_numbers<[1], [0], [0], [1], [0, 0, 1, 1], [], []>} : vector<64x32xbf16>, vector<32x64xbf16>, vector<64x64xf32> -> vector<64x64xf32>
    %74 = arith.addf %69, %73 : vector<64x64xf32>
    %c0_43 = arith.constant 0 : index
    %c0_44 = arith.constant 0 : index
    %75 = vector.load %arg7[%c0_43, %c0_44] : memref<1x64xf32, #tpu.memory_space<vmem>>, vector<1x64xf32>
    %76 = vector.broadcast %75 : vector<1x64xf32> to vector<64x64xf32>
    %77 = arith.addf %74, %76 : vector<64x64xf32>
    %cst_45 = arith.constant 2.000000e+01 : f32
    %78 = vector.broadcast %cst_45 : f32 to vector<64x64xf32>
    %79 = arith.minimumf %77, %78 : vector<64x64xf32>
    %80 = math.exp %79 : vector<64x64xf32>
    %cst_46 = arith.constant 2.000000e+00 : f32
    %81 = vector.broadcast %cst_46 : f32 to vector<64x64xf32>
    %82 = arith.addf %80, %81 : vector<64x64xf32>
    %83 = arith.mulf %80, %82 : vector<64x64xf32>
    %cst_47 = arith.constant 2.000000e+00 : f32
    %84 = vector.broadcast %cst_47 : f32 to vector<64x64xf32>
    %85 = arith.addf %83, %84 : vector<64x64xf32>
    %86 = tpu.reciprocal %85 {approx = true} : vector<64x64xf32> -> vector<64x64xf32>
    %87 = arith.mulf %85, %86 : vector<64x64xf32>
    %cst_48 = arith.constant 2.000000e+00 : f32
    %88 = vector.broadcast %cst_48 : f32 to vector<64x64xf32>
    %89 = arith.subf %88, %87 : vector<64x64xf32>
    %90 = arith.mulf %86, %89 : vector<64x64xf32>
    %cst_49 = arith.constant 2.000000e+01 : f32
    %91 = vector.broadcast %cst_49 : f32 to vector<64x64xf32>
    %92 = arith.cmpf ogt, %77, %91 : vector<64x64xf32>
    %93 = arith.mulf %77, %83 : vector<64x64xf32>
    %94 = arith.mulf %93, %90 : vector<64x64xf32>
    %95 = arith.select %92, %77, %94 : vector<64x64xi1>, vector<64x64xf32>
    %96 = arith.truncf %95 : vector<64x64xf32> to vector<64x64xbf16>
    %c0_50 = arith.constant 0 : index
    %c0_51 = arith.constant 0 : index
    %97 = vector.load %arg8[%c0_50, %c0_51] : memref<64x128xbf16, #tpu.memory_space<vmem>>, vector<64x128xbf16>
    %cst_52 = arith.constant dense<0.000000e+00> : vector<64x128xf32>
    %98 = tpu.matmul %96, %97, %cst_52 {dimension_numbers = #tpu.dot_dimension_numbers<[1], [0], [0], [1], [0, 0, 1, 1], [], []>} : vector<64x64xbf16>, vector<64x128xbf16>, vector<64x128xf32> -> vector<64x128xf32>
    %c0_53 = arith.constant 0 : index
    %c0_54 = arith.constant 0 : index
    %99 = vector.load %arg9[%c0_53, %c0_54] : memref<1x128xf32, #tpu.memory_space<vmem>>, vector<1x128xf32>
    %100 = vector.broadcast %99 : vector<1x128xf32> to vector<64x128xf32>
    %101 = arith.addf %98, %100 : vector<64x128xf32>
    %cst_55 = arith.constant 2.000000e+01 : f32
    %102 = vector.broadcast %cst_55 : f32 to vector<64x128xf32>
    %103 = arith.minimumf %101, %102 : vector<64x128xf32>
    %104 = math.exp %103 : vector<64x128xf32>
    %cst_56 = arith.constant 2.000000e+00 : f32
    %105 = vector.broadcast %cst_56 : f32 to vector<64x128xf32>
    %106 = arith.addf %104, %105 : vector<64x128xf32>
    %107 = arith.mulf %104, %106 : vector<64x128xf32>
    %cst_57 = arith.constant 2.000000e+00 : f32
    %108 = vector.broadcast %cst_57 : f32 to vector<64x128xf32>
    %109 = arith.addf %107, %108 : vector<64x128xf32>
    %110 = tpu.reciprocal %109 {approx = true} : vector<64x128xf32> -> vector<64x128xf32>
    %111 = arith.mulf %109, %110 : vector<64x128xf32>
    %cst_58 = arith.constant 2.000000e+00 : f32
    %112 = vector.broadcast %cst_58 : f32 to vector<64x128xf32>
    %113 = arith.subf %112, %111 : vector<64x128xf32>
    %114 = arith.mulf %110, %113 : vector<64x128xf32>
    %cst_59 = arith.constant 2.000000e+01 : f32
    %115 = vector.broadcast %cst_59 : f32 to vector<64x128xf32>
    %116 = arith.cmpf ogt, %101, %115 : vector<64x128xf32>
    %117 = arith.mulf %101, %107 : vector<64x128xf32>
    %118 = arith.mulf %117, %114 : vector<64x128xf32>
    %119 = arith.select %116, %101, %118 : vector<64x128xi1>, vector<64x128xf32>
    %120 = vector.extract_strided_slice %119 {offsets = [0, 0], sizes = [64, 64], strides = [1, 1]} : vector<64x128xf32> to vector<64x64xf32>
    %121 = arith.truncf %119 : vector<64x128xf32> to vector<64x128xbf16>
    %c0_60 = arith.constant 0 : index
    %c0_61 = arith.constant 0 : index
    %122 = vector.load %arg10[%c0_60, %c0_61] : memref<128x32xbf16, #tpu.memory_space<vmem>>, vector<128x32xbf16>
    %cst_62 = arith.constant dense<0.000000e+00> : vector<64x32xf32>
    %123 = tpu.matmul %121, %122, %cst_62 {dimension_numbers = #tpu.dot_dimension_numbers<[1], [0], [0], [1], [0, 0, 1, 1], [], []>} : vector<64x128xbf16>, vector<128x32xbf16>, vector<64x32xf32> -> vector<64x32xf32>
    %c0_63 = arith.constant 0 : index
    %c0_64 = arith.constant 0 : index
    %124 = vector.load %arg11[%c0_63, %c0_64] : memref<1x32xf32, #tpu.memory_space<vmem>>, vector<1x32xf32>
    %125 = vector.broadcast %124 : vector<1x32xf32> to vector<64x32xf32>
    %126 = arith.addf %123, %125 : vector<64x32xf32>
    %cst_65 = arith.constant 2.000000e+01 : f32
    %127 = vector.broadcast %cst_65 : f32 to vector<64x32xf32>
    %128 = arith.minimumf %126, %127 : vector<64x32xf32>
    %129 = math.exp %128 : vector<64x32xf32>
    %cst_66 = arith.constant 2.000000e+00 : f32
    %130 = vector.broadcast %cst_66 : f32 to vector<64x32xf32>
    %131 = arith.addf %129, %130 : vector<64x32xf32>
    %132 = arith.mulf %129, %131 : vector<64x32xf32>
    %cst_67 = arith.constant 2.000000e+00 : f32
    %133 = vector.broadcast %cst_67 : f32 to vector<64x32xf32>
    %134 = arith.addf %132, %133 : vector<64x32xf32>
    %135 = tpu.reciprocal %134 {approx = true} : vector<64x32xf32> -> vector<64x32xf32>
    %136 = arith.mulf %134, %135 : vector<64x32xf32>
    %cst_68 = arith.constant 2.000000e+00 : f32
    %137 = vector.broadcast %cst_68 : f32 to vector<64x32xf32>
    %138 = arith.subf %137, %136 : vector<64x32xf32>
    %139 = arith.mulf %135, %138 : vector<64x32xf32>
    %cst_69 = arith.constant 2.000000e+01 : f32
    %140 = vector.broadcast %cst_69 : f32 to vector<64x32xf32>
    %141 = arith.cmpf ogt, %126, %140 : vector<64x32xf32>
    %142 = arith.mulf %126, %132 : vector<64x32xf32>
    %143 = arith.mulf %142, %139 : vector<64x32xf32>
    %144 = arith.select %141, %126, %143 : vector<64x32xi1>, vector<64x32xf32>
    %145 = arith.truncf %144 : vector<64x32xf32> to vector<64x32xbf16>
    %c0_70 = arith.constant 0 : index
    %c0_71 = arith.constant 0 : index
    %146 = vector.load %arg3[%c0_70, %c0_71] : memref<576x64xbf16, #tpu.memory_space<vmem>>, vector<576x64xbf16>
    %cst_72 = arith.constant dense<0.000000e+00> : vector<576x32xf32>
    %147 = tpu.matmul %146, %145, %cst_72 {dimension_numbers = #tpu.dot_dimension_numbers<[1], [0], [0], [1], [0, 0, 1, 1], [], []>} : vector<576x64xbf16>, vector<64x32xbf16>, vector<576x32xf32> -> vector<576x32xf32>
    %148 = arith.truncf %147 : vector<576x32xf32> to vector<576x32xbf16>
    %cst_73 = arith.constant 0.000000e+00 : f32
    %149 = vector.broadcast %cst_73 : f32 to vector<64x64xf32>
    %150 = vector.extract_strided_slice %148 {offsets = [0, 0], sizes = [64, 32], strides = [1, 1]} : vector<576x32xbf16> to vector<64x32xbf16>
    %c0_74 = arith.constant 0 : index
    %c0_75 = arith.constant 0 : index
    %c0_76 = arith.constant 0 : index
    %151 = vector.load %arg12[%c0_74, %c0_75, %c0_76] : memref<9x32x64xbf16, #tpu.memory_space<vmem>>, vector<1x32x64xbf16>
    %152 = vector.shape_cast %151 : vector<1x32x64xbf16> to vector<32x64xbf16>
    %cst_77 = arith.constant dense<0.000000e+00> : vector<64x64xf32>
    %153 = tpu.matmul %150, %152, %cst_77 {dimension_numbers = #tpu.dot_dimension_numbers<[1], [0], [0], [1], [0, 0, 1, 1], [], []>} : vector<64x32xbf16>, vector<32x64xbf16>, vector<64x64xf32> -> vector<64x64xf32>
    %154 = arith.addf %149, %153 : vector<64x64xf32>
    %155 = vector.extract_strided_slice %148 {offsets = [64, 0], sizes = [64, 32], strides = [1, 1]} : vector<576x32xbf16> to vector<64x32xbf16>
    %c1_78 = arith.constant 1 : index
    %c0_79 = arith.constant 0 : index
    %c0_80 = arith.constant 0 : index
    %156 = vector.load %arg12[%c1_78, %c0_79, %c0_80] : memref<9x32x64xbf16, #tpu.memory_space<vmem>>, vector<1x32x64xbf16>
    %157 = vector.shape_cast %156 : vector<1x32x64xbf16> to vector<32x64xbf16>
    %cst_81 = arith.constant dense<0.000000e+00> : vector<64x64xf32>
    %158 = tpu.matmul %155, %157, %cst_81 {dimension_numbers = #tpu.dot_dimension_numbers<[1], [0], [0], [1], [0, 0, 1, 1], [], []>} : vector<64x32xbf16>, vector<32x64xbf16>, vector<64x64xf32> -> vector<64x64xf32>
    %159 = arith.addf %154, %158 : vector<64x64xf32>
    %160 = vector.extract_strided_slice %148 {offsets = [128, 0], sizes = [64, 32], strides = [1, 1]} : vector<576x32xbf16> to vector<64x32xbf16>
    %c2_82 = arith.constant 2 : index
    %c0_83 = arith.constant 0 : index
    %c0_84 = arith.constant 0 : index
    %161 = vector.load %arg12[%c2_82, %c0_83, %c0_84] : memref<9x32x64xbf16, #tpu.memory_space<vmem>>, vector<1x32x64xbf16>
    %162 = vector.shape_cast %161 : vector<1x32x64xbf16> to vector<32x64xbf16>
    %cst_85 = arith.constant dense<0.000000e+00> : vector<64x64xf32>
    %163 = tpu.matmul %160, %162, %cst_85 {dimension_numbers = #tpu.dot_dimension_numbers<[1], [0], [0], [1], [0, 0, 1, 1], [], []>} : vector<64x32xbf16>, vector<32x64xbf16>, vector<64x64xf32> -> vector<64x64xf32>
    %164 = arith.addf %159, %163 : vector<64x64xf32>
    %165 = vector.extract_strided_slice %148 {offsets = [192, 0], sizes = [64, 32], strides = [1, 1]} : vector<576x32xbf16> to vector<64x32xbf16>
    %c3_86 = arith.constant 3 : index
    %c0_87 = arith.constant 0 : index
    %c0_88 = arith.constant 0 : index
    %166 = vector.load %arg12[%c3_86, %c0_87, %c0_88] : memref<9x32x64xbf16, #tpu.memory_space<vmem>>, vector<1x32x64xbf16>
    %167 = vector.shape_cast %166 : vector<1x32x64xbf16> to vector<32x64xbf16>
    %cst_89 = arith.constant dense<0.000000e+00> : vector<64x64xf32>
    %168 = tpu.matmul %165, %167, %cst_89 {dimension_numbers = #tpu.dot_dimension_numbers<[1], [0], [0], [1], [0, 0, 1, 1], [], []>} : vector<64x32xbf16>, vector<32x64xbf16>, vector<64x64xf32> -> vector<64x64xf32>
    %169 = arith.addf %164, %168 : vector<64x64xf32>
    %170 = vector.extract_strided_slice %148 {offsets = [256, 0], sizes = [64, 32], strides = [1, 1]} : vector<576x32xbf16> to vector<64x32xbf16>
    %c4_90 = arith.constant 4 : index
    %c0_91 = arith.constant 0 : index
    %c0_92 = arith.constant 0 : index
    %171 = vector.load %arg12[%c4_90, %c0_91, %c0_92] : memref<9x32x64xbf16, #tpu.memory_space<vmem>>, vector<1x32x64xbf16>
    %172 = vector.shape_cast %171 : vector<1x32x64xbf16> to vector<32x64xbf16>
    %cst_93 = arith.constant dense<0.000000e+00> : vector<64x64xf32>
    %173 = tpu.matmul %170, %172, %cst_93 {dimension_numbers = #tpu.dot_dimension_numbers<[1], [0], [0], [1], [0, 0, 1, 1], [], []>} : vector<64x32xbf16>, vector<32x64xbf16>, vector<64x64xf32> -> vector<64x64xf32>
    %174 = arith.addf %169, %173 : vector<64x64xf32>
    %175 = vector.extract_strided_slice %148 {offsets = [320, 0], sizes = [64, 32], strides = [1, 1]} : vector<576x32xbf16> to vector<64x32xbf16>
    %c5_94 = arith.constant 5 : index
    %c0_95 = arith.constant 0 : index
    %c0_96 = arith.constant 0 : index
    %176 = vector.load %arg12[%c5_94, %c0_95, %c0_96] : memref<9x32x64xbf16, #tpu.memory_space<vmem>>, vector<1x32x64xbf16>
    %177 = vector.shape_cast %176 : vector<1x32x64xbf16> to vector<32x64xbf16>
    %cst_97 = arith.constant dense<0.000000e+00> : vector<64x64xf32>
    %178 = tpu.matmul %175, %177, %cst_97 {dimension_numbers = #tpu.dot_dimension_numbers<[1], [0], [0], [1], [0, 0, 1, 1], [], []>} : vector<64x32xbf16>, vector<32x64xbf16>, vector<64x64xf32> -> vector<64x64xf32>
    %179 = arith.addf %174, %178 : vector<64x64xf32>
    %180 = vector.extract_strided_slice %148 {offsets = [384, 0], sizes = [64, 32], strides = [1, 1]} : vector<576x32xbf16> to vector<64x32xbf16>
    %c6_98 = arith.constant 6 : index
    %c0_99 = arith.constant 0 : index
    %c0_100 = arith.constant 0 : index
    %181 = vector.load %arg12[%c6_98, %c0_99, %c0_100] : memref<9x32x64xbf16, #tpu.memory_space<vmem>>, vector<1x32x64xbf16>
    %182 = vector.shape_cast %181 : vector<1x32x64xbf16> to vector<32x64xbf16>
    %cst_101 = arith.constant dense<0.000000e+00> : vector<64x64xf32>
    %183 = tpu.matmul %180, %182, %cst_101 {dimension_numbers = #tpu.dot_dimension_numbers<[1], [0], [0], [1], [0, 0, 1, 1], [], []>} : vector<64x32xbf16>, vector<32x64xbf16>, vector<64x64xf32> -> vector<64x64xf32>
    %184 = arith.addf %179, %183 : vector<64x64xf32>
    %185 = vector.extract_strided_slice %148 {offsets = [448, 0], sizes = [64, 32], strides = [1, 1]} : vector<576x32xbf16> to vector<64x32xbf16>
    %c7_102 = arith.constant 7 : index
    %c0_103 = arith.constant 0 : index
    %c0_104 = arith.constant 0 : index
    %186 = vector.load %arg12[%c7_102, %c0_103, %c0_104] : memref<9x32x64xbf16, #tpu.memory_space<vmem>>, vector<1x32x64xbf16>
    %187 = vector.shape_cast %186 : vector<1x32x64xbf16> to vector<32x64xbf16>
    %cst_105 = arith.constant dense<0.000000e+00> : vector<64x64xf32>
    %188 = tpu.matmul %185, %187, %cst_105 {dimension_numbers = #tpu.dot_dimension_numbers<[1], [0], [0], [1], [0, 0, 1, 1], [], []>} : vector<64x32xbf16>, vector<32x64xbf16>, vector<64x64xf32> -> vector<64x64xf32>
    %189 = arith.addf %184, %188 : vector<64x64xf32>
    %190 = vector.extract_strided_slice %148 {offsets = [512, 0], sizes = [64, 32], strides = [1, 1]} : vector<576x32xbf16> to vector<64x32xbf16>
    %c8_106 = arith.constant 8 : index
    %c0_107 = arith.constant 0 : index
    %c0_108 = arith.constant 0 : index
    %191 = vector.load %arg12[%c8_106, %c0_107, %c0_108] : memref<9x32x64xbf16, #tpu.memory_space<vmem>>, vector<1x32x64xbf16>
    %192 = vector.shape_cast %191 : vector<1x32x64xbf16> to vector<32x64xbf16>
    %cst_109 = arith.constant dense<0.000000e+00> : vector<64x64xf32>
    %193 = tpu.matmul %190, %192, %cst_109 {dimension_numbers = #tpu.dot_dimension_numbers<[1], [0], [0], [1], [0, 0, 1, 1], [], []>} : vector<64x32xbf16>, vector<32x64xbf16>, vector<64x64xf32> -> vector<64x64xf32>
    %194 = arith.addf %189, %193 : vector<64x64xf32>
    %c0_110 = arith.constant 0 : index
    %c0_111 = arith.constant 0 : index
    %195 = vector.load %arg13[%c0_110, %c0_111] : memref<1x64xf32, #tpu.memory_space<vmem>>, vector<1x64xf32>
    %196 = vector.broadcast %195 : vector<1x64xf32> to vector<64x64xf32>
    %197 = arith.addf %194, %196 : vector<64x64xf32>
    %cst_112 = arith.constant 2.000000e+01 : f32
    %198 = vector.broadcast %cst_112 : f32 to vector<64x64xf32>
    %199 = arith.minimumf %197, %198 : vector<64x64xf32>
    %200 = math.exp %199 : vector<64x64xf32>
    %cst_113 = arith.constant 2.000000e+00 : f32
    %201 = vector.broadcast %cst_113 : f32 to vector<64x64xf32>
    %202 = arith.addf %200, %201 : vector<64x64xf32>
    %203 = arith.mulf %200, %202 : vector<64x64xf32>
    %cst_114 = arith.constant 2.000000e+00 : f32
    %204 = vector.broadcast %cst_114 : f32 to vector<64x64xf32>
    %205 = arith.addf %203, %204 : vector<64x64xf32>
    %206 = tpu.reciprocal %205 {approx = true} : vector<64x64xf32> -> vector<64x64xf32>
    %207 = arith.mulf %205, %206 : vector<64x64xf32>
    %cst_115 = arith.constant 2.000000e+00 : f32
    %208 = vector.broadcast %cst_115 : f32 to vector<64x64xf32>
    %209 = arith.subf %208, %207 : vector<64x64xf32>
    %210 = arith.mulf %206, %209 : vector<64x64xf32>
    %cst_116 = arith.constant 2.000000e+01 : f32
    %211 = vector.broadcast %cst_116 : f32 to vector<64x64xf32>
    %212 = arith.cmpf ogt, %197, %211 : vector<64x64xf32>
    %213 = arith.mulf %197, %203 : vector<64x64xf32>
    %214 = arith.mulf %213, %210 : vector<64x64xf32>
    %215 = arith.select %212, %197, %214 : vector<64x64xi1>, vector<64x64xf32>
    %216 = arith.addf %215, %120 : vector<64x64xf32>
    %217 = arith.truncf %216 : vector<64x64xf32> to vector<64x64xbf16>
    %c0_117 = arith.constant 0 : index
    %c0_118 = arith.constant 0 : index
    %218 = vector.load %arg14[%c0_117, %c0_118] : memref<64x64xbf16, #tpu.memory_space<vmem>>, vector<64x64xbf16>
    %cst_119 = arith.constant dense<0.000000e+00> : vector<64x64xf32>
    %219 = tpu.matmul %217, %218, %cst_119 {dimension_numbers = #tpu.dot_dimension_numbers<[1], [0], [0], [1], [0, 0, 1, 1], [], []>} : vector<64x64xbf16>, vector<64x64xbf16>, vector<64x64xf32> -> vector<64x64xf32>
    %c0_120 = arith.constant 0 : index
    %c0_121 = arith.constant 0 : index
    %220 = vector.load %arg15[%c0_120, %c0_121] : memref<1x64xf32, #tpu.memory_space<vmem>>, vector<1x64xf32>
    %221 = vector.broadcast %220 : vector<1x64xf32> to vector<64x64xf32>
    %222 = arith.addf %219, %221 : vector<64x64xf32>
    %cst_122 = arith.constant 2.000000e+01 : f32
    %223 = vector.broadcast %cst_122 : f32 to vector<64x64xf32>
    %224 = arith.minimumf %222, %223 : vector<64x64xf32>
    %225 = math.exp %224 : vector<64x64xf32>
    %cst_123 = arith.constant 2.000000e+00 : f32
    %226 = vector.broadcast %cst_123 : f32 to vector<64x64xf32>
    %227 = arith.addf %225, %226 : vector<64x64xf32>
    %228 = arith.mulf %225, %227 : vector<64x64xf32>
    %cst_124 = arith.constant 2.000000e+00 : f32
    %229 = vector.broadcast %cst_124 : f32 to vector<64x64xf32>
    %230 = arith.addf %228, %229 : vector<64x64xf32>
    %231 = tpu.reciprocal %230 {approx = true} : vector<64x64xf32> -> vector<64x64xf32>
    %232 = arith.mulf %230, %231 : vector<64x64xf32>
    %cst_125 = arith.constant 2.000000e+00 : f32
    %233 = vector.broadcast %cst_125 : f32 to vector<64x64xf32>
    %234 = arith.subf %233, %232 : vector<64x64xf32>
    %235 = arith.mulf %231, %234 : vector<64x64xf32>
    %cst_126 = arith.constant 2.000000e+01 : f32
    %236 = vector.broadcast %cst_126 : f32 to vector<64x64xf32>
    %237 = arith.cmpf ogt, %222, %236 : vector<64x64xf32>
    %238 = arith.mulf %222, %228 : vector<64x64xf32>
    %239 = arith.mulf %238, %235 : vector<64x64xf32>
    %240 = arith.select %237, %222, %239 : vector<64x64xi1>, vector<64x64xf32>
    %241 = arith.truncf %240 : vector<64x64xf32> to vector<64x64xbf16>
    %c0_127 = arith.constant 0 : index
    %c0_128 = arith.constant 0 : index
    %242 = vector.load %arg16[%c0_127, %c0_128] : memref<64x64xbf16, #tpu.memory_space<vmem>>, vector<64x64xbf16>
    %cst_129 = arith.constant dense<0.000000e+00> : vector<64x64xf32>
    %243 = tpu.matmul %241, %242, %cst_129 {dimension_numbers = #tpu.dot_dimension_numbers<[1], [0], [0], [1], [0, 0, 1, 1], [], []>} : vector<64x64xbf16>, vector<64x64xbf16>, vector<64x64xf32> -> vector<64x64xf32>
    %c0_130 = arith.constant 0 : index
    %c0_131 = arith.constant 0 : index
    %244 = vector.load %arg17[%c0_130, %c0_131] : memref<128x64xbf16, #tpu.memory_space<vmem>>, vector<128x64xbf16>
    %cst_132 = arith.constant dense<0.000000e+00> : vector<64x64xf32>
    %245 = tpu.matmul %121, %244, %cst_132 {dimension_numbers = #tpu.dot_dimension_numbers<[1], [0], [0], [1], [0, 0, 1, 1], [], []>} : vector<64x128xbf16>, vector<128x64xbf16>, vector<64x64xf32> -> vector<64x64xf32>
    %246 = arith.addf %243, %245 : vector<64x64xf32>
    %c0_133 = arith.constant 0 : index
    %c0_134 = arith.constant 0 : index
    %247 = vector.load %arg18[%c0_133, %c0_134] : memref<1x64xf32, #tpu.memory_space<vmem>>, vector<1x64xf32>
    %248 = vector.broadcast %247 : vector<1x64xf32> to vector<64x64xf32>
    %249 = arith.addf %246, %248 : vector<64x64xf32>
    %cst_135 = arith.constant 2.000000e+01 : f32
    %250 = vector.broadcast %cst_135 : f32 to vector<64x64xf32>
    %251 = arith.minimumf %249, %250 : vector<64x64xf32>
    %252 = math.exp %251 : vector<64x64xf32>
    %cst_136 = arith.constant 2.000000e+00 : f32
    %253 = vector.broadcast %cst_136 : f32 to vector<64x64xf32>
    %254 = arith.addf %252, %253 : vector<64x64xf32>
    %255 = arith.mulf %252, %254 : vector<64x64xf32>
    %cst_137 = arith.constant 2.000000e+00 : f32
    %256 = vector.broadcast %cst_137 : f32 to vector<64x64xf32>
    %257 = arith.addf %255, %256 : vector<64x64xf32>
    %258 = tpu.reciprocal %257 {approx = true} : vector<64x64xf32> -> vector<64x64xf32>
    %259 = arith.mulf %257, %258 : vector<64x64xf32>
    %cst_138 = arith.constant 2.000000e+00 : f32
    %260 = vector.broadcast %cst_138 : f32 to vector<64x64xf32>
    %261 = arith.subf %260, %259 : vector<64x64xf32>
    %262 = arith.mulf %258, %261 : vector<64x64xf32>
    %cst_139 = arith.constant 2.000000e+01 : f32
    %263 = vector.broadcast %cst_139 : f32 to vector<64x64xf32>
    %264 = arith.cmpf ogt, %249, %263 : vector<64x64xf32>
    %265 = arith.mulf %249, %255 : vector<64x64xf32>
    %266 = arith.mulf %265, %262 : vector<64x64xf32>
    %267 = arith.select %264, %249, %266 : vector<64x64xi1>, vector<64x64xf32>
    %c0_140 = arith.constant 0 : index
    %c0_141 = arith.constant 0 : index
    %c0_142 = arith.constant 0 : index
    %268 = vector.load %arg19[%c0_140, %c0_141, %c0_142] : memref<1x64x64xf32, #tpu.memory_space<vmem>>, vector<1x64x64xf32>
    %269 = vector.shape_cast %268 : vector<1x64x64xf32> to vector<64x64xf32>
    %270 = vector.shape_cast %267 : vector<64x64xf32> to vector<1x64x64xf32>
    tpu.vector_store %arg19[%c0_140, %c0_141, %c0_142], %270 {strides = array<i32>} : memref<1x64x64xf32, #tpu.memory_space<vmem>>, vector<1x64x64xf32>,
    return
  }
  func.func @transform_0(%arg0: i32) -> (i32, i32, i32) {
    %c0_i32 = arith.constant 0 : i32
    %c0_i32_0 = arith.constant 0 : i32
    %c0_i32_1 = arith.constant 0 : i32
    return %arg0, %c0_i32, %c0_i32_0 : i32, i32, i32
  }
  func.func @transform_1(%arg0: i32) -> (i32, i32) {
    %c0_i32 = arith.constant 0 : i32
    %c0_i32_0 = arith.constant 0 : i32
    %c0_i32_1 = arith.constant 0 : i32
    return %c0_i32, %c0_i32_0 : i32, i32
  }
  func.func @transform_2(%arg0: i32) -> (i32, i32) {
    %c0_i32 = arith.constant 0 : i32
    %c0_i32_0 = arith.constant 0 : i32
    %c0_i32_1 = arith.constant 0 : i32
    return %c0_i32, %c0_i32_0 : i32, i32
  }
  func.func @transform_3(%arg0: i32) -> (i32, i32) {
    %c0_i32 = arith.constant 0 : i32
    %c0_i32_0 = arith.constant 0 : i32
    %c0_i32_1 = arith.constant 0 : i32
    return %c0_i32, %c0_i32_0 : i32, i32
  }
  func.func @transform_4(%arg0: i32) -> (i32, i32) {
    %c0_i32 = arith.constant 0 : i32
    %c0_i32_0 = arith.constant 0 : i32
    %c0_i32_1 = arith.constant 0 : i32
    return %c0_i32, %c0_i32_0 : i32, i32
  }
  func.func @transform_5(%arg0: i32) -> (i32, i32, i32) {
    %c0_i32 = arith.constant 0 : i32
    %c0_i32_0 = arith.constant 0 : i32
    %c0_i32_1 = arith.constant 0 : i32
    %c0_i32_2 = arith.constant 0 : i32
    return %c0_i32, %c0_i32_0, %c0_i32_1 : i32, i32, i32
  }
  func.func @transform_6(%arg0: i32) -> (i32, i32) {
    %c0_i32 = arith.constant 0 : i32
    %c0_i32_0 = arith.constant 0 : i32
    %c0_i32_1 = arith.constant 0 : i32
    return %c0_i32, %c0_i32_0 : i32, i32
  }
  func.func @transform_7(%arg0: i32) -> (i32, i32) {
    %c0_i32 = arith.constant 0 : i32
    %c0_i32_0 = arith.constant 0 : i32
    %c0_i32_1 = arith.constant 0 : i32
    return %c0_i32, %c0_i32_0 : i32, i32
  }
  func.func @transform_8(%arg0: i32) -> (i32, i32) {
    %c0_i32 = arith.constant 0 : i32
    %c0_i32_0 = arith.constant 0 : i32
    %c0_i32_1 = arith.constant 0 : i32
    return %c0_i32, %c0_i32_0 : i32, i32
  }
  func.func @transform_9(%arg0: i32) -> (i32, i32) {
    %c0_i32 = arith.constant 0 : i32
    %c0_i32_0 = arith.constant 0 : i32
    %c0_i32_1 = arith.constant 0 : i32
    return %c0_i32, %c0_i32_0 : i32, i32
  }
  func.func @transform_10(%arg0: i32) -> (i32, i32) {
    %c0_i32 = arith.constant 0 : i32
    %c0_i32_0 = arith.constant 0 : i32
    %c0_i32_1 = arith.constant 0 : i32
    return %c0_i32, %c0_i32_0 : i32, i32
  }
  func.func @transform_11(%arg0: i32) -> (i32, i32, i32) {
    %c0_i32 = arith.constant 0 : i32
    %c0_i32_0 = arith.constant 0 : i32
    %c0_i32_1 = arith.constant 0 : i32
    %c0_i32_2 = arith.constant 0 : i32
    return %c0_i32, %c0_i32_0, %c0_i32_1 : i32, i32, i32
  }
  func.func @transform_12(%arg0: i32) -> (i32, i32) {
    %c0_i32 = arith.constant 0 : i32
    %c0_i32_0 = arith.constant 0 : i32
    %c0_i32_1 = arith.constant 0 : i32
    return %c0_i32, %c0_i32_0 : i32, i32
  }
  func.func @transform_13(%arg0: i32) -> (i32, i32) {
    %c0_i32 = arith.constant 0 : i32
    %c0_i32_0 = arith.constant 0 : i32
    %c0_i32_1 = arith.constant 0 : i32
    return %c0_i32, %c0_i32_0 : i32, i32
  }
  func.func @transform_14(%arg0: i32) -> (i32, i32) {
    %c0_i32 = arith.constant 0 : i32
    %c0_i32_0 = arith.constant 0 : i32
    %c0_i32_1 = arith.constant 0 : i32
    return %c0_i32, %c0_i32_0 : i32, i32
  }
  func.func @transform_15(%arg0: i32) -> (i32, i32) {
    %c0_i32 = arith.constant 0 : i32
    %c0_i32_0 = arith.constant 0 : i32
    %c0_i32_1 = arith.constant 0 : i32
    return %c0_i32, %c0_i32_0 : i32, i32
  }
  func.func @transform_16(%arg0: i32) -> (i32, i32) {
    %c0_i32 = arith.constant 0 : i32
    %c0_i32_0 = arith.constant 0 : i32
    %c0_i32_1 = arith.constant 0 : i32
    return %c0_i32, %c0_i32_0 : i32, i32
  }
  func.func @transform_17(%arg0: i32) -> (i32, i32) {
    %c0_i32 = arith.constant 0 : i32
    %c0_i32_0 = arith.constant 0 : i32
    %c0_i32_1 = arith.constant 0 : i32
    return %c0_i32, %c0_i32_0 : i32, i32
  }
  func.func @transform_18(%arg0: i32) -> (i32, i32, i32) {
    %c0_i32 = arith.constant 0 : i32
    %c0_i32_0 = arith.constant 0 : i32
    %c0_i32_1 = arith.constant 0 : i32
    return %arg0, %c0_i32, %c0_i32_0 : i32, i32, i32
  }
}

</mosaic_0001>

<bundles_post_ra>
// kernel: downsample1_forward.1
= control target key start
LH: loop header
LB: loop body
LE: loop exit
PB: predicated region body
PF: predicated region fallthrough
CT: control target
= control target key end

     0   :  { %s9544_s0 = inlined_call_operand.vmem [shape: bf16[2,256,32], index: 0, kind: input, shape index: {}]   ;;  %s9545_s1 = inlined_call_operand.vmem [shape: bf16[576,256], index: 1, kind: input, shape index: {}]   ;;  %s9546_s2 = inlined_call_operand.vmem [shape: bf16[576,64], index: 2, kind: input, shape index: {}]   ;;  %s9547_s3 = inlined_call_operand.vmem [shape: bf16[32,32], index: 3, kind: input, shape index: {}]   ;;  %s9548_s4 = inlined_call_operand.vmem [shape: f32[1,32], index: 4, kind: input, shape index: {}]   ;;  %s9549_s5 = inlined_call_operand.vmem [shape: bf16[9,32,64], index: 5, kind: input, shape index: {}]   ;;  %s9550_s6 = inlined_call_operand.vmem [shape: f32[1,64], index: 6, kind: input, shape index: {}]   ;;  %s9551_s7 = inlined_call_operand.vmem [shape: bf16[64,128], index: 7, kind: input, shape index: {}]   ;;  %s9552_s8 = inlined_call_operand.vmem [shape: f32[1,128], index: 8, kind: input, shape index: {}]   ;;  %s9553_s9 = inlined_call_operand.vmem [shape: bf16[128,32], index: 9, kind: input, shape index: {}]   ;;  %s9554_s10 = inlined_call_operand.vmem [shape: f32[1,32], index: 10, kind: input, shape index: {}]   ;;  %s9555_s11 = inlined_call_operand.vmem [shape: bf16[9,32,64], index: 11, kind: input, shape index: {}]   ;;  %s9556_s12 = inlined_call_operand.vmem [shape: f32[1,64], index: 12, kind: input, shape index: {}]   ;;  %s9557_s13 = inlined_call_operand.vmem [shape: bf16[64,64], index: 13, kind: input, shape index: {}]   ;;  %s9558_s14 = inlined_call_operand.vmem [shape: f32[1,64], index: 14, kind: input, shape index: {}]   ;;  %s9559_s15 = inlined_call_operand.vmem [shape: bf16[64,64], index: 15, kind: input, shape index: {}]   ;;  %s9560_s16 = inlined_call_operand.vmem [shape: bf16[128,64], index: 16, kind: input, shape index: {}]   ;;  %s9561_s17 = inlined_call_operand.vmem [shape: f32[1,64], index: 17, kind: input, shape index: {}]   ;;  %s9562_s18 = inlined_call_operand.hbm [shape: f32[2,64,64], index: 18, kind: output, shape index: {}]  }
   0x1   :  { %9579 = sst [smem:[#allocation16_spill]] %s9544_s0 }
   0x2   :  { %9580 = sst [smem:[#allocation17_spill]] %s9545_s1 }
   0x3   :  { %9581 = sst [smem:[#allocation18_spill]] %s9546_s2 }
   0x4   :  { %9582 = sst [smem:[#allocation19_spill]] %s9547_s3 }
   0x5   :  { %9583 = sst [smem:[#allocation20_spill]] %s9548_s4 }
   0x6   :  { %9584 = sst [smem:[#allocation21_spill]] %s9549_s5 }
   0x7   :  { %9585 = sst [smem:[#allocation22_spill]] %s9550_s6 }
   0x8   :  { %23 = vsyncpa [#allocation3], 0 }
   0x9   :  { %25 = vsyncpa [#allocation3 + $0x1], 0  ;;  %s7271_s27 = smov 0   ;;  %s7273_s28 = smov 0  }
   0xa   :  { %s7275_s29 = smov 0   ;;  %s7277_s30 = smov 0  }
   0xb LB: > { %9586 = sst [smem:[#allocation5_spill]] %s7160_s27  ;;  %s7292_s0 = sadd.s32 4294967295, %s7172_s30   ;;  %s7172_s30 = sphi %s7277_s30, %s9614_s30   ;;  %s7168_s29 = sphi %s7275_s29, %s9616_s29   ;;  %s7164_s28 = sphi %s7273_s28, %s9618_s28   ;;  %s7160_s27 = sphi %s7271_s27, %s9617_s27  }
   0xc   : > { %9587 = sst [smem:[#allocation6_spill]] %s7168_s29  ;;  %s5566_s19 = sadd.s32 4294967294, %s7172_s30  }
   0xd   : > { %s7296_s1 = sadd.s32 1, %s7172_s30   ;;  %s421_s20 = sadd.s32 1, %s7168_s29 }
   0xe   : > { %9588 = sst [smem:[#allocation7_spill]] %s7296_s1  ;;  %s418_s21 = ssub.s32 %s7172_s30, %s7296_s1 }
   0xf   : > { %p431_p0 = scmp.ne.s32.totalorder %s7168_s29, %s7164_s28  ;;  %p419_p1 = scmp.eq.s32.totalorder %s418_s21, 0 }
  0x10   : > { %p432_p2 = scmp.eq.s32.totalorder %s7292_s0, 1  ;;  %p437_p3 = scmp.ne.s32.totalorder %s7164_s28, %s7160_s27 }
  0x11   : > { %p438_p4 = scmp.eq.s32.totalorder %s5566_s19, 1  ;;  %p5569_p7 = scmp.ge.s32.totalorder %s7172_s30, 1 }
  0x12   : > { %s7307_s22 = scalar_select %p419_p1, %s7168_s29, %s421_s20  }
  0x13   : > { %p7309_p5 = por %p432_p2, %p431_p0  ;;  %p7313_p6 = por %p438_p4, %p437_p3 }
  0x14   : > { %9589 = sst [smem:[#allocation8_spill]] %s7307_s22  ;;  %p515_p8 = scmp.lt.s32.totalorder %s7172_s30, 3 }
  0x15   : > { %s9591_s23 = scalar_select %p7313_p6, 1, 0 }
  0x16   : > { %p516_p9 = pnand %p5569_p7, %p515_p8 }
  0x17   : > { %9592 = sst [smem:[#allocation9_spill]] %s9591_s23 }
  0x18   : > { %519 = sbr.rel (%p516_p9) target bundleno = 2770 (0xad2), region = 92 }
  0x1d   : > { %s9593_s3 = sld [smem:[#allocation19_spill]]  ;;  %p569_p10 = scmp.lt.s32.totalorder %s7292_s0, 1  ;;  %vm707_vm0 = vcmask 261120  }
  0x1e   : > { %s9594_s1 = sld [smem:[#allocation16_spill]]  ;;  %s566_s29 = sand.u32 1, %s7164_s28  }
  0x1f   : > { %s570_s20 = scalar_select %p569_p10, %s7292_s0, 1 }
  0x20   : > { %s9595_s4 = sld [smem:[#allocation20_spill]]  ;;  %s6729_s22 = sshll.u32 %s7292_s0, 6 }
  0x21   : > { %s6538_s21 = sshll.u32 %s570_s20, 7  ;;  %s9596_s24 = sld [smem:[#allocation17_spill]] }
  0x22   : > { %s9609_s5 = sld [smem:[#allocation21_spill]]  ;;  %s5489_s0 = scalar_lea.sflag [#allocation3], %s566_s29 }
  0x23   : > { %v6556_v0 = vld [vmem:[%s9593_s3 + $0x8] sm:$0xff]  ;;  %v6555_v1 = vld [vmem:[%s9593_s3] sm:$0xff]  ;;  %s9610_s6 = sld [smem:[#allocation22_spill]] }
  0x24   : > { %762 = vmatpush.bf16.msra.mxu0 %v6556_v0  ;;  %s7330_s23 = scalar_lea.vmem %s9594_s1, %s6538_s21  ;;  %s9611_s20 = sld [smem:[#allocation18_spill]] }
  0x25   : > { %v6539_v2 = vld [vmem:[%s7330_s23] sm:$0xff]  ;;  %v6540_v3 = vld [vmem:[%s7330_s23 + $0x8] sm:$0xff]  ;;  %v6541_v4 = vld [vmem:[%s7330_s23 + $0x10] sm:$0xff]  ;;  %s5570_s1 = sshll.u32 %s566_s29, 6 }
  0x26   : > { %v6542_v5 = vld [vmem:[%s7330_s23 + $0x18] sm:$0xff]  ;;  %v6543_v6 = vld [vmem:[%s7330_s23 + $0x20] sm:$0xff]  ;;  %v6544_v7 = vld [vmem:[%s7330_s23 + $0x28] sm:$0xff]  ;;  %s9465_s3 = scalar_lea.vmem [#allocation2], %s5570_s1 }
  0x27   : > { %v6545_v8 = vld [vmem:[%s7330_s23 + $0x30] sm:$0xff]  ;;  %v6546_v9 = vld [vmem:[%s7330_s23 + $0x38] sm:$0xff]  ;;  %v7351_v10 = vld [vmem:[%s9595_s4] ss:$0 sm:$0xff]  ;;  %s5501_s25 = sshll.u32 %s9465_s3, 4  ;;  %s7130_s4 = scalar_lea.hbm %s9562_s18, 128  ;;  %s5502_s25 = int_to_ptr.vmem [resolvable:$true] %s5501_s25 }
  0x28   : > { %763 = vmatpush.bf16.msra.mxu0 %v6555_v1  ;;  %v6547_v11 = vld [vmem:[%s7330_s23 + $0x40] sm:$0xff]  ;;  %v6548_v22 = vld [vmem:[%s7330_s23 + $0x48] sm:$0xff]  ;;  %v6549_v41 = vld [vmem:[%s7330_s23 + $0x50] sm:$0xff] }
  0x2b   : > { %5645 = vmatmul.msk.bf16.vlgmr.msra.gmra.mxu0 %vm707_vm0, %v6539_v2 }
  0x3b   : > { %5646 = vmatmul.msk.bf16.gmra.mxu0 %vm707_vm0, %v6540_v3 }
  0x4b   : > { %5647 = vmatmul.msk.bf16.gmra.mxu0 %vm707_vm0, %v6541_v4 }
  0x5b   : > { %5648 = vmatmul.msk.bf16.gmra.mxu0 %vm707_vm0, %v6542_v5 }
  0x6b   : > { %5649 = vmatmul.msk.bf16.gmra.mxu0 %vm707_vm0, %v6543_v6 }
  0x7b   : > { %5650 = vmatmul.msk.bf16.gmra.mxu0 %vm707_vm0, %v6544_v7 }
  0x8b   : > { %5651 = vmatmul.msk.bf16.gmra.mxu0 %vm707_vm0, %v6545_v8 }
  0x9b   : > { %5652 = vmatmul.msk.bf16.gmra.mxu0 %vm707_vm0, %v6546_v9  ;;  %v6550_v9 = vld [vmem:[%s7330_s23 + $0x58] sm:$0xff] }
  0xa8   : > { %v765_v12 = vpop.f32.mrf.mxu0 }
  0xa9   : > { %v7355_v13 = vadd.f32 %v7351_v10, %v765_v12 }
  0xab   : > { %v845_v14 = vmin.f32 %v7355_v13, 20.0  ;;  %5653 = vmatmul.msk.bf16.gmra.mxu0 %vm707_vm0, %v6547_v11  ;;  %vm1165_vm1 = vcmp.gt.f32.partialorder %v7355_v13, 20.0 }
  0xad   : > { %v877_v15 = vmul.f32 1.442695, %v845_v14 }
  0xaf   : > { %6790 = vpow2.f32 %v877_v15 }
  0xb0   : > { %v767_v16 = vpop.f32.mrf.mxu0 }
  0xb1   : > { %v7360_v17 = vadd.f32 %v7351_v10, %v767_v16 }
  0xb3   : > { %v846_v18 = vmin.f32 %v7360_v17, 20.0  ;;  %vm1166_vm2 = vcmp.gt.f32.partialorder %v7360_v17, 20.0 }
  0xb5   : > { %v6791_v19 = vpop.eup %6790  ;;  %v879_v20 = vmul.f32 1.442695, %v846_v18 }
  0xb6   : > { %v941_v21 = vadd.f32 2.0, %v6791_v19 }
  0xb7   : > { %6792 = vpow2.f32 %v879_v20 }
  0xb8   : > { %v973_v23 = vmul.f32 %v6791_v19, %v941_v21  ;;  %v770_v24 = vpop.f32.mrf.mxu0 }
  0xb9   : > { %v7365_v25 = vadd.f32 %v7351_v10, %v770_v24 }
  0xba   : > { %v1005_v26 = vadd.f32 2.0, %v973_v23  ;;  %v1197_v52 = vmul.f32 %v973_v23, %v7355_v13 }
  0xbb   : > { %v847_v27 = vmin.f32 %v7365_v25, 20.0  ;;  %5654 = vmatmul.msk.bf16.gmra.mxu0 %vm707_vm0, %v6548_v22  ;;  %vm1167_vm3 = vcmp.gt.f32.partialorder %v7365_v25, 20.0 }
  0xbc   : > { %6794 = vrcp.f32 %v1005_v26 }
  0xbd   : > { %v6793_v28 = vpop.eup %6792  ;;  %v881_v29 = vmul.f32 1.442695, %v847_v27 }
  0xbe   : > { %v942_v30 = vadd.f32 2.0, %v6793_v28 }
  0xbf   : > { %6796 = vpow2.f32 %v881_v29 }
  0xc0   : > { %v772_v31 = vpop.f32.mrf.mxu0  ;;  %v974_v32 = vmul.f32 %v6793_v28, %v942_v30 }
  0xc1   : > { %v7370_v33 = vadd.f32 %v7351_v10, %v772_v31 }
  0xc2   : > { %v6795_v34 = vpop.eup %6794  ;;  %v1006_v35 = vadd.f32 2.0, %v974_v32  ;;  %v1198_v57 = vmul.f32 %v974_v32, %v7360_v17 }
  0xc3   : > { %v848_v36 = vmin.f32 %v7370_v33, 20.0  ;;  %v1069_v37 = vmul.f32 %v6795_v34, %v1005_v26  ;;  %vm1168_vm4 = vcmp.gt.f32.partialorder %v7370_v33, 20.0 }
  0xc4   : > { %6798 = vrcp.f32 %v1006_v35 }
  0xc5   : > { %v6797_v38 = vpop.eup %6796  ;;  %v883_v39 = vmul.f32 1.442695, %v848_v36  ;;  %v1101_v42 = vsub.f32 2.0, %v1069_v37 }
  0xc6   : > { %v943_v40 = vadd.f32 2.0, %v6797_v38 }
  0xc7   : > { %6800 = vpow2.f32 %v883_v39  ;;  %v1133_v50 = vmul.f32 %v6795_v34, %v1101_v42 }
  0xc8   : > { %v975_v43 = vmul.f32 %v6797_v38, %v943_v40  ;;  %v775_v44 = vpop.f32.mrf.mxu0 }
  0xc9   : > { %v7375_v45 = vadd.f32 %v7351_v10, %v775_v44  ;;  %v1229_v58 = vmul.f32 %v1197_v52, %v1133_v50  ;;  %v6551_v44 = vld [vmem:[%s7330_s23 + $0x60] sm:$0xff] }
  0xca   : > { %v6799_v46 = vpop.eup %6798  ;;  %v1007_v47 = vadd.f32 2.0, %v975_v43  ;;  %v1199_v21 = vmul.f32 %v975_v43, %v7365_v25 }
  0xcb   : > { %v849_v48 = vmin.f32 %v7375_v45, 20.0  ;;  %5655 = vmatmul.msk.bf16.gmra.mxu0 %vm707_vm0, %v6549_v41  ;;  %v1070_v49 = vmul.f32 %v6799_v46, %v1006_v35  ;;  %v7388_v3 = vsel %vm1165_vm1, %v7355_v13, %v1229_v58  ;;  %vm1169_vm5 = vcmp.gt.f32.partialorder %v7375_v45, 20.0 }
  0xcc   : > { %6802 = vrcp.f32 %v1007_v47 }
  0xcd   : > { %v6801_v51 = vpop.eup %6800  ;;  %v885_v53 = vmul.f32 1.442695, %v849_v48  ;;  %v1102_v54 = vsub.f32 2.0, %v1070_v49 }
  0xce   : > { %v944_v55 = vadd.f32 2.0, %v6801_v51 }
  0xcf   : > { %6804 = vpow2.f32 %v885_v53  ;;  %v1134_v56 = vmul.f32 %v6799_v46, %v1102_v54 }
  0xd0   : > { %v777_v59 = vpop.f32.mrf.mxu0  ;;  %v976_v60 = vmul.f32 %v6801_v51, %v944_v55 }
  0xd1   : > { %v7382_v61 = vadd.f32 %v7351_v10, %v777_v59  ;;  %v1230_v62 = vmul.f32 %v1198_v57, %v1134_v56 }
  0xd2   : > { %v6803_v63 = vpop.eup %6802  ;;  %v1008_v0 = vadd.f32 2.0, %v976_v60  ;;  %v1200_v27 = vmul.f32 %v976_v60, %v7370_v33 }
  0xd3   : > { %v850_v1 = vmin.f32 %v7382_v61, 20.0  ;;  %v1071_v2 = vmul.f32 %v6803_v63, %v1007_v47  ;;  %v7391_v4 = vsel %vm1166_vm2, %v7360_v17, %v1230_v62  ;;  %vm1170_vm6 = vcmp.gt.f32.partialorder %v7382_v61, 20.0 }
  0xd4   : > { %6806 = vrcp.f32 %v1008_v0  ;;  %v1293_v5 = vpack.c.bf16 %v7391_v4, %v7388_v3 }
  0xd5   : > { %v6805_v6 = vpop.eup %6804  ;;  %v887_v7 = vmul.f32 1.442695, %v850_v1  ;;  %v1103_v11 = vsub.f32 2.0, %v1071_v2 }
  0xd6   : > { %v945_v8 = vadd.f32 2.0, %v6805_v6 }
  0xd7   : > { %6808 = vpow2.f32 %v887_v7  ;;  %v1135_v19 = vmul.f32 %v6803_v63, %v1103_v11  ;;  %v6552_v7 = vld [vmem:[%s7330_s23 + $0x68] sm:$0xff] }
  0xd8   : > { %v977_v12 = vmul.f32 %v6805_v6, %v945_v8  ;;  %v780_v14 = vpop.f32.mrf.mxu0 }
  0xd9   : > { %v7397_v15 = vadd.f32 %v7351_v10, %v780_v14  ;;  %v1231_v28 = vmul.f32 %v1199_v21, %v1135_v19 }
  0xda   : > { %v6807_v13 = vpop.eup %6806  ;;  %v1009_v16 = vadd.f32 2.0, %v977_v12  ;;  %v1201_v52 = vmul.f32 %v977_v12, %v7375_v45 }
  0xdb   : > { %v851_v17 = vmin.f32 %v7397_v15, 20.0  ;;  %5656 = vmatmul.msk.bf16.gmra.mxu0 %vm707_vm0, %v6550_v9  ;;  %v1072_v18 = vmul.f32 %v6807_v13, %v1008_v0  ;;  %v7410_v38 = vsel %vm1167_vm3, %v7365_v25, %v1231_v28  ;;  %vm1171_vm7 = vcmp.gt.f32.partialorder %v7397_v15, 20.0 }
  0xdc   : > { %6810 = vrcp.f32 %v1009_v16 }
  0xdd   : > { %v6809_v20 = vpop.eup %6808  ;;  %v889_v22 = vmul.f32 1.442695, %v851_v17  ;;  %v1104_v23 = vsub.f32 2.0, %v1072_v18 }
  0xde   : > { %v946_v24 = vadd.f32 2.0, %v6809_v20 }
  0xdf   : > { %6812 = vpow2.f32 %v889_v22  ;;  %v1136_v26 = vmul.f32 %v6807_v13, %v1104_v23  ;;  %v6553_v23 = vld [vmem:[%s7330_s23 + $0x70] sm:$0xff] }
  0xe0   : > { %v782_v29 = vpop.f32.mrf.mxu0  ;;  %v978_v30 = vmul.f32 %v6809_v20, %v946_v24 }
  0xe1   : > { %v7404_v31 = vadd.f32 %v7351_v10, %v782_v29  ;;  %v1232_v32 = vmul.f32 %v1200_v27, %v1136_v26 }
  0xe2   : > { %v6811_v34 = vpop.eup %6810  ;;  %v1010_v35 = vadd.f32 2.0, %v978_v30  ;;  %v1202_v56 = vmul.f32 %v978_v30, %v7382_v61 }
  0xe3   : > { %v852_v36 = vmin.f32 %v7404_v31, 20.0  ;;  %v1073_v37 = vmul.f32 %v6811_v34, %v1009_v16  ;;  %v7413_v39 = vsel %vm1168_vm4, %v7370_v33, %v1232_v32  ;;  %vm1172_vm8 = vcmp.gt.f32.partialorder %v7404_v31, 20.0 }
  0xe4   : > { %6814 = vrcp.f32 %v1010_v35  ;;  %v1294_v40 = vpack.c.bf16 %v7413_v39, %v7410_v38 }
  0xe5   : > { %v6813_v41 = vpop.eup %6812  ;;  %v891_v42 = vmul.f32 1.442695, %v852_v36  ;;  %v1105_v46 = vsub.f32 2.0, %v1073_v37 }
  0xe6   : > { %v947_v43 = vadd.f32 2.0, %v6813_v41 }
  0xe7   : > { %6816 = vpow2.f32 %v891_v42  ;;  %v1137_v51 = vmul.f32 %v6811_v34, %v1105_v46 }
  0xe8   : > { %v979_v47 = vmul.f32 %v6813_v41, %v947_v43  ;;  %v785_v48 = vpop.f32.mrf.mxu0 }
  0xe9   : > { %v1233_v57 = vmul.f32 %v1201_v52, %v1137_v51 }
  0xea   : > { %v6815_v49 = vpop.eup %6814  ;;  %v1011_v50 = vadd.f32 2.0, %v979_v47  ;;  %v1203_v13 = vmul.f32 %v979_v47, %v7397_v15 }
  0xeb   : > { %5657 = vmatmul.msk.bf16.gmra.mxu0 %vm707_vm0, %v6551_v44  ;;  %v1074_v25 = vmul.f32 %v6815_v49, %v1010_v35  ;;  %v7424_v1 = vsel %vm1169_vm5, %v7375_v45, %v1233_v57  ;;  %v7466_v35 = vadd.f32 %v7351_v10, %v785_v48  ;;  %v6554_v44 = vld [vmem:[%s7330_s23 + $0x78] sm:$0xff]  ;;  %s5500_s23 = scalar_lea.hbm %s9562_s18, %s6729_s22 }
  0xec   : > { %6818 = vrcp.f32 %v1011_v50  ;;  %s5503_s26 = sshll.u32 %s5500_s23, 4  ;;  %s5504_s26 = int_to_ptr.hbm [resolvable:$true] %s5503_s26 }
  0xed   : > { %v6817_v33 = vpop.eup %6816  ;;  %v1106_v53 = vsub.f32 2.0, %v1074_v25  ;;  %v853_v46 = vmin.f32 %v7466_v35, 20.0  ;;  %vm1173_vm1 = vcmp.gt.f32.partialorder %v7466_v35, 20.0  ;;  %s7124_s19 = sshra.s32 %s5504_s26, 4  ;;  %s7125_s19 = int_to_ptr.hbm [resolvable:$true] %s7124_s19 }
  0xee   : > { %v948_v54 = vadd.f32 2.0, %v6817_v33  ;;  %s7126_s21 = scalar_lea.hbm %s7125_s19, 64  ;;  %p7131_p0 = scmp.lt.s32.totalorder %s7125_s19, %s9562_s18 }
  0xef   : > { %v1138_v55 = vmul.f32 %v6815_v49, %v1106_v53  ;;  %v893_v51 = vmul.f32 1.442695, %v853_v46  ;;  %p7127_p11 = scmp.ne.s32.totalorder %s7125_s19, %s7126_s21  ;;  %p7132_p1 = scmp.lt.s32.totalorder %s7130_s4, %s7126_s21 }
  0xf0   : > { %v787_v58 = vpop.f32.mrf.mxu0  ;;  %v980_v59 = vmul.f32 %v6817_v33, %v948_v54 }
  0xf1   : > { %v1234_v60 = vmul.f32 %v1202_v56, %v1138_v55  ;;  %p7128_p12 = pnand %p7127_p11, %p7309_p5  ;;  %p7133_p2 = por %p7132_p1, %p7131_p0 }
  0xf2   : > { %v6819_v62 = vpop.eup %6818  ;;  %v1012_v63 = vadd.f32 2.0, %v980_v59 }
  0xf3   : > { %v1075_v0 = vmul.f32 %v6819_v62, %v1011_v50  ;;  %v7427_v2 = vsel %vm1170_vm6, %v7382_v61, %v1234_v60  ;;  %v1204_v61 = vmul.f32 %v980_v59, %v7404_v31  ;;  %p7129_p13 = pneg %p7128_p12 }
  0xf4   : > { %6820 = vrcp.f32 %v1012_v63  ;;  %v1295_v6 = vpack.c.bf16 %v7427_v2, %v7424_v1  ;;  %v6558_v1 = vld [vmem:[%s9596_s24 + $0x4] sm:$0xf0] }
  0xf5   : > { %v1107_v8 = vsub.f32 2.0, %v1075_v0  ;;  %p7134_p3 = pnand %p7133_p2, %p7129_p13 }
  0xf7   : > { %v1139_v14 = vmul.f32 %v6819_v62, %v1107_v8 }
  0xf8   : > { %v790_v9 = vpop.f32.mrf.mxu0 }
  0xf9   : > { %v1235_v17 = vmul.f32 %v1203_v13, %v1139_v14 }
  0xfa   : > { %v6821_v11 = vpop.eup %6820 }
  0xfb   : > { %5658 = vmatmul.msk.bf16.gmra.mxu0 %vm707_vm0, %v6552_v7  ;;  %v1076_v12 = vmul.f32 %v6821_v11, %v1012_v63  ;;  %v7438_v20 = vsel %vm1171_vm7, %v7397_v15, %v1235_v17  ;;  %v7454_v15 = vadd.f32 %v7351_v10, %v790_v9 }
  0xfd   : > { %v1108_v45 = vsub.f32 2.0, %v1076_v12  ;;  %v855_v36 = vmin.f32 %v7454_v15, 20.0  ;;  %vm1175_vm14 = vcmp.gt.f32.partialorder %v7454_v15, 20.0 }
  0xff   : > { %v1140_v16 = vmul.f32 %v6821_v11, %v1108_v45  ;;  %v897_v47 = vmul.f32 1.442695, %v855_v36 }
 0x100   : > { %v792_v18 = vpop.f32.mrf.mxu0 }
 0x101   : > { %v1236_v19 = vmul.f32 %v1204_v61, %v1140_v16  ;;  %v7451_v27 = vadd.f32 %v7351_v10, %v792_v18 }
 0x103   : > { %v7441_v21 = vsel %vm1172_vm8, %v7404_v31, %v1236_v19  ;;  %v7461_v31 = vadd.f32 %v7351_v10, %v787_v58  ;;  %v856_v32 = vmin.f32 %v7451_v27, 20.0  ;;  %vm1176_vm13 = vcmp.gt.f32.partialorder %v7451_v27, 20.0 }
 0x104   : > { %v1296_v22 = vpack.c.bf16 %v7441_v21, %v7438_v20  ;;  %v5663_v21 = vld [vmem:[%s9596_s24] sm:$0xf] }
 0x105   : > { %v854_v42 = vmin.f32 %v7461_v31, 20.0  ;;  %v899_v43 = vmul.f32 1.442695, %v856_v32  ;;  %vm1174_vm15 = vcmp.gt.f32.partialorder %v7461_v31, 20.0  ;;  %v5664_v39 = vor.u32 %v6558_v1, %v5663_v21 }
 0x107   : > { %v895_v25 = vmul.f32 1.442695, %v854_v42 }
 0x108   : > { %v795_v24 = vpop.f32.mrf.mxu0 }
 0x109   : > { %v7448_v26 = vadd.f32 %v7351_v10, %v795_v24 }
 0x10b   : > { %5659 = vmatmul.msk.bf16.gmra.mxu0 %vm707_vm0, %v6553_v23  ;;  %v857_v29 = vmin.f32 %v7448_v26, 20.0  ;;  %vm1177_vm12 = vcmp.gt.f32.partialorder %v7448_v26, 20.0 }
 0x10d   : > { %v901_v37 = vmul.f32 1.442695, %v857_v29 }
 0x110   : > { %v797_v28 = vpop.f32.mrf.mxu0 }
 0x111   : > { %v7458_v30 = vadd.f32 %v7351_v10, %v797_v28 }
 0x113   : > { %v858_v34 = vmin.f32 %v7458_v30, 20.0  ;;  %vm1178_vm11 = vcmp.gt.f32.partialorder %v7458_v30, 20.0 }
 0x115   : > { %v903_v41 = vmul.f32 1.442695, %v858_v34 }
 0x117   : > { %6822 = vpow2.f32 %v903_v41 }
 0x118   : > { %v800_v49 = vpop.f32.mrf.mxu0  ;;  %6824 = vpow2.f32 %v901_v37 }
 0x119   : > { %v7473_v50 = vadd.f32 %v7351_v10, %v800_v49  ;;  %6826 = vpow2.f32 %v899_v43 }
 0x11a   : > { %6828 = vpow2.f32 %v897_v47 }
 0x11b   : > { %v859_v48 = vmin.f32 %v7473_v50, 20.0  ;;  %5660 = vmatmul.msk.bf16.gmra.mxu0 %vm707_vm0, %v6554_v44  ;;  %6830 = vpow2.f32 %v895_v25  ;;  %vm1179_vm9 = vcmp.gt.f32.partialorder %v7473_v50, 20.0 }
 0x11d   : > { %v6823_v33 = vpop.eup %6822  ;;  %v905_v52 = vmul.f32 1.442695, %v859_v48 }
 0x11e   : > { %v6825_v53 = vpop.eup %6824  ;;  %v954_v54 = vadd.f32 2.0, %v6823_v33 }
 0x11f   : > { %6832 = vpow2.f32 %v905_v52  ;;  %v6827_v56 = vpop.eup %6826  ;;  %v953_v59 = vadd.f32 2.0, %v6825_v53 }
 0x120   : > { %6834 = vpow2.f32 %v893_v51  ;;  %v802_v55 = vpop.f32.mrf.mxu0  ;;  %v6829_v58 = vpop.eup %6828  ;;  %v986_v62 = vmul.f32 %v6823_v33, %v954_v54  ;;  %v952_v0 = vadd.f32 2.0, %v6827_v56 }
 0x121   : > { %v7478_v57 = vadd.f32 %v7351_v10, %v802_v55  ;;  %v6831_v63 = vpop.eup %6830  ;;  %v951_v8 = vadd.f32 2.0, %v6829_v58  ;;  %v7481_v12 = vmul.f32 %v6825_v53, %v953_v59 }
 0x122   : > { %v1018_v13 = vadd.f32 2.0, %v986_v62  ;;  %v950_v45 = vadd.f32 2.0, %v6831_v63  ;;  %v7485_v17 = vmul.f32 %v6827_v56, %v952_v0 }
 0x123   : > { %v860_v60 = vmin.f32 %v7478_v57, 20.0  ;;  %v7487_v19 = vmul.f32 %v6829_v58, %v951_v8  ;;  %v1017_v23 = vadd.f32 2.0, %v7481_v12  ;;  %vm1180_vm10 = vcmp.gt.f32.partialorder %v7478_v57, 20.0 }
 0x124   : > { %v7490_v28 = vmul.f32 %v6831_v63, %v950_v45  ;;  %v1016_v29 = vadd.f32 2.0, %v7485_v17 }
 0x125   : > { %v6833_v7 = vpop.eup %6832  ;;  %v907_v9 = vmul.f32 1.442695, %v860_v60  ;;  %v1015_v36 = vadd.f32 2.0, %v7487_v19 }
 0x126   : > { %v6835_v11 = vpop.eup %6834  ;;  %v955_v14 = vadd.f32 2.0, %v6833_v7  ;;  %v1014_v41 = vadd.f32 2.0, %v7490_v28 }
 0x127   : > { %6836 = vpow2.f32 %v907_v9  ;;  %v949_v18 = vadd.f32 2.0, %v6835_v11 }
 0x128   : > { %v7483_v16 = vpop.f32.mrf.mxu0  ;;  %v987_v61 = vmul.f32 %v6833_v7, %v955_v14  ;;  %6838 = vrcp.f32 %v1018_v13 }
 0x129   : > { %v7493_v34 = vmul.f32 %v6835_v11, %v949_v18  ;;  %v7556_v3 = vadd.f32 %v7351_v10, %v7483_v16 }
 0x12a   : > { %v1019_v24 = vadd.f32 2.0, %v987_v61  ;;  %v1211_v45 = vmul.f32 %v987_v61, %v7473_v50 }
 0x12b   : > { %v1013_v46 = vadd.f32 2.0, %v7493_v34  ;;  %9597 = vst [vmem:[#allocation10_spill] sm:$0xff] %v7556_v3 }
 0x12c   : > { %6840 = vrcp.f32 %v1019_v24 }
 0x12d   : > { %v6837_v32 = vpop.eup %6836  ;;  %6842 = vrcp.f32 %v1017_v23 }
 0x12e   : > { %v956_v37 = vadd.f32 2.0, %v6837_v32  ;;  %6844 = vrcp.f32 %v1016_v29  ;;  %v6839_v44 = vpop.eup %6838 }
 0x12f   : > { %6846 = vrcp.f32 %v1015_v36  ;;  %v1082_v51 = vmul.f32 %v6839_v44, %v1018_v13 }
 0x130   : > { %v7497_v42 = vpop.f32.mrf.mxu0  ;;  %v988_v43 = vmul.f32 %v6837_v32, %v956_v37  ;;  %6848 = vrcp.f32 %v1014_v41 }
 0x131   : > { %v1114_v58 = vsub.f32 2.0, %v1082_v51 }
 0x132   : > { %v6841_v47 = vpop.eup %6840  ;;  %v1020_v49 = vadd.f32 2.0, %v988_v43 }
 0x133   : > { %v1083_v25 = vmul.f32 %v6841_v47, %v1019_v24  ;;  %v6843_v48 = vpop.eup %6842  ;;  %v1146_v13 = vmul.f32 %v6839_v44, %v1114_v58  ;;  %v1210_v24 = vmul.f32 %v986_v62, %v7458_v30  ;;  %v1208_v62 = vmul.f32 %v7485_v17, %v7451_v27 }
 0x134   : > { %6850 = vrcp.f32 %v1020_v49  ;;  %v6845_v33 = vpop.eup %6844  ;;  %v1081_v54 = vmul.f32 %v6843_v48, %v1017_v23 }
 0x135   : > { %6852 = vrcp.f32 %v1013_v46  ;;  %v6847_v52 = vpop.eup %6846  ;;  %v1115_v53 = vsub.f32 2.0, %v1083_v25  ;;  %v1080_v59 = vmul.f32 %v6845_v33, %v1016_v29  ;;  %v1212_v25 = vmul.f32 %v988_v43, %v7478_v57 }
 0x136   : > { %v6849_v56 = vpop.eup %6848  ;;  %v1079_v63 = vmul.f32 %v6847_v52, %v1015_v36  ;;  %v1113_v9 = vsub.f32 2.0, %v1081_v54 }
 0x137   : > { %v1147_v8 = vmul.f32 %v6841_v47, %v1115_v53  ;;  %v1078_v11 = vmul.f32 %v6849_v56, %v1014_v41  ;;  %v1112_v18 = vsub.f32 2.0, %v1080_v59  ;;  %v1209_v41 = vmul.f32 %v7481_v12, %v7448_v26 }
 0x138   : > { %v7500_v55 = vpop.f32.mrf.mxu0  ;;  %v1111_v23 = vsub.f32 2.0, %v1079_v63  ;;  %v1145_v51 = vmul.f32 %v6843_v48, %v1113_v9  ;;  %v1242_v53 = vmul.f32 %v1210_v24, %v1146_v13  ;;  %v1207_v12 = vmul.f32 %v7487_v19, %v7454_v15 }
 0x139   : > { %v1243_v29 = vmul.f32 %v1211_v45, %v1147_v8  ;;  %v1144_v61 = vmul.f32 %v6845_v33, %v1112_v18  ;;  %v1205_v19 = vmul.f32 %v7493_v34, %v7466_v35 }
 0x13a   : > { %v6851_v60 = vpop.eup %6850  ;;  %v1241_v48 = vmul.f32 %v1209_v41, %v1145_v51  ;;  %v1143_v54 = vmul.f32 %v6847_v52, %v1111_v23  ;;  %v1274_v33 = vsel %vm1178_vm11, %v7458_v30, %v1242_v53  ;;  %v7587_v41 = vadd.f32 %v7351_v10, %v7497_v42 }
 0x13b   : > { %v6853_v0 = vpop.eup %6852  ;;  %v1084_v7 = vmul.f32 %v6851_v60, %v1020_v49  ;;  %v1110_v49 = vsub.f32 2.0, %v1078_v11  ;;  %v1275_v43 = vsel %vm1179_vm9, %v7473_v50, %v1243_v29  ;;  %v1240_v59 = vmul.f32 %v1208_v62, %v1144_v61 }
 0x13c   : > { %v1077_v32 = vmul.f32 %v6853_v0, %v1013_v46  ;;  %v1273_v17 = vsel %vm1177_vm12, %v7448_v26, %v1241_v48  ;;  %v1239_v50 = vmul.f32 %v1207_v12, %v1143_v54  ;;  %9598 = vst [vmem:[#allocation11_spill] sm:$0xff] %v7587_v41  ;;  %v7592_v61 = vadd.f32 %v7351_v10, %v7500_v55 }
 0x13d   : > { %v1116_v14 = vsub.f32 2.0, %v1084_v7  ;;  %v1299_v7 = vpack.c.bf16 %v1274_v33, %v1273_v17  ;;  %v1272_v30 = vsel %vm1176_vm13, %v7451_v27, %v1240_v59  ;;  %v862_v33 = vmin.f32 %v7587_v41, 20.0 }
 0x13e   : > { %v1109_v44 = vsub.f32 2.0, %v1077_v32  ;;  %v1271_v26 = vsel %vm1175_vm14, %v7454_v15, %v1239_v50  ;;  %9599 = vst [vmem:[#allocation12_spill] sm:$0xff] %v7592_v61  ;;  %v863_v17 = vmin.f32 %v7592_v61, 20.0 }
 0x13f   : > { %v1148_v37 = vmul.f32 %v6851_v60, %v1116_v14  ;;  %v1142_v60 = vmul.f32 %v6849_v56, %v1110_v49 }
 0x140   : > { %v7505_v36 = vpop.f32.mrf.mxu0  ;;  %v1141_v63 = vmul.f32 %v6853_v0, %v1109_v44  ;;  %v1298_v0 = vpack.c.bf16 %v1272_v30, %v1271_v26 }
 0x141   : > { %v1244_v47 = vmul.f32 %v1212_v25, %v1148_v37 }
 0x142   : > { %v1237_v8 = vmul.f32 %v1205_v19, %v1141_v63 }
 0x143   : > { %v1276_v46 = vsel %vm1180_vm10, %v7478_v57, %v1244_v47  ;;  %v1206_v57 = vmul.f32 %v7490_v28, %v7461_v31 }
 0x144   : > { %v1300_v58 = vpack.c.bf16 %v1276_v46, %v1275_v43  ;;  %v1269_v9 = vsel %vm1173_vm1, %v7466_v35, %v1237_v8  ;;  %v5671_v43 = vld [vmem:[%s9596_s24 + $0x10] sm:$0xf]  ;;  %v6560_v46 = vld [vmem:[%s9596_s24 + $0x14] sm:$0xf0]  ;;  %v911_v8 = vmul.f32 1.442695, %v862_v33 }
 0x145   : > { %v1238_v56 = vmul.f32 %v1206_v57, %v1142_v60  ;;  %v5672_v60 = vor.u32 %v6560_v46, %v5671_v43  ;;  %v7616_v57 = vadd.f32 %v7351_v10, %v7505_v36 }
 0x146   : > { %1741 = vmatpush.bf16.msra.mxu1 %v1300_v58 }
 0x147   : > { %v1270_v28 = vsel %vm1174_vm15, %v7461_v31, %v1238_v56  ;;  %vm1184_vm14 = vcmp.gt.f32.partialorder %v7616_v57, 20.0 }
 0x148   : > { %v815_v52 = vpop.f32.mrf.mxu0  ;;  %v1297_v11 = vpack.c.bf16 %v1270_v28, %v1269_v9  ;;  %v913_v9 = vmul.f32 1.442695, %v863_v17 }
 0x149   : > { %v7601_v42 = vadd.f32 %v7351_v10, %v815_v52 }
 0x14a   : > { %1742 = vmatpush.bf16.msra.mxu1 %v1299_v7 }
 0x14b   : > { %v865_v52 = vmin.f32 %v7601_v42, 20.0  ;;  %vm1185_vm13 = vcmp.gt.f32.partialorder %v7601_v42, 20.0 }
 0x14e   : > { %1743 = vmatpush.bf16.msra.mxu1 %v1298_v0 }
 0x150   : > { %v817_v34 = vpop.f32.mrf.mxu0 }
 0x151   : > { %v7608_v55 = vadd.f32 %v7351_v10, %v817_v34 }
 0x152   : > { %1744 = vmatpush.bf16.msra.mxu1 %v1297_v11  ;;  %v864_v11 = vmin.f32 %v7616_v57, 20.0 }
 0x153   : > { %v866_v30 = vmin.f32 %v7608_v55, 20.0  ;;  %vm1186_vm12 = vcmp.gt.f32.partialorder %v7608_v55, 20.0 }
 0x156   : > { %1745 = vmatpush.bf16.msra.mxu1 %v1296_v22  ;;  %v861_v22 = vmin.f32 %v7556_v3, 20.0 }
 0x158   : > { %v820_v27 = vpop.f32.mrf.mxu0  ;;  %v909_v29 = vmul.f32 1.442695, %v861_v22 }
 0x159   : > { %v7579_v32 = vadd.f32 %v7351_v10, %v820_v27  ;;  %v917_v27 = vmul.f32 1.442695, %v865_v52 }
 0x15a   : > { %1746 = vmatpush.bf16.msra.mxu1 %v1295_v6 }
 0x15b   : > { %v867_v48 = vmin.f32 %v7579_v32, 20.0  ;;  %vm1187_vm11 = vcmp.gt.f32.partialorder %v7579_v32, 20.0 }
 0x15d   : > { %v921_v7 = vmul.f32 1.442695, %v867_v48 }
 0x15e   : > { %1747 = vmatpush.bf16.msra.mxu1 %v1294_v40 }
 0x160   : > { %v822_v15 = vpop.f32.mrf.mxu0 }
 0x161   : > { %v7582_v51 = vadd.f32 %v7351_v10, %v822_v15 }
 0x162   : > { %1748 = vmatpush.bf16.msra.mxu1 %v1293_v5 }
 0x163   : > { %v868_v58 = vmin.f32 %v7582_v51, 20.0  ;;  %vm1188_vm10 = vcmp.gt.f32.partialorder %v7582_v51, 20.0 }
 0x165   : > { %1749 = vmatmul.bf16.vlgmr.msra.gmra.mxu1 %v5664_v39  ;;  %v923_v56 = vmul.f32 1.442695, %v868_v58 }
 0x168   : > { %v825_v31 = vpop.f32.mrf.mxu0 }
 0x169   : > { %v7573_v16 = vadd.f32 %v7351_v10, %v825_v31 }
 0x16b   : > { %v869_v47 = vmin.f32 %v7573_v16, 20.0  ;;  %vm1189_vm9 = vcmp.gt.f32.partialorder %v7573_v16, 20.0 }
 0x16d   : > { %v925_v50 = vmul.f32 1.442695, %v869_v47 }
 0x170   : > { %v827_v35 = vpop.f32.mrf.mxu0 }
 0x171   : > { %v7570_v13 = vadd.f32 %v7351_v10, %v827_v35  ;;  %v919_v35 = vmul.f32 1.442695, %v866_v30 }
 0x173   : > { %v870_v49 = vmin.f32 %v7570_v13, 20.0  ;;  %vm1190_vm8 = vcmp.gt.f32.partialorder %v7570_v13, 20.0 }
 0x175   : > { %v927_v12 = vmul.f32 1.442695, %v870_v49  ;;  %1754 = vmatmul.bf16.gmra.mxu1 %v5672_v60 }
 0x178   : > { %v830_v14 = vpop.f32.mrf.mxu0 }
 0x179   : > { %v7562_v5 = vadd.f32 %v7351_v10, %v830_v14 }
 0x17b   : > { %v871_v23 = vmin.f32 %v7562_v5, 20.0  ;;  %vm1191_vm7 = vcmp.gt.f32.partialorder %v7562_v5, 20.0 }
 0x17d   : > { %v929_v62 = vmul.f32 1.442695, %v871_v23 }
 0x180   : > { %v832_v45 = vpop.f32.mrf.mxu0 }
 0x181   : > { %v7559_v4 = vadd.f32 %v7351_v10, %v832_v45 }
 0x183   : > { %v872_v18 = vmin.f32 %v7559_v4, 20.0  ;;  %vm1192_vm6 = vcmp.gt.f32.partialorder %v7559_v4, 20.0 }
 0x185   : > { %v931_v53 = vmul.f32 1.442695, %v872_v18 }
 0x188   : > { %v835_v20 = vpop.f32.mrf.mxu0 }
 0x189   : > { %v7552_v38 = vadd.f32 %v7351_v10, %v835_v20 }
 0x18b   : > { %v873_v2 = vmin.f32 %v7552_v38, 20.0  ;;  %vm1193_vm5 = vcmp.gt.f32.partialorder %v7552_v38, 20.0 }
 0x18d   : > { %v933_v37 = vmul.f32 1.442695, %v873_v2 }
 0x190   : > { %v837_v40 = vpop.f32.mrf.mxu0 }
 0x191   : > { %v7566_v6 = vadd.f32 %v7351_v10, %v837_v40  ;;  %v915_v40 = vmul.f32 1.442695, %v864_v11 }
 0x193   : > { %v874_v24 = vmin.f32 %v7566_v6, 20.0  ;;  %vm1194_vm4 = vcmp.gt.f32.partialorder %v7566_v6, 20.0 }
 0x195   : > { %v935_v25 = vmul.f32 1.442695, %v874_v24 }
 0x197   : > { %6854 = vpow2.f32 %v935_v25 }
 0x198   : > { %v840_v44 = vpop.f32.mrf.mxu0  ;;  %6856 = vpow2.f32 %v933_v37 }
 0x199   : > { %v7605_v54 = vadd.f32 %v7351_v10, %v840_v44  ;;  %6858 = vpow2.f32 %v909_v29 }
 0x19a   : > { %6860 = vpow2.f32 %v931_v53 }
 0x19b   : > { %v875_v59 = vmin.f32 %v7605_v54, 20.0  ;;  %6862 = vpow2.f32 %v929_v62  ;;  %vm1195_vm2 = vcmp.gt.f32.partialorder %v7605_v54, 20.0 }
 0x19c   : > { %6864 = vpow2.f32 %v927_v12 }
 0x19d   : > { %v6855_v63 = vpop.eup %6854  ;;  %v937_v19 = vmul.f32 1.442695, %v875_v59 }
 0x19e   : > { %v6857_v26 = vpop.eup %6856  ;;  %v970_v0 = vadd.f32 2.0, %v6855_v63 }
 0x19f   : > { %6866 = vpow2.f32 %v937_v19  ;;  %v7620_v28 = vpop.eup %6858  ;;  %v969_v14 = vadd.f32 2.0, %v6857_v26 }
 0x1a0   : > { %6868 = vpow2.f32 %v925_v50  ;;  %v842_v34 = vpop.f32.mrf.mxu0  ;;  %v6861_v36 = vpop.eup %6860  ;;  %v7627_v20 = vmul.f32 %v6855_v63, %v970_v0  ;;  %v957_v17 = vadd.f32 2.0, %v7620_v28 }
 0x1a1   : > { %6870 = vpow2.f32 %v921_v7  ;;  %v7624_v15 = vadd.f32 %v7351_v10, %v842_v34  ;;  %v6863_v31 = vpop.eup %6862  ;;  %v968_v1 = vadd.f32 2.0, %v6861_v36  ;;  %v7629_v10 = vmul.f32 %v6857_v26, %v969_v14 }
 0x1a2   : > { %6872 = vpow2.f32 %v923_v56  ;;  %v6865_v21 = vpop.eup %6864  ;;  %v967_v2 = vadd.f32 2.0, %v6863_v31  ;;  %v1034_v37 = vadd.f32 2.0, %v7627_v20 }
 0x1a3   : > { %6874 = vpow2.f32 %v911_v8  ;;  %v876_v45 = vmin.f32 %v7624_v15, 20.0  ;;  %v966_v25 = vadd.f32 2.0, %v6865_v21  ;;  %v7634_v47 = vmul.f32 %v6861_v36, %v968_v1 }
 0x1a4   : > { %6876 = vpow2.f32 %v913_v9  ;;  %v7636_v44 = vmul.f32 %v6863_v31, %v967_v2  ;;  %v1033_v48 = vadd.f32 2.0, %v7629_v10  ;;  %v7653_v36 = vmul.f32 %v7620_v28, %v957_v17  ;;  %v5679_v31 = vld [vmem:[%s9596_s24 + $0x20] sm:$0xf] }
 0x1a5   : > { %v6867_v39 = vpop.eup %6866  ;;  %6878 = vpow2.f32 %v917_v27  ;;  %v939_v22 = vmul.f32 1.442695, %v876_v45  ;;  %v7640_v33 = vmul.f32 %v6865_v21, %v966_v25  ;;  %v1032_v50 = vadd.f32 2.0, %v7634_v47 }
 0x1a6   : > { %v6869_v18 = vpop.eup %6868  ;;  %6880 = vpow2.f32 %v919_v35  ;;  %v971_v24 = vadd.f32 2.0, %v6867_v39  ;;  %v1031_v7 = vadd.f32 2.0, %v7636_v44  ;;  %9600 = vst [vmem:[#allocation13_spill] sm:$0xff] %v7653_v36  ;;  %v6562_v35 = vld [vmem:[%s9596_s24 + $0x24] sm:$0xf0]  ;;  %vm1196_vm3 = vcmp.gt.f32.partialorder %v7624_v15, 20.0 }
 0x1a7   : > { %v6871_v23 = vpop.eup %6870  ;;  %6882 = vpow2.f32 %v939_v22  ;;  %v965_v62 = vadd.f32 2.0, %v6869_v18  ;;  %v1030_v0 = vadd.f32 2.0, %v7640_v33  ;;  %v5680_v21 = vor.u32 %v6562_v35, %v5679_v31 }
 0x1a8   : > { %v6873_v29 = vpop.eup %6872  ;;  %v7632_v49 = vmul.f32 %v6867_v39, %v971_v24  ;;  %6884 = vpow2.f32 %v915_v40  ;;  %v963_v46 = vadd.f32 2.0, %v6871_v23 }
 0x1a9   : > { %v6875_v53 = vpop.eup %6874  ;;  %6886 = vrcp.f32 %v1034_v37  ;;  %v964_v59 = vadd.f32 2.0, %v6873_v29  ;;  %v7644_v52 = vmul.f32 %v6869_v18, %v965_v62  ;;  %1759 = vmatmul.bf16.gmra.mxu1 %v5680_v21 }
 0x1aa   : > { %v6877_v43 = vpop.eup %6876  ;;  %v1035_v58 = vadd.f32 2.0, %v7632_v49  ;;  %v958_v19 = vadd.f32 2.0, %v6875_v53  ;;  %v7647_v56 = vmul.f32 %v6871_v23, %v963_v46 }
 0x1ab   : > { %v6879_v12 = vpop.eup %6878  ;;  %v959_v30 = vadd.f32 2.0, %v6877_v43  ;;  %v7650_v9 = vmul.f32 %v6873_v29, %v964_v59  ;;  %v1029_v45 = vadd.f32 2.0, %v7644_v52  ;;  %v7674_v29 = vadd.f32 2.0, %v7653_v36 }
 0x1ac   : > { %v6881_v60 = vpop.eup %6880  ;;  %6888 = vrcp.f32 %v1035_v58  ;;  %v961_v11 = vadd.f32 2.0, %v6879_v12  ;;  %v7664_v1 = vmul.f32 %v6875_v53, %v958_v19  ;;  %v1027_v40 = vadd.f32 2.0, %v7647_v56 }
 0x1ad   : > { %v6883_v63 = vpop.eup %6882  ;;  %6890 = vrcp.f32 %v1033_v48  ;;  %v962_v34 = vadd.f32 2.0, %v6881_v60  ;;  %v7666_v39 = vmul.f32 %v6877_v43, %v959_v30  ;;  %v1028_v24 = vadd.f32 2.0, %v7650_v9 }
 0x1ae   : > { %v972_v26 = vadd.f32 2.0, %v6883_v63  ;;  %v6885_v8 = vpop.eup %6884  ;;  %6892 = vrcp.f32 %v1032_v50  ;;  %9601 = vst [vmem:[#allocation14_spill] sm:$0xff] %v7664_v1  ;;  %v7676_v53 = vmul.f32 %v6879_v12, %v961_v11  ;;  %v7679_v43 = vadd.f32 2.0, %v7664_v1 }
 0x1af   : > { %v6887_v14 = vpop.eup %6886  ;;  %6894 = vrcp.f32 %v1031_v7  ;;  %9602 = vst [vmem:[#allocation15_spill] sm:$0xff] %v7666_v39  ;;  %v960_v22 = vadd.f32 2.0, %v6885_v8  ;;  %v7671_v23 = vmul.f32 %v6881_v60, %v962_v34 }
 0x1b0   : > { %v7655_v27 = vmul.f32 %v6883_v63, %v972_v26  ;;  %6896 = vrcp.f32 %v1030_v0  ;;  %v1098_v62 = vmul.f32 %v6887_v14, %v1034_v37  ;;  %v7689_v37 = vadd.f32 2.0, %v7676_v53 }
 0x1b1   : > { %v7684_v59 = vmul.f32 %v6885_v8, %v960_v22  ;;  %v1026_v12 = vadd.f32 2.0, %v7671_v23 }
 0x1b2   : > { %v6889_v28 = vpop.eup %6888  ;;  %v1036_v2 = vadd.f32 2.0, %v7655_v27  ;;  %v1130_v30 = vsub.f32 2.0, %v1098_v62  ;;  %v1227_v62 = vmul.f32 %v7632_v49, %v7605_v54 }
 0x1b3   : > { %v1099_v18 = vmul.f32 %v6889_v28, %v1035_v58  ;;  %v6891_v25 = vpop.eup %6890  ;;  %v7682_v58 = vadd.f32 2.0, %v7666_v39  ;;  %v7694_v11 = vadd.f32 2.0, %v7684_v59 }
 0x1b4   : > { %6898 = vrcp.f32 %v1036_v2  ;;  %v6893_v46 = vpop.eup %6892  ;;  %v1097_v63 = vmul.f32 %v6891_v25, %v1033_v48  ;;  %v1162_v3 = vmul.f32 %v6887_v14, %v1130_v30  ;;  %v1225_v14 = vmul.f32 %v7629_v10, %v7552_v38 }
 0x1b5   : > { %6900 = vrcp.f32 %v1029_v45  ;;  %v6895_v60 = vpop.eup %6894  ;;  %v1131_v17 = vsub.f32 2.0, %v1099_v18  ;;  %v1096_v26 = vmul.f32 %v6893_v46, %v1032_v50  ;;  %v1224_v10 = vmul.f32 %v7634_v47, %v7559_v4 }
 0x1b6   : > { %6902 = vrcp.f32 %v1027_v40  ;;  %v6897_v19 = vpop.eup %6896  ;;  %v1095_v8 = vmul.f32 %v6895_v60, %v1031_v7  ;;  %v1129_v21 = vsub.f32 2.0, %v1097_v63 }
 0x1b7   : > { %6904 = vrcp.f32 %v1028_v24  ;;  %v1163_v35 = vmul.f32 %v6889_v28, %v1131_v17  ;;  %v1094_v18 = vmul.f32 %v6897_v19, %v1030_v0  ;;  %v1128_v7 = vsub.f32 2.0, %v1096_v26 }
 0x1b8   : > { %6906 = vrcp.f32 %v7674_v29  ;;  %v1127_v28 = vsub.f32 2.0, %v1095_v8  ;;  %v1228_v0 = vmul.f32 %v7655_v27, %v7624_v15  ;;  %v1161_v49 = vmul.f32 %v6891_v25, %v1129_v21 }
 0x1b9   : > { %6908 = vrcp.f32 %v7679_v43  ;;  %v1259_v39 = vmul.f32 %v1227_v62, %v1163_v35  ;;  %v1126_v30 = vsub.f32 2.0, %v1094_v18  ;;  %v1160_v8 = vmul.f32 %v6893_v46, %v1128_v7 }
 0x1ba   : > { %v6899_v34 = vpop.eup %6898  ;;  %6910 = vrcp.f32 %v7682_v58  ;;  %v1257_v62 = vmul.f32 %v1225_v14, %v1161_v49  ;;  %v1159_v61 = vmul.f32 %v6895_v60, %v1127_v28  ;;  %v1221_v49 = vmul.f32 %v7644_v52, %v7573_v16 }
 0x1bb   : > { %v6901_v48 = vpop.eup %6900  ;;  %v1100_v31 = vmul.f32 %v6899_v34, %v1036_v2  ;;  %6912 = vrcp.f32 %v1026_v12  ;;  %v1226_v2 = vmul.f32 %v7627_v20, %v7566_v6  ;;  %v1256_v47 = vmul.f32 %v1224_v10, %v1160_v8 }
 0x1bc   : > { %v7696_v22 = vpop.eup %6902  ;;  %6914 = vrcp.f32 %v7689_v37  ;;  %v1093_v17 = vmul.f32 %v6901_v48, %v1029_v45  ;;  %v5687_v45 = vld [vmem:[%s9596_s24 + $0x30] sm:$0xf]  ;;  %v1220_v52 = vmul.f32 %v7650_v9, %v7582_v51  ;;  %v1217_v10 = vmul.f32 %v7676_v53, %v7601_v42  ;;  %v9604_v53 = vld [vmem:[#allocation15_spill] sm:$0xff] }
 0x1bd   : > { %v6905_v50 = vpop.eup %6904  ;;  %v1132_v36 = vsub.f32 2.0, %v1100_v31  ;;  %6916 = vrcp.f32 %v7694_v11  ;;  %v1091_v20 = vmul.f32 %v7696_v22, %v1027_v40  ;;  %v1258_v25 = vmul.f32 %v1226_v2, %v1162_v3 }
 0x1be   : > { %v7701_v1 = vpop.eup %6906  ;;  %v1092_v26 = vmul.f32 %v6905_v50, %v1028_v24  ;;  %v1125_v40 = vsub.f32 2.0, %v1093_v17  ;;  %v1291_v24 = vsel %vm1195_vm2, %v7605_v54, %v1259_v39  ;;  %v1223_v2 = vmul.f32 %v7636_v44, %v7562_v5 }
 0x1bf   : > { %v7706_v63 = vpop.eup %6908  ;;  %v1164_v41 = vmul.f32 %v6899_v34, %v1132_v36  ;;  %v6564_v36 = vld [vmem:[%s9596_s24 + $0x34] sm:$0xf0]  ;;  %v1158_v17 = vmul.f32 %v6897_v19, %v1126_v30  ;;  %v1123_v54 = vsub.f32 2.0, %v1091_v20  ;;  %v1289_v39 = vsel %vm1193_vm5, %v7552_v38, %v1257_v62 }
 0x1c0   : > { %v7710_v31 = vpop.eup %6910  ;;  %v5688_v35 = vor.u32 %v6564_v36, %v5687_v45  ;;  %v1124_v46 = vsub.f32 2.0, %v1092_v26  ;;  %v1255_v60 = vmul.f32 %v1223_v2, %v1159_v61  ;;  %v1157_v28 = vmul.f32 %v6901_v48, %v1125_v40  ;;  %v5695_v26 = vld [vmem:[%s9596_s24 + $0x40] sm:$0xf] }
 0x1c1   : > { %v6913_v27 = vpop.eup %6912  ;;  %v1260_v34 = vmul.f32 %v1228_v0, %v1164_v41  ;;  %v1290_v0 = vsel %vm1194_vm4, %v7566_v6, %v1258_v25  ;;  %v1288_v14 = vsel %vm1192_vm6, %v7559_v4, %v1256_v47  ;;  %v1087_v61 = vmul.f32 %v7710_v31, %v7682_v58  ;;  %v9606_v47 = vld [vmem:[#allocation14_spill] sm:$0xff] }
 0x1c2   : > { %v7721_v21 = vpop.eup %6914  ;;  %1764 = vmatmul.bf16.gmra.mxu1 %v5688_v35  ;;  %v1090_v7 = vmul.f32 %v6913_v27, %v1026_v12  ;;  %v1222_v12 = vmul.f32 %v7640_v33, %v7570_v13  ;;  %v1307_v44 = vpack.c.bf16 %v1290_v0, %v1289_v39  ;;  %v1287_v33 = vsel %vm1191_vm7, %v7562_v5, %v1255_v60  ;;  %v6566_v5 = vld [vmem:[%s9596_s24 + $0x44] sm:$0xf0] }
 0x1c3   : > { %v1292_v18 = vsel %vm1196_vm3, %v7624_v15, %v1260_v34  ;;  %v6917_v3 = vpop.eup %6916  ;;  %v1089_v15 = vmul.f32 %v7721_v21, %v7689_v37  ;;  %v1156_v37 = vmul.f32 %v6905_v50, %v1124_v46  ;;  %v1253_v48 = vmul.f32 %v1221_v49, %v1157_v28  ;;  %v9605_v0 = vld [vmem:[#allocation11_spill] sm:$0xff]  ;;  %v6563_v49 = vld [vmem:[%s9596_s24 + $0x34] sm:$0xf] }
 0x1c4   : > { %v1308_v41 = vpack.c.bf16 %v1292_v18, %v1291_v24  ;;  %v1122_v6 = vsub.f32 2.0, %v1090_v7  ;;  %v1088_v19 = vmul.f32 %v6917_v3, %v7694_v11  ;;  %v1254_v30 = vmul.f32 %v1222_v12, %v1158_v17  ;;  %v5703_v12 = vld [vmem:[%s9596_s24 + $0x50] sm:$0xf] }
 0x1c5   : > { %v1121_v38 = vsub.f32 2.0, %v1089_v15  ;;  %v1155_v11 = vmul.f32 %v7696_v22, %v1123_v54  ;;  %v1306_v20 = vpack.c.bf16 %v1288_v14, %v1287_v33  ;;  %v1086_v50 = vmul.f32 %v7706_v63, %v7679_v43  ;;  %v9607_v15 = vld [vmem:[#allocation10_spill] sm:$0xff]  ;;  %v5689_v14 = vld [vmem:[%s9596_s24 + $0x38] sm:$0xf0] }
 0x1c6   : > { %1930 = vmatpush.bf16.msrb.mxu0 %v1308_v41  ;;  %6730 = vmatpush.bf16.msra.mxu2 %v1308_v41  ;;  %v1120_v4 = vsub.f32 2.0, %v1088_v19  ;;  %v1219_v58 = vmul.f32 %v7647_v56, %v7579_v32  ;;  %v1286_v9 = vsel %vm1190_vm8, %v7570_v13, %v1254_v30  ;;  %v1252_v22 = vmul.f32 %v1220_v52, %v1156_v37  ;;  %v5665_v19 = vld [vmem:[%s9596_s24 + $0x8] sm:$0xf0]  ;;  %v6559_v52 = vld [vmem:[%s9596_s24 + $0x14] sm:$0xf] }
 0x1c7   : > { %v1154_v45 = vmul.f32 %v6913_v27, %v1122_v6  ;;  %v1218_v43 = vmul.f32 %v7671_v23, %v7608_v55  ;;  %v1119_v36 = vsub.f32 2.0, %v1087_v61  ;;  %v1085_v34 = vmul.f32 %v7701_v1, %v7674_v29  ;;  %v6557_v6 = vld [vmem:[%s9596_s24 + $0x4] sm:$0xf] }
 0x1c8   : > { %v1285_v25 = vsel %vm1189_vm9, %v7573_v16, %v1253_v48  ;;  %v1251_v8 = vmul.f32 %v1219_v58, %v1155_v11  ;;  %v1153_v56 = vmul.f32 %v7721_v21, %v1121_v38  ;;  %v5696_v35 = vor.u32 %v6566_v5, %v5695_v26  ;;  %v5711_v48 = vld [vmem:[%s9596_s24 + $0x60] sm:$0xf]  ;;  %v6570_v11 = vld [vmem:[%s9596_s24 + $0x64] sm:$0xf0] }
 0x1c9   : > { %v1305_v13 = vpack.c.bf16 %v1286_v9, %v1285_v25  ;;  %v1118_v27 = vsub.f32 2.0, %v1086_v50  ;;  %v1284_v40 = vsel %vm1188_vm10, %v7582_v51, %v1252_v22  ;;  %v1250_v23 = vmul.f32 %v1218_v43, %v1154_v45  ;;  %v9603_v51 = vld [vmem:[#allocation12_spill] sm:$0xff]  ;;  %v5697_v50 = vld [vmem:[%s9596_s24 + $0x48] sm:$0xf0]  ;;  %v6572_v22 = vld [vmem:[%s9596_s24 + $0x74] sm:$0xf0] }
 0x1ca   : > { %1931 = vmatpush.bf16.msrb.mxu0 %v1307_v44  ;;  %6731 = vmatpush.bf16.msra.mxu2 %v1307_v44  ;;  %v1152_v24 = vmul.f32 %v6917_v3, %v1120_v4  ;;  %v1117_v16 = vsub.f32 2.0, %v1085_v34  ;;  %v1283_v29 = vsel %vm1187_vm11, %v7579_v32, %v1251_v8  ;;  %v1249_v21 = vmul.f32 %v1217_v10, %v1153_v56  ;;  %v6568_v44 = vld [vmem:[%s9596_s24 + $0x54] sm:$0xf0]  ;;  %v6565_v4 = vld [vmem:[%s9596_s24 + $0x44] sm:$0xf] }
 0x1cb   : > { %v1151_v18 = vmul.f32 %v7710_v31, %v1119_v36  ;;  %v1216_v62 = vmul.f32 %v7684_v59, %v7616_v57  ;;  %v1304_v41 = vpack.c.bf16 %v1284_v40, %v1283_v29  ;;  %v1215_v3 = vmul.f32 %v9604_v53, %v9603_v51  ;;  %v5719_v9 = vld [vmem:[%s9596_s24 + $0x70] sm:$0xf]  ;;  %v6561_v45 = vld [vmem:[%s9596_s24 + $0x24] sm:$0xf]  ;;  %v5681_v43 = vld [vmem:[%s9596_s24 + $0x28] sm:$0xf0] }
 0x1cc   : > { %v1282_v46 = vsel %vm1186_vm12, %v7608_v55, %v1250_v23  ;;  %v1150_v2 = vmul.f32 %v7706_v63, %v1118_v27  ;;  %v1281_v32 = vsel %vm1185_vm13, %v7601_v42, %v1249_v21  ;;  %v1149_v59 = vmul.f32 %v7701_v1, %v1117_v16  ;;  %v9608_v55 = vld [vmem:[#allocation13_spill] sm:$0xff]  ;;  %v6567_v36 = vld [vmem:[%s9596_s24 + $0x54] sm:$0xf]  ;;  %v6574_v27 = vld [vmem:[%s9596_s24 + $0x84] sm:$0xf0] }
 0x1cd   : > { %v1248_v7 = vmul.f32 %v1216_v62, %v1152_v24  ;;  %v1247_v31 = vmul.f32 %v1215_v3, %v1151_v18  ;;  %v1214_v17 = vmul.f32 %v9606_v47, %v9605_v0  ;;  %v1303_v54 = vpack.c.bf16 %v1282_v46, %v1281_v32  ;;  %v5705_v34 = vld [vmem:[%s9596_s24 + $0x58] sm:$0xf0]  ;;  %v6569_v10 = vld [vmem:[%s9596_s24 + $0x64] sm:$0xf]  ;;  %v5713_v40 = vld [vmem:[%s9596_s24 + $0x68] sm:$0xf0] }
 0x1ce   : > { %1932 = vmatpush.bf16.msrb.mxu0 %v1306_v20  ;;  %6732 = vmatpush.bf16.msra.mxu2 %v1306_v20  ;;  %v1213_v39 = vmul.f32 %v9608_v55, %v9607_v15  ;;  %vm1183_vm15 = vcmp.gt.f32.partialorder %v9603_v51, 20.0  ;;  %vm1182_vm1 = vcmp.gt.f32.partialorder %v9605_v0, 20.0  ;;  %vm1181_vm2 = vcmp.gt.f32.partialorder %v9607_v15, 20.0  ;;  %v5673_v20 = vld [vmem:[%s9596_s24 + $0x18] sm:$0xf0] }
 0x1cf   : > { %v1280_v63 = vsel %vm1184_vm14, %v7616_v57, %v1248_v7  ;;  %v1246_v60 = vmul.f32 %v1214_v17, %v1150_v2  ;;  %v1279_v42 = vsel %vm1183_vm15, %v9603_v51, %v1247_v31  ;;  %v5704_v37 = vor.u32 %v6568_v44, %v5703_v12  ;;  %v5735_v29 = vld [vmem:[%s9596_s24 + $0x90] sm:$0xf]  ;;  %v6576_v21 = vld [vmem:[%s9596_s24 + $0x94] sm:$0xf0]  ;;  %v6571_v62 = vld [vmem:[%s9596_s24 + $0x74] sm:$0xf] }
 0x1d0   : > { %v1245_v28 = vmul.f32 %v1213_v39, %v1149_v59  ;;  %v1302_v1 = vpack.c.bf16 %v1280_v63, %v1279_v42  ;;  %v5668_v61 = vor.u32 %v6557_v6, %v5665_v19  ;;  %v5692_v33 = vor.u32 %v6563_v49, %v5689_v14  ;;  %v5743_v46 = vld [vmem:[%s9596_s24 + $0xa0] sm:$0xf]  ;;  %v6578_v7 = vld [vmem:[%s9596_s24 + $0xa4] sm:$0xf0]  ;;  %v6573_v2 = vld [vmem:[%s9596_s24 + $0x84] sm:$0xf] }
 0x1d1   : > { %v1278_v57 = vsel %vm1182_vm1, %v9605_v0, %v1246_v60  ;;  %v5712_v26 = vor.u32 %v6570_v11, %v5711_v48  ;;  %v5676_v5 = vor.u32 %v6559_v52, %v5673_v20  ;;  %v5700_v58 = vor.u32 %v6565_v4, %v5697_v50  ;;  %v5729_v32 = vld [vmem:[%s9596_s24 + $0x88] sm:$0xf0]  ;;  %v6575_v17 = vld [vmem:[%s9596_s24 + $0x94] sm:$0xf]  ;;  %v5751_v55 = vld [vmem:[%s9596_s24 + $0xb0] sm:$0xf] }
 0x1d2   : > { %1933 = vmatpush.bf16.msrb.mxu0 %v1305_v13  ;;  %6733 = vmatpush.bf16.msra.mxu2 %v1305_v13  ;;  %v1277_v30 = vsel %vm1181_vm2, %v9607_v15, %v1245_v28  ;;  %v5720_v25 = vor.u32 %v6572_v22, %v5719_v9  ;;  %v5684_v8 = vor.u32 %v6561_v45, %v5681_v43  ;;  %v5727_v13 = vld [vmem:[%s9596_s24 + $0x80] sm:$0xf]  ;;  %v6580_v39 = vld [vmem:[%s9596_s24 + $0xb4] sm:$0xf0]  ;;  %v6577_v28 = vld [vmem:[%s9596_s24 + $0xa4] sm:$0xf] }
 0x1d3   : > { %1769 = vmatmul.bf16.gmra.mxu1 %v5696_v35  ;;  %v1301_v38 = vpack.c.bf16 %v1278_v57, %v1277_v30  ;;  %v5708_v56 = vor.u32 %v6567_v36, %v5705_v34  ;;  %v5728_v23 = vor.u32 %v6574_v27, %v5727_v13  ;;  %v5716_v24 = vor.u32 %v6569_v10, %v5713_v40  ;;  %v5759_v44 = vld [vmem:[%s9596_s24 + $0xc0] sm:$0xf]  ;;  %v6582_v57 = vld [vmem:[%s9596_s24 + $0xc4] sm:$0xf0]  ;;  %v6579_v14 = vld [vmem:[%s9596_s24 + $0xb4] sm:$0xf] }
 0x1d4   : > { %v5736_v51 = vor.u32 %v6576_v21, %v5735_v29  ;;  %v5744_v31 = vor.u32 %v6578_v7, %v5743_v46  ;;  %v5732_v0 = vor.u32 %v6573_v2, %v5729_v32  ;;  %v5752_v60 = vor.u32 %v6580_v39, %v5751_v55  ;;  %v5753_v30 = vld [vmem:[%s9596_s24 + $0xb8] sm:$0xf0]  ;;  %v6631_v52 = vld [vmem:[%s9609_s5 + $0x10] sm:$0xff]  ;;  %v5775_v22 = vld [vmem:[%s9596_s24 + $0xe0] sm:$0xf] }
 0x1d5   : > { %v5760_v19 = vor.u32 %v6582_v57, %v5759_v44  ;;  %v5756_v48 = vor.u32 %v6579_v14, %v5753_v30  ;;  %v6586_v45 = vld [vmem:[%s9596_s24 + $0xe4] sm:$0xf0]  ;;  %v5769_v29 = vld [vmem:[%s9596_s24 + $0xd8] sm:$0xf0]  ;;  %v6585_v39 = vld [vmem:[%s9596_s24 + $0xe4] sm:$0xf] }
 0x1d6   : > { %1934 = vmatpush.bf16.msrb.mxu0 %v1304_v41  ;;  %6734 = vmatpush.bf16.msra.mxu2 %v1304_v41  ;;  %v5721_v41 = vld [vmem:[%s9596_s24 + $0x78] sm:$0xf0]  ;;  %vm3112_vm5 = vcmask 523264  }
 0x1d7   : > { %v5724_v53 = vor.u32 %v6571_v62, %v5721_v41  ;;  %v5783_v41 = vld [vmem:[%s9596_s24 + $0xf0] sm:$0xf] }
 0x1da   : > { %1935 = vmatpush.bf16.msrb.mxu0 %v1303_v54  ;;  %6735 = vmatpush.bf16.msra.mxu2 %v1303_v54  ;;  %v5737_v54 = vld [vmem:[%s9596_s24 + $0x98] sm:$0xf0] }
 0x1db   : > { %v5740_v63 = vor.u32 %v6575_v17, %v5737_v54 }
 0x1de   : > { %1936 = vmatpush.bf16.msrb.mxu0 %v1302_v1  ;;  %6736 = vmatpush.bf16.msra.mxu2 %v1302_v1  ;;  %v5745_v1 = vld [vmem:[%s9596_s24 + $0xa8] sm:$0xf0] }
 0x1df   : > { %v5748_v6 = vor.u32 %v6577_v28, %v5745_v1  ;;  %v5791_v28 = vld [vmem:[%s9596_s24 + $0x100] sm:$0xf]  ;;  %v6590_v1 = vld [vmem:[%s9596_s24 + $0x104] sm:$0xf0] }
 0x1e2   : > { %1937 = vmatpush.bf16.msrb.mxu0 %v1301_v38  ;;  %6737 = vmatpush.bf16.msra.mxu2 %v1301_v38  ;;  %v7853_v35 = vpop.f32.mrf.mxu1  ;;  %v6632_v38 = vld [vmem:[%s9609_s5 + $0x18] sm:$0xff] }
 0x1e3   : > { %1774 = vmatmul.bf16.gmra.mxu1 %v5704_v37  ;;  %2250 = vmatpush.bf16.msra.mxu3 %v6632_v38 }
 0x1e5   : > { %1938 = vmatmul.bf16.vlgmr.msrb.gmra.mxu0 %v5668_v61  ;;  %1953 = vmatmul.bf16.vlgmr.msra.gmra.mxu2 %v5692_v33  ;;  %v5767_v61 = vld [vmem:[%s9596_s24 + $0xd0] sm:$0xf]  ;;  %v6584_v33 = vld [vmem:[%s9596_s24 + $0xd4] sm:$0xf0] }
 0x1e6   : > { %v5768_v11 = vor.u32 %v6584_v33, %v5767_v61  ;;  %v6587_v33 = vld [vmem:[%s9596_s24 + $0xf4] sm:$0xf] }
 0x1e7   : > { %2251 = vmatpush.bf16.msra.mxu3 %v6631_v52 }
 0x1ea   : > { %v7867_v16 = vpop.f32.mrf.mxu1 }
 0x1f2   : > { %v7875_v18 = vpop.f32.mrf.mxu1 }
 0x1f3   : > { %1779 = vmatmul.bf16.gmra.mxu1 %v5712_v26  ;;  %v6581_v26 = vld [vmem:[%s9596_s24 + $0xc4] sm:$0xf] }
 0x1f5   : > { %1943 = vmatmul.bf16.gmra.mxu0 %v5676_v5  ;;  %1958 = vmatmul.bf16.gmra.mxu2 %v5700_v58  ;;  %v5761_v5 = vld [vmem:[%s9596_s24 + $0xc8] sm:$0xf0] }
 0x1f6   : > { %v5764_v34 = vor.u32 %v6581_v26, %v5761_v5 }
 0x1fa   : > { %v7883_v3 = vpop.f32.mrf.mxu1 }
 0x203   : > { %1784 = vmatmul.bf16.gmra.mxu1 %v5720_v25  ;;  %v5776_v25 = vor.u32 %v6586_v45, %v5775_v22  ;;  %v6629_v45 = vld [vmem:[%s9609_s5] sm:$0xff] }
 0x205   : > { %1948 = vmatmul.bf16.gmra.mxu0 %v5684_v8  ;;  %1963 = vmatmul.bf16.gmra.mxu2 %v5708_v56 }
 0x213   : > { %1789 = vmatmul.bf16.gmra.mxu1 %v5728_v23 }
 0x215   : > { %1968 = vmatmul.bf16.gmra.mxu2 %v5716_v24  ;;  %v6583_v24 = vld [vmem:[%s9596_s24 + $0xd4] sm:$0xf] }
 0x216   : > { %v5772_v7 = vor.u32 %v6583_v24, %v5769_v29  ;;  %v5793_v24 = vld [vmem:[%s9596_s24 + $0x108] sm:$0xf0] }
 0x223   : > { %1794 = vmatmul.bf16.gmra.mxu1 %v5736_v51  ;;  %v6588_v51 = vld [vmem:[%s9596_s24 + $0xf4] sm:$0xf0] }
 0x224   : > { %v5784_v2 = vor.u32 %v6588_v51, %v5783_v41  ;;  %v5807_v51 = vld [vmem:[%s9596_s24 + $0x120] sm:$0xf] }
 0x225   : > { %1973 = vmatmul.bf16.gmra.mxu2 %v5724_v53 }
 0x226   : > { %v7897_v59 = vpop.f32.mrf.mxu1 }
 0x22e   : > { %v7899_v47 = vpop.f32.mrf.mxu1 }
 0x233   : > { %1799 = vmatmul.bf16.gmra.mxu1 %v5744_v31 }
 0x235   : > { %1978 = vmatmul.bf16.gmra.mxu2 %v5732_v0 }
 0x23f   : > { %v1765_v15 = vpop.f32.mrf.mxu1 }
 0x243   : > { %1804 = vmatmul.bf16.gmra.mxu1 %v5752_v60 }
 0x245   : > { %1983 = vmatmul.bf16.gmra.mxu2 %v5740_v63  ;;  %v5777_v63 = vld [vmem:[%s9596_s24 + $0xe8] sm:$0xf0] }
 0x246   : > { %v5780_v57 = vor.u32 %v6585_v39, %v5777_v63 }
 0x247   : > { %v1767_v42 = vpop.f32.mrf.mxu1 }
 0x250   : > { %v1770_v12 = vpop.f32.mrf.mxu1 }
 0x253   : > { %1809 = vmatmul.bf16.gmra.mxu1 %v5760_v19 }
 0x255   : > { %1988 = vmatmul.bf16.gmra.mxu2 %v5748_v6  ;;  %v5792_v6 = vor.u32 %v6590_v1, %v5791_v28  ;;  %v5801_v1 = vld [vmem:[%s9596_s24 + $0x118] sm:$0xf0] }
 0x258   : > { %v1772_v49 = vpop.f32.mrf.mxu1 }
 0x260   : > { %v1775_v37 = vpop.f32.mrf.mxu1 }
 0x263   : > { %1814 = vmatmul.bf16.gmra.mxu1 %v5768_v11 }
 0x265   : > { %1993 = vmatmul.bf16.gmra.mxu2 %v5756_v48  ;;  %v5785_v48 = vld [vmem:[%s9596_s24 + $0xf8] sm:$0xf0] }
 0x268   : > { %v1954_v20 = vpop.f32.mrf.mxu2  ;;  %v1777_v4 = vpop.f32.mrf.mxu1 }
 0x269   : > { %v1955_v50 = vadd.f32 %v1954_v20, %v1765_v15  ;;  %v6630_v20 = vld [vmem:[%s9609_s5 + $0x8] sm:$0xff] }
 0x26a   : > { %2323 = vmatpush.bf16.msrb.mxu3 %v6630_v20 }
 0x26b   : > { %v2125_v43 = vpack.c.bf16 %v1955_v50, %v1955_v50  ;;  %v6592_v50 = vld [vmem:[%s9596_s24 + $0x114] sm:$0xf0] }
 0x26d   : > { %v7955_v56 = vunpack.c.l.b16 %v2125_v43  ;;  %v1939_v43 = vpop.f32.mrf.mxu0 }
 0x26e   : > { %2324 = vmatpush.bf16.msrb.mxu3 %v6629_v45  ;;  %v1940_v28 = vadd.f32 %v1939_v43, %v7853_v35  ;;  %v6596_v35 = vld [vmem:[%s9596_s24 + $0x134] sm:$0xf0]  ;;  %v5809_v45 = vld [vmem:[%s9596_s24 + $0x128] sm:$0xf0] }
 0x270   : > { %v1956_v58 = vpop.f32.mrf.mxu2  ;;  %v1780_v9 = vpop.f32.mrf.mxu1 }
 0x271   : > { %v1957_v36 = vadd.f32 %v1956_v58, %v1767_v42  ;;  %v5788_v58 = vor.u32 %v6587_v33, %v5785_v48 }
 0x273   : > { %v2126_v8 = vpack.c.bf16 %v1957_v36, %v1957_v36  ;;  %1819 = vmatmul.bf16.gmra.mxu1 %v5776_v25 }
 0x275   : > { %v7957_v13 = vunpack.c.l.b16 %v2126_v8  ;;  %1998 = vmatmul.bf16.gmra.mxu2 %v5764_v34  ;;  %v1941_v29 = vpop.f32.mrf.mxu0 }
 0x277   : > { %v2292_v27 = vpack.c.b16 %v7957_v13, %v7955_v56  ;;  %v6604_v56 = vld [vmem:[%s9596_s24 + $0x174] sm:$0xf0] }
 0x278   : > { %v1959_v10 = vpop.f32.mrf.mxu2  ;;  %v1782_v40 = vpop.f32.mrf.mxu1 }
 0x279   : > { %v1960_v23 = vadd.f32 %v1959_v10, %v1770_v12 }
 0x27b   : > { %v2127_v53 = vpack.c.bf16 %v1960_v23, %v1960_v23  ;;  %v6589_v23 = vld [vmem:[%s9596_s24 + $0x104] sm:$0xf] }
 0x27d   : > { %v2208_v31 = vunpack.c.l.b16 %v2127_v53  ;;  %v1944_v39 = vpop.f32.mrf.mxu0 }
 0x280   : > { %v1961_v21 = vpop.f32.mrf.mxu2  ;;  %v1785_v62 = vpop.f32.mrf.mxu1 }
 0x281   : > { %v1962_v46 = vadd.f32 %v1961_v21, %v1772_v49 }
 0x283   : > { %v2128_v32 = vpack.c.bf16 %v1962_v46, %v1962_v46  ;;  %1824 = vmatmul.bf16.gmra.mxu1 %v5784_v2 }
 0x285   : > { %v2209_v0 = vunpack.c.l.b16 %v2128_v32  ;;  %2003 = vmatmul.bf16.gmra.mxu2 %v5772_v7  ;;  %v5796_v7 = vor.u32 %v6589_v23, %v5793_v24 }
 0x287   : > { %v2216_v17 = vpack.c.b16 %v2209_v0, %v2208_v31 }
 0x288   : > { %v1964_v54 = vpop.f32.mrf.mxu2  ;;  %v1787_v15 = vpop.f32.mrf.mxu1 }
 0x289   : > { %5961 = vmatmul.msk.bf16.vlgmr.msra.gmra.mxu3 %vm707_vm0, %v2216_v17  ;;  %v1965_v55 = vadd.f32 %v1964_v54, %v1775_v37 }
 0x28b   : > { %v2129_v12 = vpack.c.bf16 %v1965_v55, %v1965_v55 }
 0x28d   : > { %v2210_v49 = vunpack.c.l.b16 %v2129_v12 }
 0x290   : > { %v1966_v60 = vpop.f32.mrf.mxu2  ;;  %v1790_v42 = vpop.f32.mrf.mxu1 }
 0x291   : > { %v1967_v44 = vadd.f32 %v1966_v60, %v1777_v4  ;;  %v5799_v4 = vld [vmem:[%s9596_s24 + $0x110] sm:$0xf]  ;;  %v1942_v60 = vadd.f32 %v1941_v29, %v7867_v16 }
 0x293   : > { %v2130_v19 = vpack.c.bf16 %v1967_v44, %v1967_v44  ;;  %1829 = vmatmul.bf16.gmra.mxu1 %v5792_v6  ;;  %v2120_v12 = vpack.c.bf16 %v1942_v60, %v1942_v60  ;;  %v2119_v44 = vpack.c.bf16 %v1940_v28, %v1940_v28 }
 0x295   : > { %v2211_v14 = vunpack.c.l.b16 %v2130_v19  ;;  %2008 = vmatmul.bf16.gmra.mxu2 %v5780_v57  ;;  %v2281_v33 = vunpack.c.l.b16 %v2119_v44 }
 0x297   : > { %v2217_v30 = vpack.c.b16 %v2211_v14, %v2210_v49 }
 0x298   : > { %v1969_v37 = vpop.f32.mrf.mxu2  ;;  %v1792_v38 = vpop.f32.mrf.mxu1 }
 0x299   : > { %5962 = vmatmul.msk.bf16.gmra.mxu3 %vm707_vm0, %v2217_v30  ;;  %v1970_v61 = vadd.f32 %v1969_v37, %v1780_v9  ;;  %v5800_v9 = vor.u32 %v6592_v50, %v5799_v4  ;;  %v2282_v30 = vunpack.c.l.b16 %v2120_v12  ;;  %v1946_v37 = vpop.f32.mrf.mxu0 }
 0x29b   : > { %v2131_v26 = vpack.c.bf16 %v1970_v61, %v1970_v61  ;;  %v2289_v20 = vpack.c.b16 %v2282_v30, %v2281_v33  ;;  %v6597_v33 = vld [vmem:[%s9596_s24 + $0x144] sm:$0xf] }
 0x29d   : > { %v2212_v36 = vunpack.c.l.b16 %v2131_v26 }
 0x2a0   : > { %v1971_v11 = vpop.f32.mrf.mxu2  ;;  %v7993_v52 = vpop.f32.mrf.mxu1 }
 0x2a1   : > { %v1972_v5 = vadd.f32 %v1971_v11, %v1782_v40 }
 0x2a3   : > { %v2132_v22 = vpack.c.bf16 %v1972_v5, %v1972_v5  ;;  %1834 = vmatmul.bf16.gmra.mxu1 %v5800_v9  ;;  %v1947_v5 = vadd.f32 %v1946_v37, %v7883_v3  ;;  %v1949_v9 = vpop.f32.mrf.mxu0  ;;  %v5823_v3 = vld [vmem:[%s9596_s24 + $0x140] sm:$0xf] }
 0x2a5   : > { %v2213_v34 = vunpack.c.l.b16 %v2132_v22  ;;  %2013 = vmatmul.bf16.gmra.mxu2 %v5788_v58  ;;  %v1945_v58 = vadd.f32 %v1944_v39, %v7875_v18  ;;  %v6593_v22 = vld [vmem:[%s9596_s24 + $0x124] sm:$0xf]  ;;  %v2122_v43 = vpack.c.bf16 %v1947_v5, %v1947_v5  ;;  %v6598_v18 = vld [vmem:[%s9596_s24 + $0x144] sm:$0xf0]  ;;  %v5839_v5 = vld [vmem:[%s9596_s24 + $0x160] sm:$0xf] }
 0x2a6   : > { %v5824_v23 = vor.u32 %v6598_v18, %v5823_v3 }
 0x2a7   : > { %v2218_v25 = vpack.c.b16 %v2213_v34, %v2212_v36  ;;  %v2121_v36 = vpack.c.bf16 %v1945_v58, %v1945_v58  ;;  %v2284_v24 = vunpack.c.l.b16 %v2122_v43 }
 0x2a8   : > { %v1974_v8 = vpop.f32.mrf.mxu2  ;;  %v8007_v10 = vpop.f32.mrf.mxu1 }
 0x2a9   : > { %5963 = vmatmul.msk.bf16.gmra.mxu3 %vm707_vm0, %v2218_v25  ;;  %v1975_v40 = vadd.f32 %v1974_v8, %v1785_v62  ;;  %v6594_v62 = vld [vmem:[%s9596_s24 + $0x124] sm:$0xf0] }
 0x2aa   : > { %v5808_v2 = vor.u32 %v6594_v62, %v5807_v51 }
 0x2ab   : > { %v2133_v53 = vpack.c.bf16 %v1975_v40, %v1975_v40  ;;  %v5812_v40 = vor.u32 %v6593_v22, %v5809_v45 }
 0x2ad   : > { %v2214_v31 = vunpack.c.l.b16 %v2133_v53  ;;  %v1951_v53 = vpop.f32.mrf.mxu0 }
 0x2b0   : > { %v1976_v21 = vpop.f32.mrf.mxu2  ;;  %v8016_v41 = vpop.f32.mrf.mxu1 }
 0x2b1   : > { %v1977_v46 = vadd.f32 %v1976_v21, %v1787_v15  ;;  %v6591_v15 = vld [vmem:[%s9596_s24 + $0x114] sm:$0xf]  ;;  %v2283_v21 = vunpack.c.l.b16 %v2121_v36 }
 0x2b2   : > { %v5804_v49 = vor.u32 %v6591_v15, %v5801_v1 }
 0x2b3   : > { %v2134_v32 = vpack.c.bf16 %v1977_v46, %v1977_v46  ;;  %1839 = vmatmul.bf16.gmra.mxu1 %v5808_v2  ;;  %v2290_v46 = vpack.c.b16 %v2284_v24, %v2283_v21 }
 0x2b5   : > { %v2215_v0 = vunpack.c.l.b16 %v2134_v32  ;;  %2018 = vmatmul.bf16.gmra.mxu2 %v5796_v7 }
 0x2b7   : > { %v2219_v17 = vpack.c.b16 %v2215_v0, %v2214_v31  ;;  %v1952_v31 = vadd.f32 %v1951_v53, %v7899_v47  ;;  %v1950_v0 = vadd.f32 %v1949_v9, %v7897_v59  ;;  %v5831_v59 = vld [vmem:[%s9596_s24 + $0x150] sm:$0xf]  ;;  %v6600_v47 = vld [vmem:[%s9596_s24 + $0x154] sm:$0xf0] }
 0x2b8   : > { %v1979_v54 = vpop.f32.mrf.mxu2  ;;  %v8024_v55 = vpop.f32.mrf.mxu1  ;;  %v5832_v44 = vor.u32 %v6600_v47, %v5831_v59 }
 0x2b9   : > { %v1980_v63 = vadd.f32 %v1979_v54, %v1790_v42  ;;  %5964 = vmatmul.msk.bf16.gmra.mxu3 %vm707_vm0, %v2219_v17  ;;  %v5815_v42 = vld [vmem:[%s9596_s24 + $0x130] sm:$0xf]  ;;  %v6595_v17 = vld [vmem:[%s9596_s24 + $0x134] sm:$0xf]  ;;  %v5817_v54 = vld [vmem:[%s9596_s24 + $0x138] sm:$0xf0]  ;;  %v2124_v39 = vpack.c.bf16 %v1952_v31, %v1952_v31 }
 0x2ba   : > { %v5816_v14 = vor.u32 %v6596_v35, %v5815_v42  ;;  %v5820_v12 = vor.u32 %v6595_v17, %v5817_v54  ;;  %v6633_v35 = vld [vmem:[%s9609_s5 + $0x20] sm:$0xff] }
 0x2bb   : > { %v2135_v16 = vpack.c.bf16 %v1980_v63, %v1980_v63  ;;  %v2123_v63 = vpack.c.bf16 %v1950_v0, %v1950_v0  ;;  %v6601_v54 = vld [vmem:[%s9596_s24 + $0x164] sm:$0xf] }
 0x2bd   : > { %v8043_v48 = vunpack.c.l.b16 %v2135_v16  ;;  %v2285_v16 = vunpack.c.l.b16 %v2123_v63 }
 0x2c0   : > { %v1981_v57 = vpop.f32.mrf.mxu2  ;;  %v8035_v6 = vpop.f32.mrf.mxu1 }
 0x2c1   : > { %v1982_v19 = vadd.f32 %v1981_v57, %v1792_v38  ;;  %v2286_v57 = vunpack.c.l.b16 %v2124_v39  ;;  %v5841_v39 = vld [vmem:[%s9596_s24 + $0x168] sm:$0xf0] }
 0x2c3   : > { %v2136_v61 = vpack.c.bf16 %v1982_v19, %v1982_v19  ;;  %1844 = vmatmul.bf16.gmra.mxu1 %v5816_v14  ;;  %v2291_v14 = vpack.c.b16 %v2286_v57, %v2285_v16 }
 0x2c5   : > { %v8045_v11 = vunpack.c.l.b16 %v2136_v61  ;;  %2023 = vmatmul.bf16.gmra.mxu2 %v5804_v49 }
 0x2c7   : > { %v2367_v4 = vpack.c.b16 %v8045_v11, %v8043_v48  ;;  %v6606_v48 = vld [vmem:[%s9596_s24 + $0x184] sm:$0xf0] }
 0x2c8   : > { %v1984_v50 = vpop.f32.mrf.mxu2  ;;  %v8049_v26 = vpop.f32.mrf.mxu1 }
 0x2c9   : > { %v1985_v38 = vadd.f32 %v1984_v50, %v7993_v52  ;;  %5973 = vmatmul.msk.bf16.vlgmr.msrb.gmra.mxu3 %vm707_vm0, %v2289_v20  ;;  %v5825_v20 = vld [vmem:[%s9596_s24 + $0x148] sm:$0xf0] }
 0x2ca   : > { %v5828_v22 = vor.u32 %v6597_v33, %v5825_v20  ;;  %v6636_v33 = vld [vmem:[%s9609_s5 + $0x38] sm:$0xff] }
 0x2cb   : > { %v2137_v52 = vpack.c.bf16 %v1985_v38, %v1985_v38 }
 0x2cd   : > { %v8070_v51 = vunpack.c.l.b16 %v2137_v52 }
 0x2d0   : > { %v1986_v34 = vpop.f32.mrf.mxu2  ;;  %v8061_v25 = vpop.f32.mrf.mxu1 }
 0x2d1   : > { %v1987_v8 = vadd.f32 %v1986_v34, %v8007_v10 }
 0x2d3   : > { %v2138_v29 = vpack.c.bf16 %v1987_v8, %v1987_v8  ;;  %1849 = vmatmul.bf16.gmra.mxu1 %v5824_v23 }
 0x2d5   : > { %v8072_v62 = vunpack.c.l.b16 %v2138_v29  ;;  %2028 = vmatmul.bf16.gmra.mxu2 %v5812_v40  ;;  %v5833_v40 = vld [vmem:[%s9596_s24 + $0x158] sm:$0xf0] }
 0x2d7   : > { %v2368_v7 = vpack.c.b16 %v8072_v62, %v8070_v51  ;;  %v6638_v51 = vld [vmem:[%s9609_s5 + $0x48] sm:$0xff]  ;;  %v5863_v62 = vld [vmem:[%s9596_s24 + $0x190] sm:$0xf] }
 0x2d8   : > { %v1989_v2 = vpop.f32.mrf.mxu2  ;;  %v1812_v32 = vpop.f32.mrf.mxu1  ;;  %2573 = vmatpush.bf16.msra.mxu0 %v6638_v51 }
 0x2d9   : > { %v1990_v10 = vadd.f32 %v1989_v2, %v8016_v41  ;;  %5974 = vmatmul.msk.bf16.gmra.mxu3 %vm707_vm0, %v2290_v46  ;;  %v6634_v41 = vld [vmem:[%s9609_s5 + $0x28] sm:$0xff] }
 0x2da   : > { %2401 = vmatpush.bf16.msra.mxu3 %v6634_v41  ;;  %v5844_v41 = vor.u32 %v6601_v54, %v5841_v39 }
 0x2db   : > { %v2139_v15 = vpack.c.bf16 %v1990_v10, %v1990_v10 }
 0x2dd   : > { %v8099_v19 = vunpack.c.l.b16 %v2139_v15 }
 0x2de   : > { %2402 = vmatpush.bf16.msra.mxu3 %v6633_v35 }
 0x2e0   : > { %v1991_v60 = vpop.f32.mrf.mxu2  ;;  %v1815_v28 = vpop.f32.mrf.mxu1 }
 0x2e1   : > { %v1992_v1 = vadd.f32 %v1991_v60, %v8024_v55 }
 0x2e2   : > { %2487 = vmatpush.bf16.msrb.mxu3 %v6636_v33 }
 0x2e3   : > { %v2140_v42 = vpack.c.bf16 %v1992_v1, %v1992_v1  ;;  %1854 = vmatmul.bf16.gmra.mxu1 %v5832_v44 }
 0x2e5   : > { %v8101_v49 = vunpack.c.l.b16 %v2140_v42  ;;  %2033 = vmatmul.bf16.gmra.mxu2 %v5820_v12 }
 0x2e7   : > { %v2369_v55 = vpack.c.b16 %v8101_v49, %v8099_v19  ;;  %v6610_v19 = vld [vmem:[%s9596_s24 + $0x1a4] sm:$0xf0] }
 0x2e8   : > { %v1994_v30 = vpop.f32.mrf.mxu2  ;;  %v1817_v37 = vpop.f32.mrf.mxu1 }
 0x2e9   : > { %v1995_v61 = vadd.f32 %v1994_v30, %v8035_v6  ;;  %5975 = vmatmul.msk.bf16.gmra.mxu3 %vm707_vm0, %v2291_v14  ;;  %v6602_v6 = vld [vmem:[%s9596_s24 + $0x164] sm:$0xf0]  ;;  %v6603_v14 = vld [vmem:[%s9596_s24 + $0x174] sm:$0xf]  ;;  %v5849_v30 = vld [vmem:[%s9596_s24 + $0x178] sm:$0xf0] }
 0x2ea   : > { %v5840_v45 = vor.u32 %v6602_v6, %v5839_v5 }
 0x2eb   : > { %v2141_v58 = vpack.c.bf16 %v1995_v61, %v1995_v61 }
 0x2ed   : > { %v8120_v36 = vunpack.c.l.b16 %v2141_v58 }
 0x2f0   : > { %v1996_v50 = vpop.f32.mrf.mxu2  ;;  %v1820_v38 = vpop.f32.mrf.mxu1 }
 0x2f1   : > { %v1997_v9 = vadd.f32 %v1996_v50, %v8049_v26  ;;  %v6599_v26 = vld [vmem:[%s9596_s24 + $0x154] sm:$0xf]  ;;  %v5852_v50 = vor.u32 %v6603_v14, %v5849_v30 }
 0x2f2   : > { %v5836_v29 = vor.u32 %v6599_v26, %v5833_v40 }
 0x2f3   : > { %v2142_v43 = vpack.c.bf16 %v1997_v9, %v1997_v9  ;;  %1859 = vmatmul.bf16.gmra.mxu1 %v5840_v45  ;;  %v6635_v9 = vld [vmem:[%s9609_s5 + $0x30] sm:$0xff] }
 0x2f4   : > { %2488 = vmatpush.bf16.msrb.mxu3 %v6635_v9 }
 0x2f5   : > { %v8122_v34 = vunpack.c.l.b16 %v2142_v43  ;;  %2038 = vmatmul.bf16.gmra.mxu2 %v5828_v22  ;;  %v6637_v22 = vld [vmem:[%s9609_s5 + $0x40] sm:$0xff] }
 0x2f6   : > { %2574 = vmatpush.bf16.msra.mxu0 %v6637_v22 }
 0x2f7   : > { %v2370_v3 = vpack.c.b16 %v8122_v34, %v8120_v36  ;;  %v5879_v36 = vld [vmem:[%s9596_s24 + $0x1b0] sm:$0xf]  ;;  %v6612_v34 = vld [vmem:[%s9596_s24 + $0x1b4] sm:$0xf0] }
 0x2f8   : > { %v1999_v18 = vpop.f32.mrf.mxu2  ;;  %v1822_v52 = vpop.f32.mrf.mxu1 }
 0x2f9   : > { %v2000_v8 = vadd.f32 %v1999_v18, %v8061_v25  ;;  %5976 = vmatmul.msk.bf16.gmra.mxu3 %vm707_vm0, %v2292_v27  ;;  %v5847_v25 = vld [vmem:[%s9596_s24 + $0x170] sm:$0xf] }
 0x2fa   : > { %v5848_v21 = vor.u32 %v6604_v56, %v5847_v25  ;;  %v5857_v25 = vld [vmem:[%s9596_s24 + $0x188] sm:$0xf0] }
 0x2fb   : > { %v2143_v13 = vpack.c.bf16 %v2000_v8, %v2000_v8 }
 0x2fd   : > { %v8145_v46 = vunpack.c.l.b16 %v2143_v13 }
 0x300   : > { %v2001_v23 = vpop.f32.mrf.mxu2  ;;  %v8137_v24 = vpop.f32.mrf.mxu1 }
 0x301   : > { %v2002_v27 = vadd.f32 %v2001_v23, %v1812_v32  ;;  %v6605_v23 = vld [vmem:[%s9596_s24 + $0x184] sm:$0xf] }
 0x303   : > { %v2144_v53 = vpack.c.bf16 %v2002_v27, %v2002_v27  ;;  %1864 = vmatmul.bf16.gmra.mxu1 %v5848_v21  ;;  %v5860_v27 = vor.u32 %v6605_v23, %v5857_v25 }
 0x305   : > { %v8147_v2 = vunpack.c.l.b16 %v2144_v53  ;;  %2043 = vmatmul.bf16.gmra.mxu2 %v5836_v29 }
 0x307   : > { %v2453_v10 = vpack.c.b16 %v8147_v2, %v8145_v46  ;;  %v5887_v2 = vld [vmem:[%s9596_s24 + $0x1c0] sm:$0xf] }
 0x308   : > { %v2004_v31 = vpop.f32.mrf.mxu2  ;;  %v8151_v0 = vpop.f32.mrf.mxu1 }
 0x309   : > { %v2005_v17 = vadd.f32 %v2004_v31, %v1815_v28  ;;  %5989 = vmatmul.msk.bf16.vlgmr.msra.gmra.mxu3 %vm707_vm0, %v2367_v4  ;;  %v5855_v28 = vld [vmem:[%s9596_s24 + $0x180] sm:$0xf] }
 0x30a   : > { %v5856_v59 = vor.u32 %v6606_v48, %v5855_v28  ;;  %v6607_v48 = vld [vmem:[%s9596_s24 + $0x194] sm:$0xf] }
 0x30b   : > { %v2145_v11 = vpack.c.bf16 %v2005_v17, %v2005_v17 }
 0x30c   : > { %v8157_v32 = vpop.f32.mrf.mxu3 }
 0x30d   : > { %v8175_v1 = vunpack.c.l.b16 %v2145_v11  ;;  %v5865_v11 = vld [vmem:[%s9596_s24 + $0x198] sm:$0xf0] }
 0x310   : > { %v2006_v63 = vpop.f32.mrf.mxu2  ;;  %v8165_v60 = vpop.f32.mrf.mxu1 }
 0x311   : > { %v2007_v4 = vadd.f32 %v2006_v63, %v1817_v37 }
 0x313   : > { %v2146_v47 = vpack.c.bf16 %v2007_v4, %v2007_v4  ;;  %1869 = vmatmul.bf16.gmra.mxu1 %v5856_v59  ;;  %v5868_v59 = vor.u32 %v6607_v48, %v5865_v11  ;;  %v6639_v11 = vld [vmem:[%s9609_s5 + $0x50] sm:$0xff] }
 0x314   : > { %v8173_v15 = vpop.f32.mrf.mxu3 }
 0x315   : > { %v8177_v12 = vunpack.c.l.b16 %v2146_v47  ;;  %2048 = vmatmul.bf16.gmra.mxu2 %v5844_v41  ;;  %v5880_v47 = vor.u32 %v6612_v34, %v5879_v36 }
 0x317   : > { %v2454_v44 = vpack.c.b16 %v8177_v12, %v8175_v1  ;;  %v6640_v12 = vld [vmem:[%s9609_s5 + $0x58] sm:$0xff] }
 0x318   : > { %v2009_v57 = vpop.f32.mrf.mxu2  ;;  %v8181_v42 = vpop.f32.mrf.mxu1  ;;  %2659 = vmatpush.bf16.msra.mxu3 %v6640_v12 }
 0x319   : > { %v2010_v35 = vadd.f32 %v2009_v57, %v1820_v38  ;;  %5990 = vmatmul.msk.bf16.gmra.mxu3 %vm707_vm0, %v2368_v7  ;;  %v6608_v38 = vld [vmem:[%s9596_s24 + $0x194] sm:$0xf0] }
 0x31a   : > { %v5864_v5 = vor.u32 %v6608_v38, %v5863_v62 }
 0x31b   : > { %v2147_v7 = vpack.c.bf16 %v2010_v35, %v2010_v35 }
 0x31c   : > { %v8187_v16 = vpop.f32.mrf.mxu3  ;;  %2660 = vmatpush.bf16.msra.mxu3 %v6639_v11 }
 0x31d   : > { %v8217_v45 = vunpack.c.l.b16 %v2147_v7 }
 0x320   : > { %v2011_v37 = vpop.f32.mrf.mxu2  ;;  %v8195_v61 = vpop.f32.mrf.mxu1 }
 0x321   : > { %v2012_v20 = vadd.f32 %v2011_v37, %v1822_v52 }
 0x323   : > { %v2148_v6 = vpack.c.bf16 %v2012_v20, %v2012_v20  ;;  %1874 = vmatmul.bf16.gmra.mxu1 %v5864_v5  ;;  %v6609_v20 = vld [vmem:[%s9596_s24 + $0x1a4] sm:$0xf] }
 0x324   : > { %v8209_v58 = vpop.f32.mrf.mxu3 }
 0x325   : > { %v8219_v43 = vunpack.c.l.b16 %v2148_v6  ;;  %2053 = vmatmul.bf16.gmra.mxu2 %v5852_v50  ;;  %v5873_v50 = vld [vmem:[%s9596_s24 + $0x1a8] sm:$0xf0] }
 0x326   : > { %v5876_v5 = vor.u32 %v6609_v20, %v5873_v50 }
 0x327   : > { %v2455_v18 = vpack.c.b16 %v8219_v43, %v8217_v45  ;;  %v5903_v43 = vld [vmem:[%s9596_s24 + $0x1e0] sm:$0xf] }
 0x328   : > { %v2014_v52 = vpop.f32.mrf.mxu2  ;;  %v1837_v8 = vpop.f32.mrf.mxu1 }
 0x329   : > { %v2015_v26 = vadd.f32 %v2014_v52, %v8137_v24  ;;  %5991 = vmatmul.msk.bf16.gmra.mxu3 %vm707_vm0, %v2369_v55  ;;  %v5871_v24 = vld [vmem:[%s9596_s24 + $0x1a0] sm:$0xf] }
 0x32a   : > { %v5872_v29 = vor.u32 %v6610_v19, %v5871_v24 }
 0x32b   : > { %v2149_v49 = vpack.c.bf16 %v2015_v26, %v2015_v26 }
 0x32c   : > { %v8228_v40 = vpop.f32.mrf.mxu3 }
 0x32d   : > { %v8247_v31 = vunpack.c.l.b16 %v2149_v49 }
 0x330   : > { %v2016_v56 = vpop.f32.mrf.mxu2  ;;  %v8236_v13 = vpop.f32.mrf.mxu1 }
 0x331   : > { %v2017_v55 = vadd.f32 %v2016_v56, %v8151_v0 }
 0x333   : > { %v2150_v21 = vpack.c.bf16 %v2017_v55, %v2017_v55  ;;  %1879 = vmatmul.bf16.gmra.mxu1 %v5872_v29  ;;  %v5881_v55 = vld [vmem:[%s9596_s24 + $0x1b8] sm:$0xf0] }
 0x334   : > { %v8245_v53 = vpop.f32.mrf.mxu3 }
 0x335   : > { %v8249_v17 = vunpack.c.l.b16 %v2150_v21  ;;  %2058 = vmatmul.bf16.gmra.mxu2 %v5860_v27 }
 0x337   : > { %v2456_v54 = vpack.c.b16 %v8249_v17, %v8247_v31  ;;  %v5911_v17 = vld [vmem:[%s9596_s24 + $0x1f0] sm:$0xf] }
 0x338   : > { %v2019_v39 = vpop.f32.mrf.mxu2  ;;  %v1842_v63 = vpop.f32.mrf.mxu1 }
 0x339   : > { %5992 = vmatmul.msk.bf16.gmra.mxu3 %vm707_vm0, %v2370_v3  ;;  %v2020_v28 = vadd.f32 %v2019_v39, %v8165_v60 }
 0x33b   : > { %v2151_v3 = vpack.c.bf16 %v2020_v28, %v2020_v28 }
 0x33c   : > { %v8257_v0 = vpop.f32.mrf.mxu3 }
 0x33d   : > { %v2531_v14 = vunpack.c.l.b16 %v2151_v3 }
 0x340   : > { %v2021_v4 = vpop.f32.mrf.mxu2  ;;  %v8266_v41 = vpop.f32.mrf.mxu1 }
 0x341   : > { %v2022_v60 = vadd.f32 %v2021_v4, %v8181_v42 }
 0x343   : > { %v2152_v57 = vpack.c.bf16 %v2022_v60, %v2022_v60  ;;  %1884 = vmatmul.bf16.gmra.mxu1 %v5880_v47 }
 0x344   : > { %v8275_v35 = vpop.f32.mrf.mxu3 }
 0x345   : > { %v2532_v30 = vunpack.c.l.b16 %v2152_v57  ;;  %2063 = vmatmul.bf16.gmra.mxu2 %v5868_v59 }
 0x347   : > { %v2539_v37 = vpack.c.b16 %v2532_v30, %v2531_v14  ;;  %v5889_v14 = vld [vmem:[%s9596_s24 + $0x1c8] sm:$0xf0] }
 0x348   : > { %v2024_v33 = vpop.f32.mrf.mxu2  ;;  %v8277_v51 = vpop.f32.mrf.mxu1 }
 0x349   : > { %6005 = vmatmul.msk.bf16.vlgmr.msrb.gmra.mxu3 %vm707_vm0, %v2453_v10  ;;  %6021 = vmatmul.msk.bf16.vlgmr.msra.gmra.mxu0 %vm707_vm0, %v2539_v37  ;;  %v2025_v62 = vadd.f32 %v2024_v33, %v8195_v61  ;;  %v6614_v10 = vld [vmem:[%s9596_s24 + $0x1c4] sm:$0xf0] }
 0x34a   : > { %v5888_v6 = vor.u32 %v6614_v10, %v5887_v2 }
 0x34c   : > { %v2326_v42 = vpop.f32.mrf.mxu3 }
 0x34d   : > { %v8286_v7 = vadd.f32 %v2326_v42, %v8157_v32  ;;  %v2153_v32 = vpack.c.bf16 %v2025_v62, %v2025_v62 }
 0x34f   : > { %v2533_v52 = vunpack.c.l.b16 %v2153_v32 }
 0x350   : > { %v2026_v38 = vpop.f32.mrf.mxu2  ;;  %v8294_v46 = vpop.f32.mrf.mxu1 }
 0x351   : > { %v2027_v61 = vadd.f32 %v2026_v38, %v1837_v8 }
 0x353   : > { %v2154_v9 = vpack.c.bf16 %v2027_v61, %v2027_v61  ;;  %1889 = vmatmul.bf16.gmra.mxu1 %v5888_v6  ;;  %v5897_v6 = vld [vmem:[%s9596_s24 + $0x1d8] sm:$0xf0] }
 0x354   : > { %v2328_v22 = vpop.f32.mrf.mxu3 }
 0x355   : > { %v2534_v26 = vunpack.c.l.b16 %v2154_v9  ;;  %v8303_v23 = vadd.f32 %v2328_v22, %v8173_v15  ;;  %2068 = vmatmul.bf16.gmra.mxu2 %v5876_v5  ;;  %v6611_v15 = vld [vmem:[%s9596_s24 + $0x1b4] sm:$0xf] }
 0x356   : > { %v5884_v21 = vor.u32 %v6611_v15, %v5881_v55 }
 0x357   : > { %v2540_v25 = vpack.c.b16 %v2534_v26, %v2533_v52 }
 0x358   : > { %v2029_v56 = vpop.f32.mrf.mxu2  ;;  %v8305_v24 = vpop.f32.mrf.mxu1 }
 0x359   : > { %6006 = vmatmul.msk.bf16.gmra.mxu3 %vm707_vm0, %v2454_v44  ;;  %6022 = vmatmul.msk.bf16.gmra.mxu0 %vm707_vm0, %v2540_v25  ;;  %v2030_v19 = vadd.f32 %v2029_v56, %v8236_v13  ;;  %v5895_v44 = vld [vmem:[%s9596_s24 + $0x1d0] sm:$0xf] }
 0x35b   : > { %v2155_v13 = vpack.c.bf16 %v2030_v19, %v2030_v19 }
 0x35c   : > { %v2331_v8 = vpop.f32.mrf.mxu3 }
 0x35d   : > { %v8314_v49 = vadd.f32 %v2331_v8, %v8187_v16  ;;  %v6616_v16 = vld [vmem:[%s9596_s24 + $0x1d4] sm:$0xf0]  ;;  %v2535_v4 = vunpack.c.l.b16 %v2155_v13 }
 0x35e   : > { %v5896_v39 = vor.u32 %v6616_v16, %v5895_v44  ;;  %v6617_v16 = vld [vmem:[%s9596_s24 + $0x1e4] sm:$0xf] }
 0x360   : > { %v2031_v27 = vpop.f32.mrf.mxu2  ;;  %v8322_v1 = vpop.f32.mrf.mxu1 }
 0x361   : > { %v2032_v29 = vadd.f32 %v2031_v27, %v1842_v63 }
 0x363   : > { %v2156_v28 = vpack.c.bf16 %v2032_v29, %v2032_v29  ;;  %1894 = vmatmul.bf16.gmra.mxu1 %v5896_v39 }
 0x364   : > { %v2333_v48 = vpop.f32.mrf.mxu3 }
 0x365   : > { %v2536_v36 = vunpack.c.l.b16 %v2156_v28  ;;  %v8337_v34 = vadd.f32 %v2333_v48, %v8209_v58  ;;  %2073 = vmatmul.bf16.gmra.mxu2 %v5884_v21  ;;  %v6613_v58 = vld [vmem:[%s9596_s24 + $0x1c4] sm:$0xf]  ;;  %v5919_v21 = vld [vmem:[%s9596_s24 + $0x200] sm:$0xf] }
 0x366   : > { %v5892_v37 = vor.u32 %v6613_v58, %v5889_v14 }
 0x367   : > { %v2541_v3 = vpack.c.b16 %v2536_v36, %v2535_v4 }
 0x368   : > { %v2034_v60 = vpop.f32.mrf.mxu2  ;;  %v1857_v63 = vpop.f32.mrf.mxu1 }
 0x369   : > { %6007 = vmatmul.msk.bf16.gmra.mxu3 %vm707_vm0, %v2455_v18  ;;  %6023 = vmatmul.msk.bf16.gmra.mxu0 %vm707_vm0, %v2541_v3  ;;  %v2035_v47 = vadd.f32 %v2034_v60, %v8266_v41  ;;  %v6618_v18 = vld [vmem:[%s9596_s24 + $0x1e4] sm:$0xf0] }
 0x36a   : > { %v5904_v33 = vor.u32 %v6618_v18, %v5903_v43  ;;  %v5913_v43 = vld [vmem:[%s9596_s24 + $0x1f8] sm:$0xf0] }
 0x36c   : > { %v2336_v59 = vpop.f32.mrf.mxu3 }
 0x36d   : > { %v8346_v57 = vadd.f32 %v2336_v59, %v8228_v40  ;;  %v2157_v40 = vpack.c.bf16 %v2035_v47, %v2035_v47 }
 0x36f   : > { %v2537_v20 = vunpack.c.l.b16 %v2157_v40  ;;  %v6642_v40 = vld [vmem:[%s9609_s5 + $0x68] sm:$0xff] }
 0x370   : > { %v2036_v30 = vpop.f32.mrf.mxu2  ;;  %v8354_v45 = vpop.f32.mrf.mxu1  ;;  %2745 = vmatpush.bf16.msrb.mxu0 %v6642_v40 }
 0x371   : > { %v2037_v41 = vadd.f32 %v2036_v30, %v8277_v51 }
 0x373   : > { %v2158_v42 = vpack.c.bf16 %v2037_v41, %v2037_v41  ;;  %1899 = vmatmul.bf16.gmra.mxu1 %v5904_v33 }
 0x374   : > { %v2338_v62 = vpop.f32.mrf.mxu3 }
 0x375   : > { %v2538_v50 = vunpack.c.l.b16 %v2158_v42  ;;  %v8364_v38 = vadd.f32 %v2338_v62, %v8245_v53  ;;  %2078 = vmatmul.bf16.gmra.mxu2 %v5892_v37  ;;  %v6615_v53 = vld [vmem:[%s9596_s24 + $0x1d4] sm:$0xf] }
 0x376   : > { %v5900_v22 = vor.u32 %v6615_v53, %v5897_v6 }
 0x377   : > { %v2542_v2 = vpack.c.b16 %v2538_v50, %v2537_v20 }
 0x378   : > { %v2039_v10 = vpop.f32.mrf.mxu2  ;;  %v1862_v32 = vpop.f32.mrf.mxu1 }
 0x379   : > { %6008 = vmatmul.msk.bf16.gmra.mxu3 %vm707_vm0, %v2456_v54  ;;  %6024 = vmatmul.msk.bf16.gmra.mxu0 %vm707_vm0, %v2542_v2  ;;  %v2040_v61 = vadd.f32 %v2039_v10, %v8294_v46  ;;  %v6620_v54 = vld [vmem:[%s9596_s24 + $0x1f4] sm:$0xf0]  ;;  %v6641_v2 = vld [vmem:[%s9609_s5 + $0x60] sm:$0xff] }
 0x37a   : > { %v5912_v52 = vor.u32 %v6620_v54, %v5911_v17  ;;  %2746 = vmatpush.bf16.msrb.mxu0 %v6641_v2  ;;  %v6621_v54 = vld [vmem:[%s9596_s24 + $0x204] sm:$0xf] }
 0x37c   : > { %v2341_v51 = vpop.f32.mrf.mxu3 }
 0x37d   : > { %v8373_v5 = vadd.f32 %v2341_v51, %v8257_v0  ;;  %v2159_v0 = vpack.c.bf16 %v2040_v61, %v2040_v61 }
 0x37f   : > { %v2617_v56 = vunpack.c.l.b16 %v2159_v0  ;;  %v5921_v0 = vld [vmem:[%s9596_s24 + $0x208] sm:$0xf0] }
 0x380   : > { %v2041_v9 = vpop.f32.mrf.mxu2  ;;  %v8381_v31 = vpop.f32.mrf.mxu1 }
 0x381   : > { %v2042_v46 = vadd.f32 %v2041_v9, %v8305_v24 }
 0x383   : > { %v2160_v26 = vpack.c.bf16 %v2042_v46, %v2042_v46  ;;  %1904 = vmatmul.bf16.gmra.mxu1 %v5912_v52 }
 0x384   : > { %v2343_v25 = vpop.f32.mrf.mxu3 }
 0x385   : > { %v2618_v8 = vunpack.c.l.b16 %v2160_v26  ;;  %v8391_v19 = vadd.f32 %v2343_v25, %v8275_v35  ;;  %2083 = vmatmul.bf16.gmra.mxu2 %v5900_v22  ;;  %v5905_v35 = vld [vmem:[%s9596_s24 + $0x1e8] sm:$0xf0]  ;;  %v5935_v22 = vld [vmem:[%s9596_s24 + $0x220] sm:$0xf]  ;;  %v5924_v26 = vor.u32 %v6621_v54, %v5921_v0 }
 0x386   : > { %v5908_v28 = vor.u32 %v6617_v16, %v5905_v35 }
 0x387   : > { %v2625_v15 = vpack.c.b16 %v2618_v8, %v2617_v56 }
 0x388   : > { %v2044_v55 = vpop.f32.mrf.mxu2  ;;  %v1867_v27 = vpop.f32.mrf.mxu1 }
 0x389   : > { %6037 = vmatmul.msk.bf16.vlgmr.msra.gmra.mxu3 %vm707_vm0, %v2625_v15  ;;  %v2045_v44 = vadd.f32 %v2044_v55, %v8322_v1 }
 0x38b   : > { %v2161_v1 = vpack.c.bf16 %v2045_v44, %v2045_v44 }
 0x38c   : > { %v2404_v12 = vpop.f32.mrf.mxu3 }
 0x38d   : > { %v8396_v24 = vadd.f32 %v2404_v12, %v8286_v7  ;;  %v6622_v7 = vld [vmem:[%s9596_s24 + $0x204] sm:$0xf0]  ;;  %v2619_v36 = vunpack.c.l.b16 %v2161_v1  ;;  %v5929_v1 = vld [vmem:[%s9596_s24 + $0x218] sm:$0xf0] }
 0x38e   : > { %v5920_v48 = vor.u32 %v6622_v7, %v5919_v21  ;;  %v6623_v7 = vld [vmem:[%s9596_s24 + $0x214] sm:$0xf] }
 0x390   : > { %v2046_v13 = vpop.f32.mrf.mxu2  ;;  %v8404_v29 = vpop.f32.mrf.mxu1 }
 0x391   : > { %v2047_v39 = vadd.f32 %v2046_v13, %v1857_v63  ;;  %v6619_v63 = vld [vmem:[%s9596_s24 + $0x1f4] sm:$0xf] }
 0x392   : > { %v5916_v33 = vor.u32 %v6619_v63, %v5913_v43 }
 0x393   : > { %v2162_v11 = vpack.c.bf16 %v2047_v39, %v2047_v39  ;;  %1909 = vmatmul.bf16.gmra.mxu1 %v5920_v48 }
 0x394   : > { %v8412_v4 = vpop.f32.mrf.mxu3 }
 0x395   : > { %v2620_v3 = vunpack.c.l.b16 %v2162_v11  ;;  %2088 = vmatmul.bf16.gmra.mxu2 %v5908_v28  ;;  %v5943_v28 = vld [vmem:[%s9596_s24 + $0x230] sm:$0xf]  ;;  %v5932_v11 = vor.u32 %v6623_v7, %v5929_v1 }
 0x397   : > { %v2626_v60 = vpack.c.b16 %v2620_v3, %v2619_v36 }
 0x398   : > { %v2049_v59 = vpop.f32.mrf.mxu2  ;;  %v1872_v47 = vpop.f32.mrf.mxu1 }
 0x399   : > { %6038 = vmatmul.msk.bf16.gmra.mxu3 %vm707_vm0, %v2626_v60  ;;  %v2050_v14 = vadd.f32 %v2049_v59, %v8354_v45  ;;  %v5927_v45 = vld [vmem:[%s9596_s24 + $0x210] sm:$0xf] }
 0x39b   : > { %v2163_v41 = vpack.c.bf16 %v2050_v14, %v2050_v14 }
 0x39c   : > { %v2409_v58 = vpop.f32.mrf.mxu3 }
 0x39d   : > { %v8417_v30 = vadd.f32 %v2409_v58, %v8314_v49  ;;  %v6624_v49 = vld [vmem:[%s9596_s24 + $0x214] sm:$0xf0]  ;;  %v2621_v10 = vunpack.c.l.b16 %v2163_v41  ;;  %v6625_v41 = vld [vmem:[%s9596_s24 + $0x224] sm:$0xf] }
 0x39e   : > { %v5928_v62 = vor.u32 %v6624_v49, %v5927_v45 }
 0x3a0   : > { %v2051_v18 = vpop.f32.mrf.mxu2  ;;  %v1875_v42 = vpop.f32.mrf.mxu1 }
 0x3a1   : > { %v2052_v37 = vadd.f32 %v2051_v18, %v1862_v32 }
 0x3a3   : > { %v2164_v20 = vpack.c.bf16 %v2052_v37, %v2052_v37  ;;  %1914 = vmatmul.bf16.gmra.mxu1 %v5928_v62  ;;  %v5937_v37 = vld [vmem:[%s9596_s24 + $0x228] sm:$0xf0] }
 0x3a4   : > { %v8434_v50 = vpop.f32.mrf.mxu3 }
 0x3a5   : > { %v2622_v51 = vunpack.c.l.b16 %v2164_v20  ;;  %2093 = vmatmul.bf16.gmra.mxu2 %v5916_v33 }
 0x3a7   : > { %v2627_v61 = vpack.c.b16 %v2622_v51, %v2621_v10  ;;  %v5940_v51 = vor.u32 %v6625_v41, %v5937_v37 }
 0x3a8   : > { %v2054_v53 = vpop.f32.mrf.mxu2  ;;  %v1877_v32 = vpop.f32.mrf.mxu1 }
 0x3a9   : > { %6039 = vmatmul.msk.bf16.gmra.mxu3 %vm707_vm0, %v2627_v61  ;;  %v2055_v9 = vadd.f32 %v2054_v53, %v8381_v31  ;;  %v6626_v31 = vld [vmem:[%s9596_s24 + $0x224] sm:$0xf0] }
 0x3aa   : > { %v5936_v25 = vor.u32 %v6626_v31, %v5935_v22 }
 0x3ab   : > { %v2165_v52 = vpack.c.bf16 %v2055_v9, %v2055_v9 }
 0x3ac   : > { %v2414_v6 = vpop.f32.mrf.mxu3 }
 0x3ad   : > { %v8442_v17 = vadd.f32 %v2414_v6, %v8346_v57  ;;  %v2623_v55 = vunpack.c.l.b16 %v2165_v52  ;;  %v5945_v52 = vld [vmem:[%s9596_s24 + $0x238] sm:$0xf0] }
 0x3b0   : > { %v2056_v46 = vpop.f32.mrf.mxu2  ;;  %v1880_v56 = vpop.f32.mrf.mxu1 }
 0x3b1   : > { %v2057_v57 = vadd.f32 %v2056_v46, %v1867_v27 }
 0x3b3   : > { %v2166_v8 = vpack.c.bf16 %v2057_v57, %v2057_v57  ;;  %1919 = vmatmul.bf16.gmra.mxu1 %v5936_v25 }
 0x3b4   : > { %v8456_v15 = vpop.f32.mrf.mxu3 }
 0x3b5   : > { %v2624_v12 = vunpack.c.l.b16 %v2166_v8  ;;  %2098 = vmatmul.bf16.gmra.mxu2 %v5924_v26  ;;  %v6644_v8 = vld [vmem:[%s9609_s5 + $0x78] sm:$0xff] }
 0x3b6   : > { %2831 = vmatpush.bf16.msrb.mxu3 %v6644_v8 }
 0x3b7   : > { %v2628_v44 = vpack.c.b16 %v2624_v12, %v2623_v55 }
 0x3b8   : > { %v2059_v16 = vpop.f32.mrf.mxu2  ;;  %v1882_v13 = vpop.f32.mrf.mxu1 }
 0x3b9   : > { %6040 = vmatmul.msk.bf16.gmra.mxu3 %vm707_vm0, %v2628_v44  ;;  %v2060_v21 = vadd.f32 %v2059_v16, %v8404_v29  ;;  %v6628_v29 = vld [vmem:[%s9596_s24 + $0x234] sm:$0xf0] }
 0x3ba   : > { %v5944_v36 = vor.u32 %v6628_v29, %v5943_v28 }
 0x3bb   : > { %v2167_v48 = vpack.c.bf16 %v2060_v21, %v2060_v21 }
 0x3bc   : > { %v2419_v35 = vpop.f32.mrf.mxu3 }
 0x3bd   : > { %v8461_v27 = vadd.f32 %v2419_v35, %v8373_v5  ;;  %v2703_v59 = vunpack.c.l.b16 %v2167_v48  ;;  %v6643_v35 = vld [vmem:[%s9609_s5 + $0x70] sm:$0xff] }
 0x3be   : > { %2832 = vmatpush.bf16.msrb.mxu3 %v6643_v35 }
 0x3c0   : > { %v2061_v39 = vpop.f32.mrf.mxu2  ;;  %v1885_v63 = vpop.f32.mrf.mxu1 }
 0x3c1   : > { %v2062_v5 = vadd.f32 %v2061_v39, %v1872_v47 }
 0x3c3   : > { %v2168_v3 = vpack.c.bf16 %v2062_v5, %v2062_v5  ;;  %1924 = vmatmul.bf16.gmra.mxu1 %v5944_v36 }
 0x3c4   : > { %v8475_v60 = vpop.f32.mrf.mxu3 }
 0x3c5   : > { %v2704_v58 = vunpack.c.l.b16 %v2168_v3  ;;  %2103 = vmatmul.bf16.gmra.mxu2 %v5932_v11 }
 0x3c6   : > { %v2576_v14 = vpop.f32.mrf.mxu0 }
 0x3c7   : > { %v2711_v43 = vpack.c.b16 %v2704_v58, %v2703_v59 }
 0x3c8   : > { %v2064_v18 = vpop.f32.mrf.mxu2  ;;  %v1887_v20 = vpop.f32.mrf.mxu1 }
 0x3c9   : > { %6053 = vmatmul.msk.bf16.vlgmr.msrb.gmra.mxu0 %vm707_vm0, %v2711_v43  ;;  %v2065_v45 = vadd.f32 %v2064_v18, %v1875_v42 }
 0x3cb   : > { %v2169_v2 = vpack.c.bf16 %v2065_v45, %v2065_v45 }
 0x3cc   : > { %v2490_v40 = vpop.f32.mrf.mxu3 }
 0x3cd   : > { %v2510_v49 = vadd.f32 %v2490_v40, %v8396_v24  ;;  %v2705_v24 = vunpack.c.l.b16 %v2169_v2 }
 0x3ce   : > { %v8479_v47 = vpop.f32.mrf.mxu0 }
 0x3cf   : > { %v8487_v33 = vadd.f32 %v2576_v14, %v2510_v49 }
 0x3d0   : > { %v2066_v62 = vpop.f32.mrf.mxu2  ;;  %v1890_v0 = vpop.f32.mrf.mxu1 }
 0x3d1   : > { %v2067_v10 = vadd.f32 %v2066_v62, %v1877_v32  ;;  %v6627_v32 = vld [vmem:[%s9596_s24 + $0x234] sm:$0xf] }
 0x3d3   : > { %v2170_v42 = vpack.c.bf16 %v2067_v10, %v2067_v10 }
 0x3d4   : > { %v8489_v61 = vpop.f32.mrf.mxu3 }
 0x3d5   : > { %v2706_v53 = vunpack.c.l.b16 %v2170_v42  ;;  %2108 = vmatmul.bf16.gmra.mxu2 %v5940_v51 }
 0x3d6   : > { %v2581_v6 = vpop.f32.mrf.mxu0 }
 0x3d7   : > { %v2712_v9 = vpack.c.b16 %v2706_v53, %v2705_v24 }
 0x3d8   : > { %v2069_v54 = vpop.f32.mrf.mxu2  ;;  %v1892_v16 = vpop.f32.mrf.mxu1 }
 0x3d9   : > { %6054 = vmatmul.msk.bf16.gmra.mxu0 %vm707_vm0, %v2712_v9  ;;  %v2070_v22 = vadd.f32 %v2069_v54, %v1880_v56 }
 0x3db   : > { %v2171_v56 = vpack.c.bf16 %v2070_v22, %v2070_v22 }
 0x3dc   : > { %v2495_v46 = vpop.f32.mrf.mxu3 }
 0x3dd   : > { %v2512_v31 = vadd.f32 %v2495_v46, %v8417_v30  ;;  %v5948_v30 = vor.u32 %v6627_v32, %v5945_v52  ;;  %v2707_v21 = vunpack.c.l.b16 %v2171_v56 }
 0x3de   : > { %v8501_v26 = vpop.f32.mrf.mxu0 }
 0x3df   : > { %v8499_v57 = vadd.f32 %v2581_v6, %v2512_v31 }
 0x3e0   : > { %v2071_v25 = vpop.f32.mrf.mxu2  ;;  %v1895_v5 = vpop.f32.mrf.mxu1 }
 0x3e1   : > { %v2072_v55 = vadd.f32 %v2071_v25, %v1882_v13 }
 0x3e3   : > { %v2172_v12 = vpack.c.bf16 %v2072_v55, %v2072_v55 }
 0x3e4   : > { %v8506_v44 = vpop.f32.mrf.mxu3 }
 0x3e5   : > { %v2708_v7 = vunpack.c.l.b16 %v2172_v12  ;;  %2113 = vmatmul.bf16.gmra.mxu2 %v5948_v30 }
 0x3e6   : > { %v2586_v28 = vpop.f32.mrf.mxu0 }
 0x3e7   : > { %v2713_v1 = vpack.c.b16 %v2708_v7, %v2707_v21 }
 0x3e8   : > { %v2074_v39 = vpop.f32.mrf.mxu2  ;;  %v1897_v41 = vpop.f32.mrf.mxu1 }
 0x3e9   : > { %6055 = vmatmul.msk.bf16.gmra.mxu0 %vm707_vm0, %v2713_v1  ;;  %v2075_v29 = vadd.f32 %v2074_v39, %v1885_v63 }
 0x3eb   : > { %v2173_v3 = vpack.c.bf16 %v2075_v29, %v2075_v29 }
 0x3ec   : > { %v2500_v13 = vpop.f32.mrf.mxu3 }
 0x3ed   : > { %v2514_v48 = vadd.f32 %v2500_v13, %v8442_v17  ;;  %v2709_v18 = vunpack.c.l.b16 %v2173_v3 }
 0x3ee   : > { %v8515_v14 = vpop.f32.mrf.mxu0 }
 0x3ef   : > { %v8513_v11 = vadd.f32 %v2586_v28, %v2514_v48 }
 0x3f0   : > { %v2076_v36 = vpop.f32.mrf.mxu2  ;;  %v1900_v42 = vpop.f32.mrf.mxu1 }
 0x3f1   : > { %v2077_v59 = vadd.f32 %v2076_v36, %v1887_v20  ;;  %v6645_v36 = vld [vmem:[%s9609_s5 + $0x80] sm:$0xff] }
 0x3f3   : > { %v2174_v58 = vpack.c.bf16 %v2077_v59, %v2077_v59 }
 0x3f4   : > { %v8517_v43 = vpop.f32.mrf.mxu3 }
 0x3f5   : > { %v2710_v40 = vunpack.c.l.b16 %v2174_v58 }
 0x3f6   : > { %v2591_v62 = vpop.f32.mrf.mxu0 }
 0x3f7   : > { %v2714_v45 = vpack.c.b16 %v2710_v40, %v2709_v18 }
 0x3f8   : > { %v2079_v49 = vpop.f32.mrf.mxu2  ;;  %v1902_v31 = vpop.f32.mrf.mxu1 }
 0x3f9   : > { %6056 = vmatmul.msk.bf16.gmra.mxu0 %vm707_vm0, %v2714_v45  ;;  %v2080_v17 = vadd.f32 %v2079_v49, %v1890_v0 }
 0x3fb   : > { %v2175_v20 = vpack.c.bf16 %v2080_v17, %v2080_v17 }
 0x3fc   : > { %v2505_v63 = vpop.f32.mrf.mxu3 }
 0x3fd   : > { %v2516_v37 = vadd.f32 %v2505_v63, %v8461_v27  ;;  %v2789_v6 = vunpack.c.l.b16 %v2175_v20 }
 0x3ff   : > { %v2602_v2 = vadd.f32 %v2591_v62, %v2516_v37 }
 0x400   : > { %v2081_v10 = vpop.f32.mrf.mxu2  ;;  %v1905_v12 = vpop.f32.mrf.mxu1 }
 0x401   : > { %v2082_v51 = vadd.f32 %v2081_v10, %v1892_v16 }
 0x403   : > { %v2176_v24 = vpack.c.bf16 %v2082_v51, %v2082_v51 }
 0x404   : > { %v8521_v53 = vpop.f32.mrf.mxu3 }
 0x405   : > { %v2790_v9 = vunpack.c.l.b16 %v2176_v24 }
 0x407   : > { %v2797_v54 = vpack.c.b16 %v2790_v9, %v2789_v6 }
 0x408   : > { %v2084_v46 = vpop.f32.mrf.mxu2  ;;  %v1907_v28 = vpop.f32.mrf.mxu1 }
 0x409   : > { %6069 = vmatmul.msk.bf16.vlgmr.msrb.gmra.mxu3 %vm707_vm0, %v2797_v54  ;;  %v2085_v0 = vadd.f32 %v2084_v46, %v1895_v5  ;;  %v8542_v46 = vpop.f32.mrf.mxu0 }
 0x40b   : > { %v2177_v52 = vpack.c.bf16 %v2085_v0, %v2085_v0 }
 0x40c   : > { %v2662_v22 = vpop.f32.mrf.mxu3 }
 0x40d   : > { %v2682_v27 = vadd.f32 %v2662_v22, %v8487_v33  ;;  %v2791_v55 = vunpack.c.l.b16 %v2177_v52  ;;  %v6646_v33 = vld [vmem:[%s9609_s5 + $0x88] sm:$0xff] }
 0x40e   : > { %2917 = vmatpush.bf16.msra.mxu0 %v6646_v33 }
 0x410   : > { %v2086_v32 = vpop.f32.mrf.mxu2  ;;  %v1910_v18 = vpop.f32.mrf.mxu1 }
 0x411   : > { %v2087_v25 = vadd.f32 %v2086_v32, %v1897_v41 }
 0x412   : > { %2918 = vmatpush.bf16.msra.mxu0 %v6645_v36 }
 0x413   : > { %v2178_v8 = vpack.c.bf16 %v2087_v25, %v2087_v25 }
 0x414   : > { %v8525_v56 = vpop.f32.mrf.mxu3 }
 0x415   : > { %v2792_v30 = vunpack.c.l.b16 %v2178_v8 }
 0x417   : > { %v2798_v16 = vpack.c.b16 %v2792_v30, %v2791_v55 }
 0x418   : > { %v2089_v35 = vpop.f32.mrf.mxu2  ;;  %v1912_v10 = vpop.f32.mrf.mxu1 }
 0x419   : > { %6070 = vmatmul.msk.bf16.gmra.mxu3 %vm707_vm0, %v2798_v16  ;;  %v2090_v7 = vadd.f32 %v2089_v35, %v1900_v42 }
 0x41b   : > { %v2179_v13 = vpack.c.bf16 %v2090_v7, %v2090_v7 }
 0x41c   : > { %v2667_v21 = vpop.f32.mrf.mxu3 }
 0x41d   : > { %v2684_v1 = vadd.f32 %v2667_v21, %v8499_v57  ;;  %v2793_v3 = vunpack.c.l.b16 %v2179_v13 }
 0x420   : > { %v2091_v39 = vpop.f32.mrf.mxu2  ;;  %v1915_v22 = vpop.f32.mrf.mxu1 }
 0x421   : > { %v2092_v29 = vadd.f32 %v2091_v39, %v1902_v31 }
 0x423   : > { %v2180_v48 = vpack.c.bf16 %v2092_v29, %v2092_v29 }
 0x424   : > { %v8532_v5 = vpop.f32.mrf.mxu3 }
 0x425   : > { %v2794_v59 = vunpack.c.l.b16 %v2180_v48 }
 0x427   : > { %v2799_v57 = vpack.c.b16 %v2794_v59, %v2793_v3 }
 0x428   : > { %v2094_v58 = vpop.f32.mrf.mxu2 }
 0x429   : > { %6071 = vmatmul.msk.bf16.gmra.mxu3 %vm707_vm0, %v2799_v57  ;;  %v2095_v45 = vadd.f32 %v2094_v58, %v1905_v12  ;;  %v1917_v12 = vpop.f32.mrf.mxu1 }
 0x42b   : > { %v2181_v63 = vpack.c.bf16 %v2095_v45, %v2095_v45 }
 0x42c   : > { %v2672_v40 = vpop.f32.mrf.mxu3 }
 0x42d   : > { %v2686_v49 = vadd.f32 %v2672_v40, %v8513_v11  ;;  %v2795_v20 = vunpack.c.l.b16 %v2181_v63 }
 0x430   : > { %v2096_v41 = vpop.f32.mrf.mxu2 }
 0x431   : > { %v2097_v17 = vadd.f32 %v2096_v41, %v1907_v28  ;;  %v1920_v28 = vpop.f32.mrf.mxu1 }
 0x433   : > { %v2182_v37 = vpack.c.bf16 %v2097_v17, %v2097_v17 }
 0x434   : > { %v8539_v62 = vpop.f32.mrf.mxu3 }
 0x435   : > { %v2796_v51 = vunpack.c.l.b16 %v2182_v37 }
 0x437   : > { %v2800_v42 = vpack.c.b16 %v2796_v51, %v2795_v20 }
 0x438   : > { %v2099_v24 = vpop.f32.mrf.mxu2 }
 0x439   : > { %6072 = vmatmul.msk.bf16.gmra.mxu3 %vm707_vm0, %v2800_v42  ;;  %v2100_v9 = vadd.f32 %v2099_v24, %v1910_v18 }
 0x43b   : > { %v2183_v31 = vpack.c.bf16 %v2100_v9, %v2100_v9 }
 0x43c   : > { %v2677_v6 = vpop.f32.mrf.mxu3 }
 0x43d   : > { %v2688_v54 = vadd.f32 %v2677_v6, %v2602_v2  ;;  %v2875_v52 = vunpack.c.l.b16 %v2183_v31 }
 0x440   : > { %v2101_v11 = vpop.f32.mrf.mxu2 }
 0x441   : > { %v2102_v0 = vadd.f32 %v2101_v11, %v1912_v10 }
 0x443   : > { %v2184_v32 = vpack.c.bf16 %v2102_v0, %v2102_v0 }
 0x445   : > { %v2876_v25 = vunpack.c.l.b16 %v2184_v32 }
 0x446   : > { %v2748_v8 = vpop.f32.mrf.mxu0 }
 0x447   : > { %v2883_v55 = vpack.c.b16 %v2876_v25, %v2875_v52  ;;  %v2768_v30 = vadd.f32 %v2748_v8, %v2682_v27  ;;  %v1922_v27 = vpop.f32.mrf.mxu1 }
 0x448   : > { %v2104_v16 = vpop.f32.mrf.mxu2 }
 0x449   : > { %6085 = vmatmul.msk.bf16.vlgmr.msra.gmra.mxu0 %vm707_vm0, %v2883_v55  ;;  %v2105_v35 = vadd.f32 %v2104_v16, %v1915_v22 }
 0x44b   : > { %v2185_v2 = vpack.c.bf16 %v2105_v35, %v2105_v35  ;;  %v2425_v35 = vadd.f32 %v8412_v4, %v8303_v23 }
 0x44d   : > { %v2877_v13 = vunpack.c.l.b16 %v2185_v2 }
 0x44e   : > { %v2750_v21 = vpop.f32.mrf.mxu0 }
 0x44f   : > { %v1925_v37 = vpop.f32.mrf.mxu1 }
 0x450   : > { %v2106_v7 = vpop.f32.mrf.mxu2 }
 0x451   : > { %v2107_v39 = vadd.f32 %v2106_v7, %v1917_v12  ;;  %v2511_v7 = vadd.f32 %v8489_v61, %v2425_v35  ;;  %v6649_v61 = vld [vmem:[%s9551_s7 + $0x10] sm:$0xff] }
 0x453   : > { %v2186_v33 = vpack.c.bf16 %v2107_v39, %v2107_v39  ;;  %v8568_v39 = vld [vmem:[%s9610_s6] ss:$0 sm:$0xff] }
 0x455   : > { %v2878_v29 = vunpack.c.l.b16 %v2186_v33  ;;  %v2597_v33 = vadd.f32 %v8479_v47, %v2511_v7  ;;  %v6648_v47 = vld [vmem:[%s9551_s7 + $0x8] sm:$0xff] }
 0x456   : > { %v2753_v48 = vpop.f32.mrf.mxu0 }
 0x457   : > { %v2884_v36 = vpack.c.b16 %v2878_v29, %v2877_v13  ;;  %v8545_v3 = vadd.f32 %v2753_v48, %v2684_v1  ;;  %v1927_v6 = vpop.f32.mrf.mxu1  ;;  %v2683_v23 = vadd.f32 %v8525_v56, %v2597_v33 }
 0x458   : > { %v2109_v59 = vpop.f32.mrf.mxu2 }
 0x459   : > { %6086 = vmatmul.msk.bf16.gmra.mxu0 %vm707_vm0, %v2884_v36  ;;  %v2110_v57 = vadd.f32 %v2109_v59, %v1920_v28 }
 0x45b   : > { %v2187_v40 = vpack.c.bf16 %v2110_v57, %v2110_v57  ;;  %v2427_v57 = vadd.f32 %v8434_v50, %v8337_v34 }
 0x45d   : > { %v2879_v63 = vunpack.c.l.b16 %v2187_v40 }
 0x45e   : > { %v8548_v58 = vpop.f32.mrf.mxu0 }
 0x460   : > { %v2111_v18 = vpop.f32.mrf.mxu2 }
 0x461   : > { %v2112_v45 = vadd.f32 %v2111_v18, %v1922_v27 }
 0x463   : > { %v2188_v41 = vpack.c.bf16 %v2112_v45, %v2112_v45  ;;  %v2513_v45 = vadd.f32 %v8506_v44, %v2427_v57 }
 0x465   : > { %v2880_v17 = vunpack.c.l.b16 %v2188_v41  ;;  %v2599_v34 = vadd.f32 %v8501_v26, %v2513_v45 }
 0x466   : > { %v2758_v10 = vpop.f32.mrf.mxu0 }
 0x467   : > { %v2885_v20 = vpack.c.b16 %v2880_v17, %v2879_v63  ;;  %v8550_v51 = vadd.f32 %v2758_v10, %v2686_v49  ;;  %v8558_v49 = vpop.f32.mrf.mxu3 }
 0x468   : > { %v2114_v1 = vpop.f32.mrf.mxu2 }
 0x469   : > { %6087 = vmatmul.msk.bf16.gmra.mxu0 %vm707_vm0, %v2885_v20  ;;  %v2115_v42 = vadd.f32 %v2114_v1, %v1925_v37 }
 0x46b   : > { %v2189_v22 = vpack.c.bf16 %v2115_v42, %v2115_v42  ;;  %v2685_v42 = vadd.f32 %v8532_v5, %v2599_v34  ;;  %v2429_v5 = vadd.f32 %v8456_v15, %v8364_v38 }
 0x46d   : > { %v2881_v0 = vunpack.c.l.b16 %v2189_v22  ;;  %v2515_v35 = vadd.f32 %v8517_v43, %v2429_v5 }
 0x46e   : > { %v8553_v24 = vpop.f32.mrf.mxu0 }
 0x46f   : > { %v2601_v38 = vadd.f32 %v8515_v14, %v2515_v35 }
 0x470   : > { %v2116_v9 = vpop.f32.mrf.mxu2 }
 0x471   : > { %v2117_v11 = vadd.f32 %v2116_v9, %v1927_v6  ;;  %v2771_v9 = vadd.f32 %v8548_v58, %v2685_v42 }
 0x473   : > { %v2190_v31 = vpack.c.bf16 %v2117_v11, %v2117_v11 }
 0x475   : > { %v2882_v32 = vunpack.c.l.b16 %v2190_v31 }
 0x476   : > { %v2763_v52 = vpop.f32.mrf.mxu0 }
 0x477   : > { %v2886_v25 = vpack.c.b16 %v2882_v32, %v2881_v0  ;;  %v8555_v8 = vadd.f32 %v2763_v52, %v2688_v54  ;;  %v6650_v54 = vld [vmem:[%s9551_s7 + $0x18] sm:$0xff] }
 0x478   : > { %3129 = vmatpush.bf16.msra.mxu3 %v6650_v54 }
 0x479   : > { %6088 = vmatmul.msk.bf16.gmra.mxu0 %vm707_vm0, %v2886_v25 }
 0x47c   : > { %3130 = vmatpush.bf16.msra.mxu3 %v6649_v61 }
 0x47e   : > { %v8560_v12 = vpop.f32.mrf.mxu0 }
 0x480   : > { %3131 = vmatpush.bf16.msra.mxu3 %v6648_v47 }
 0x48c   : > { %v2834_v55 = vpop.f32.mrf.mxu3 }
 0x48d   : > { %v2854_v2 = vadd.f32 %v2834_v55, %v2768_v30  ;;  %v2769_v30 = vadd.f32 %v2750_v21, %v2683_v23  ;;  %v6647_v21 = vld [vmem:[%s9551_s7] sm:$0xff] }
 0x48e   : > { %3132 = vmatpush.bf16.msra.mxu3 %v6647_v21 }
 0x494   : > { %v2836_v16 = vpop.f32.mrf.mxu3 }
 0x495   : > { %v2855_v36 = vadd.f32 %v2836_v16, %v2769_v30 }
 0x49c   : > { %v2839_v29 = vpop.f32.mrf.mxu3 }
 0x49d   : > { %v2856_v17 = vadd.f32 %v2839_v29, %v8545_v3 }
 0x4a4   : > { %v2841_v40 = vpop.f32.mrf.mxu3 }
 0x4a5   : > { %v2857_v31 = vadd.f32 %v2841_v40, %v2771_v9 }
 0x4ac   : > { %v2844_v11 = vpop.f32.mrf.mxu3 }
 0x4c6   : > { %v2920_v28 = vpop.f32.mrf.mxu0 }
 0x4c7   : > { %v2940_v13 = vadd.f32 %v2920_v28, %v2854_v2  ;;  %v2858_v28 = vadd.f32 %v2844_v11, %v8550_v51 }
 0x4c9   : > { %v8576_v4 = vadd.f32 %v8568_v39, %v2940_v13  ;;  %v2846_v13 = vpop.f32.mrf.mxu3 }
 0x4cb   : > { %v2960_v48 = vmin.f32 %v8576_v4, 20.0  ;;  %vm3040_vm3 = vcmp.gt.f32.partialorder %v8576_v4, 20.0 }
 0x4cd   : > { %v2968_v59 = vmul.f32 1.442695, %v2960_v48  ;;  %v2687_v48 = vadd.f32 %v8539_v62, %v2601_v38  ;;  %v2431_v62 = vadd.f32 %v8475_v60, %v8391_v19 }
 0x4ce   : > { %v2922_v27 = vpop.f32.mrf.mxu0 }
 0x4cf   : > { %6918 = vpow2.f32 %v2968_v59  ;;  %v2941_v56 = vadd.f32 %v2922_v27, %v2855_v36  ;;  %v2773_v47 = vadd.f32 %v8553_v24, %v2687_v48 }
 0x4d1   : > { %v8588_v18 = vadd.f32 %v8568_v39, %v2941_v56  ;;  %v2859_v14 = vadd.f32 %v2846_v13, %v2773_v47 }
 0x4d3   : > { %v2961_v41 = vmin.f32 %v8588_v18, 20.0  ;;  %vm3041_vm4 = vcmp.gt.f32.partialorder %v8588_v18, 20.0 }
 0x4d5   : > { %v6919_v63 = vpop.eup %6918  ;;  %v2970_v37 = vmul.f32 1.442695, %v2961_v41 }
 0x4d6   : > { %v2984_v10 = vadd.f32 2.0, %v6919_v63  ;;  %v2925_v20 = vpop.f32.mrf.mxu0 }
 0x4d7   : > { %6920 = vpow2.f32 %v2970_v37  ;;  %v2942_v50 = vadd.f32 %v2925_v20, %v2856_v17  ;;  %v2849_v20 = vpop.f32.mrf.mxu3 }
 0x4d8   : > { %v2992_v1 = vmul.f32 %v6919_v63, %v2984_v10 }
 0x4d9   : > { %v8599_v6 = vadd.f32 %v8568_v39, %v2942_v50  ;;  %v2517_v50 = vadd.f32 %v8521_v53, %v2431_v62 }
 0x4da   : > { %v3000_v44 = vadd.f32 2.0, %v2992_v1  ;;  %v3048_v21 = vmul.f32 %v2992_v1, %v8576_v4 }
 0x4db   : > { %v2962_v22 = vmin.f32 %v8599_v6, 20.0  ;;  %vm3042_vm6 = vcmp.gt.f32.partialorder %v8599_v6, 20.0 }
 0x4dc   : > { %6922 = vrcp.f32 %v3000_v44 }
 0x4dd   : > { %v6921_v3 = vpop.eup %6920  ;;  %v2972_v0 = vmul.f32 1.442695, %v2962_v22 }
 0x4de   : > { %v2985_v32 = vadd.f32 2.0, %v6921_v3  ;;  %v2927_v26 = vpop.f32.mrf.mxu0 }
 0x4df   : > { %6924 = vpow2.f32 %v2972_v0  ;;  %v2943_v52 = vadd.f32 %v2927_v26, %v2857_v31  ;;  %v2860_v31 = vadd.f32 %v2849_v20, %v8555_v8  ;;  %v2851_v35 = vpop.f32.mrf.mxu3 }
 0x4e0   : > { %v2993_v25 = vmul.f32 %v6921_v3, %v2985_v32 }
 0x4e1   : > { %v8606_v55 = vadd.f32 %v8568_v39, %v2943_v52  ;;  %v2603_v52 = vadd.f32 %v8542_v46, %v2517_v50 }
 0x4e2   : > { %v6923_v16 = vpop.eup %6922  ;;  %v3001_v58 = vadd.f32 2.0, %v2993_v25  ;;  %v3049_v41 = vmul.f32 %v2993_v25, %v8588_v18 }
 0x4e3   : > { %v3016_v7 = vmul.f32 %v6923_v16, %v3000_v44  ;;  %v2963_v2 = vmin.f32 %v8606_v55, 20.0  ;;  %vm3043_vm7 = vcmp.gt.f32.partialorder %v8606_v55, 20.0 }
 0x4e4   : > { %6926 = vrcp.f32 %v3001_v58 }
 0x4e5   : > { %v6925_v54 = vpop.eup %6924  ;;  %v2974_v33 = vmul.f32 1.442695, %v2963_v2  ;;  %v3024_v15 = vsub.f32 2.0, %v3016_v7 }
 0x4e6   : > { %v2986_v29 = vadd.f32 2.0, %v6925_v54  ;;  %v2930_v23 = vpop.f32.mrf.mxu0 }
 0x4e7   : > { %6928 = vpow2.f32 %v2974_v33  ;;  %v2944_v61 = vadd.f32 %v2930_v23, %v2858_v28  ;;  %v3032_v51 = vmul.f32 %v6923_v16, %v3024_v15 }
 0x4e8   : > { %v2994_v30 = vmul.f32 %v6925_v54, %v2986_v29 }
 0x4e9   : > { %v8614_v43 = vadd.f32 %v8568_v39, %v2944_v61  ;;  %v3056_v37 = vmul.f32 %v3048_v21, %v3032_v51 }
 0x4ea   : > { %v6927_v36 = vpop.eup %6926  ;;  %v3002_v59 = vadd.f32 2.0, %v2994_v30  ;;  %v3050_v13 = vmul.f32 %v2994_v30, %v8599_v6 }
 0x4eb   : > { %v3017_v27 = vmul.f32 %v6927_v36, %v3001_v58  ;;  %v2964_v56 = vmin.f32 %v8614_v43, 20.0  ;;  %v3064_v60 = vsel %vm3040_vm3, %v8576_v4, %v3056_v37  ;;  %vm3044_vm8 = vcmp.gt.f32.partialorder %v8614_v43, 20.0 }
 0x4ec   : > { %6930 = vrcp.f32 %v3002_v59 }
 0x4ed   : > { %v6929_v57 = vpop.eup %6928  ;;  %v3025_v40 = vsub.f32 2.0, %v3017_v27  ;;  %v2976_v45 = vmul.f32 1.442695, %v2964_v56 }
 0x4ee   : > { %v2987_v63 = vadd.f32 2.0, %v6929_v57  ;;  %v2932_v17 = vpop.f32.mrf.mxu0 }
 0x4ef   : > { %v3033_v24 = vmul.f32 %v6927_v36, %v3025_v40  ;;  %6932 = vpow2.f32 %v2976_v45  ;;  %v2945_v10 = vadd.f32 %v2932_v17, %v2859_v14 }
 0x4f0   : > { %v2995_v34 = vmul.f32 %v6929_v57, %v2987_v63 }
 0x4f1   : > { %v3057_v42 = vmul.f32 %v3049_v41, %v3033_v24  ;;  %v8624_v1 = vadd.f32 %v8568_v39, %v2945_v10 }
 0x4f2   : > { %v6931_v44 = vpop.eup %6930  ;;  %v3003_v19 = vadd.f32 2.0, %v2995_v34 }
 0x4f3   : > { %v3065_v9 = vsel %vm3041_vm4, %v8588_v18, %v3057_v42  ;;  %v3018_v22 = vmul.f32 %v6931_v44, %v3002_v59  ;;  %v2965_v11 = vmin.f32 %v8624_v1, 20.0  ;;  %v2689_v18 = vadd.f32 %v8558_v49, %v2603_v52 }
 0x4f4   : > { %v3072_v3 = vpack.c.bf16 %v3065_v9, %v3064_v60  ;;  %6934 = vrcp.f32 %v3003_v19  ;;  %v3051_v49 = vmul.f32 %v2995_v34, %v8606_v55  ;;  %vm3045_vm9 = vcmp.gt.f32.partialorder %v8624_v1, 20.0 }
 0x4f5   : > { %v6933_v53 = vpop.eup %6932  ;;  %v2978_v0 = vmul.f32 1.442695, %v2965_v11  ;;  %v3026_v25 = vsub.f32 2.0, %v3018_v22  ;;  %v2775_v8 = vadd.f32 %v8560_v12, %v2689_v18 }
 0x4f6   : > { %v2988_v32 = vadd.f32 2.0, %v6933_v53  ;;  %v2935_v26 = vpop.f32.mrf.mxu0  ;;  %6105 = vmatmul.msk.bf16.vlgmr.msra.gmra.mxu3 %vm3112_vm5, %v3072_v3 }
 0x4f7   : > { %6936 = vpow2.f32 %v2978_v0  ;;  %v2946_v4 = vadd.f32 %v2935_v26, %v2860_v31  ;;  %v3034_v2 = vmul.f32 %v6931_v44, %v3026_v25  ;;  %v2861_v33 = vadd.f32 %v2851_v35, %v2775_v8  ;;  %v6657_v8 = vld [vmem:[%s9553_s9 + $0x30] sm:$0xff] }
 0x4f8   : > { %v2996_v5 = vmul.f32 %v6933_v53, %v2988_v32 }
 0x4f9   : > { %v8636_v16 = vadd.f32 %v8568_v39, %v2946_v4  ;;  %v3058_v61 = vmul.f32 %v3050_v13, %v3034_v2  ;;  %v6656_v2 = vld [vmem:[%s9553_s9 + $0x28] sm:$0xff]  ;;  %v6653_v13 = vld [vmem:[%s9553_s9 + $0x10] sm:$0xff] }
 0x4fa   : > { %v6935_v58 = vpop.eup %6934  ;;  %v3004_v7 = vadd.f32 2.0, %v2996_v5 }
 0x4fb   : > { %v2966_v54 = vmin.f32 %v8636_v16, 20.0  ;;  %v3019_v28 = vmul.f32 %v6935_v58, %v3003_v19  ;;  %v3066_v57 = vsel %vm3042_vm6, %v8599_v6, %v3058_v61  ;;  %v3052_v6 = vmul.f32 %v2996_v5, %v8614_v43  ;;  %v6651_v61 = vld [vmem:[%s9553_s9] sm:$0xff] }
 0x4fc   : > { %6938 = vrcp.f32 %v3004_v7  ;;  %vm3046_vm10 = vcmp.gt.f32.partialorder %v8636_v16, 20.0 }
 0x4fd   : > { %v6937_v46 = vpop.eup %6936  ;;  %v2980_v29 = vmul.f32 1.442695, %v2966_v54  ;;  %v3027_v23 = vsub.f32 2.0, %v3019_v28  ;;  %v8674_v54 = vld [vmem:[%s9552_s8] ss:$0 sm:$0xff]  ;;  %v6654_v28 = vld [vmem:[%s9553_s9 + $0x18] sm:$0xff] }
 0x4fe   : > { %v2989_v38 = vadd.f32 2.0, %v6937_v46  ;;  %v2937_v15 = vpop.f32.mrf.mxu0 }
 0x4ff   : > { %6940 = vpow2.f32 %v2980_v29  ;;  %v2947_v48 = vadd.f32 %v2937_v15, %v2861_v33  ;;  %v3035_v36 = vmul.f32 %v6935_v58, %v3027_v23 }
 0x500   : > { %v2997_v12 = vmul.f32 %v6937_v46, %v2989_v38 }
 0x501   : > { %v2959_v59 = vadd.f32 %v8568_v39, %v2947_v48  ;;  %v3059_v47 = vmul.f32 %v3051_v49, %v3035_v36  ;;  %v6652_v49 = vld [vmem:[%s9553_s9 + $0x8] sm:$0xff] }
 0x502   : > { %v6939_v51 = vpop.eup %6938  ;;  %v3005_v27 = vadd.f32 2.0, %v2997_v12  ;;  %v3053_v50 = vmul.f32 %v2997_v12, %v8624_v1 }
 0x503   : > { %v3020_v30 = vmul.f32 %v6939_v51, %v3004_v7  ;;  %v2967_v56 = vmin.f32 %v2959_v59, 20.0  ;;  %v3067_v14 = vsel %vm3043_vm7, %v8606_v55, %v3059_v47  ;;  %vm3047_vm11 = vcmp.gt.f32.partialorder %v2959_v59, 20.0  ;;  %v6658_v7 = vld [vmem:[%s9553_s9 + $0x38] sm:$0xff] }
 0x504   : > { %6942 = vrcp.f32 %v3005_v27  ;;  %v3073_v21 = vpack.c.bf16 %v3067_v14, %v3066_v57  ;;  %3338 = vmatpush.bf16.msrb.mxu0 %v6658_v7 }
 0x505   : > { %v6941_v40 = vpop.eup %6940  ;;  %v2982_v45 = vmul.f32 1.442695, %v2967_v56  ;;  %v3028_v39 = vsub.f32 2.0, %v3020_v30 }
 0x506   : > { %v2990_v62 = vadd.f32 2.0, %v6941_v40  ;;  %6106 = vmatmul.msk.bf16.gmra.mxu3 %vm3112_vm5, %v3073_v21 }
 0x507   : > { %6944 = vpow2.f32 %v2982_v45  ;;  %v3036_v37 = vmul.f32 %v6939_v51, %v3028_v39 }
 0x508   : > { %v2998_v41 = vmul.f32 %v6941_v40, %v2990_v62  ;;  %3339 = vmatpush.bf16.msrb.mxu0 %v6657_v8 }
 0x509   : > { %v3060_v34 = vmul.f32 %v3052_v6, %v3036_v37 }
 0x50a   : > { %v6943_v63 = vpop.eup %6942  ;;  %v3006_v17 = vadd.f32 2.0, %v2998_v41  ;;  %v3054_v52 = vmul.f32 %v2998_v41, %v8636_v16 }
 0x50b   : > { %v3021_v24 = vmul.f32 %v6943_v63, %v3005_v27  ;;  %v3068_v11 = vsel %vm3044_vm8, %v8614_v43, %v3060_v34 }
 0x50c   : > { %6946 = vrcp.f32 %v3006_v17  ;;  %3340 = vmatpush.bf16.msrb.mxu0 %v6656_v2 }
 0x50d   : > { %v6945_v10 = vpop.eup %6944  ;;  %v3029_v20 = vsub.f32 2.0, %v3021_v24 }
 0x50e   : > { %v2991_v55 = vadd.f32 2.0, %v6945_v10 }
 0x50f   : > { %v3037_v42 = vmul.f32 %v6943_v63, %v3029_v20 }
 0x510   : > { %v2999_v44 = vmul.f32 %v6945_v10, %v2991_v55 }
 0x511   : > { %v3061_v19 = vmul.f32 %v3053_v50, %v3037_v42 }
 0x512   : > { %v6947_v60 = vpop.eup %6946  ;;  %v3007_v9 = vadd.f32 2.0, %v2999_v44  ;;  %v3055_v5 = vmul.f32 %v2999_v44, %v2959_v59 }
 0x513   : > { %v3022_v22 = vmul.f32 %v6947_v60, %v3006_v17  ;;  %v3069_v3 = vsel %vm3045_vm9, %v8624_v1, %v3061_v19 }
 0x514   : > { %6948 = vrcp.f32 %v3007_v9  ;;  %v3074_v53 = vpack.c.bf16 %v3069_v3, %v3068_v11 }
 0x515   : > { %v3030_v31 = vsub.f32 2.0, %v3022_v22 }
 0x516   : > { %6107 = vmatmul.msk.bf16.gmra.mxu3 %vm3112_vm5, %v3074_v53 }
 0x517   : > { %v3038_v32 = vmul.f32 %v6947_v60, %v3030_v31 }
 0x519   : > { %v3062_v4 = vmul.f32 %v3054_v52, %v3038_v32 }
 0x51a   : > { %v6949_v0 = vpop.eup %6948 }
 0x51b   : > { %v3023_v26 = vmul.f32 %v6949_v0, %v3007_v9  ;;  %v3070_v43 = vsel %vm3046_vm10, %v8636_v16, %v3062_v4  ;;  %v6655_v16 = vld [vmem:[%s9553_s9 + $0x20] sm:$0xff] }
 0x51c   : > { %3341 = vmatpush.bf16.msrb.mxu0 %v6655_v16 }
 0x51d   : > { %v3031_v25 = vsub.f32 2.0, %v3023_v26 }
 0x51f   : > { %v3039_v18 = vmul.f32 %v6949_v0, %v3031_v25 }
 0x520   : > { %3342 = vmatpush.bf16.msrb.mxu0 %v6654_v28 }
 0x521   : > { %v3063_v58 = vmul.f32 %v3055_v5, %v3039_v18 }
 0x523   : > { %v3071_v1 = vsel %vm3047_vm11, %v2959_v59, %v3063_v58 }
 0x524   : > { %v3075_v35 = vpack.c.bf16 %v3071_v1, %v3070_v43  ;;  %3343 = vmatpush.bf16.msrb.mxu0 %v6653_v13 }
 0x526   : > { %6108 = vmatmul.msk.bf16.gmra.mxu3 %vm3112_vm5, %v3075_v35 }
 0x528   : > { %3344 = vmatpush.bf16.msrb.mxu0 %v6652_v49 }
 0x52c   : > { %3345 = vmatpush.bf16.msrb.mxu0 %v6651_v61 }
 0x579   : > { %v3134_v46 = vpop.f32.mrf.mxu3 }
 0x57a   : > { %v8680_v33 = vadd.f32 %v8674_v54, %v3134_v46 }
 0x57c   : > { %v3154_v29 = vmin.f32 %v8680_v33, 20.0  ;;  %vm3234_vm12 = vcmp.gt.f32.partialorder %v8680_v33, 20.0 }
 0x57e   : > { %v3162_v23 = vmul.f32 1.442695, %v3154_v29 }
 0x580   : > { %6950 = vpow2.f32 %v3162_v23 }
 0x581   : > { %v3136_v38 = vpop.f32.mrf.mxu3 }
 0x582   : > { %v3137_v15 = vadd.f32 %v8674_v54, %v3136_v38 }
 0x584   : > { %v3155_v48 = vmin.f32 %v3137_v15, 20.0  ;;  %vm3235_vm13 = vcmp.gt.f32.partialorder %v3137_v15, 20.0 }
 0x586   : > { %v6951_v36 = vpop.eup %6950  ;;  %v3164_v12 = vmul.f32 1.442695, %v3155_v48 }
 0x587   : > { %v3178_v59 = vadd.f32 2.0, %v6951_v36 }
 0x588   : > { %6952 = vpow2.f32 %v3164_v12 }
 0x589   : > { %v3186_v47 = vmul.f32 %v6951_v36, %v3178_v59  ;;  %v3139_v51 = vpop.f32.mrf.mxu3 }
 0x58a   : > { %v8694_v27 = vadd.f32 %v8674_v54, %v3139_v51 }
 0x58b   : > { %v3194_v30 = vadd.f32 2.0, %v3186_v47  ;;  %v3242_v22 = vmul.f32 %v3186_v47, %v8680_v33 }
 0x58c   : > { %v3156_v56 = vmin.f32 %v8694_v27, 20.0  ;;  %vm3236_vm14 = vcmp.gt.f32.partialorder %v8694_v27, 20.0 }
 0x58d   : > { %6954 = vrcp.f32 %v3194_v30 }
 0x58e   : > { %v6953_v57 = vpop.eup %6952  ;;  %v3166_v14 = vmul.f32 1.442695, %v3156_v56 }
 0x58f   : > { %v3179_v21 = vadd.f32 2.0, %v6953_v57 }
 0x590   : > { %6956 = vpow2.f32 %v3166_v14 }
 0x591   : > { %v3187_v40 = vmul.f32 %v6953_v57, %v3179_v21  ;;  %v3141_v45 = vpop.f32.mrf.mxu3 }
 0x592   : > { %v8698_v62 = vadd.f32 %v8674_v54, %v3141_v45 }
 0x593   : > { %v6955_v39 = vpop.eup %6954  ;;  %v3195_v41 = vadd.f32 2.0, %v3187_v40  ;;  %v3243_v32 = vmul.f32 %v3187_v40, %v3137_v15 }
 0x594   : > { %v3210_v63 = vmul.f32 %v6955_v39, %v3194_v30  ;;  %v3157_v17 = vmin.f32 %v8698_v62, 20.0  ;;  %vm3237_vm15 = vcmp.gt.f32.partialorder %v8698_v62, 20.0 }
 0x595   : > { %6958 = vrcp.f32 %v3195_v41 }
 0x596   : > { %v6957_v37 = vpop.eup %6956  ;;  %v3168_v24 = vmul.f32 1.442695, %v3157_v17  ;;  %v3218_v6 = vsub.f32 2.0, %v3210_v63 }
 0x597   : > { %v3180_v10 = vadd.f32 2.0, %v6957_v37 }
 0x598   : > { %6960 = vpow2.f32 %v3168_v24  ;;  %v3226_v44 = vmul.f32 %v6955_v39, %v3218_v6 }
 0x599   : > { %v3188_v20 = vmul.f32 %v6957_v37, %v3180_v10  ;;  %v3144_v55 = vpop.f32.mrf.mxu3 }
 0x59a   : > { %v8702_v34 = vadd.f32 %v8674_v54, %v3144_v55  ;;  %v3250_v31 = vmul.f32 %v3242_v22, %v3226_v44 }
 0x59b   : > { %v6959_v50 = vpop.eup %6958  ;;  %v3196_v42 = vadd.f32 2.0, %v3188_v20  ;;  %v3244_v48 = vmul.f32 %v3188_v20, %v8694_v27 }
 0x59c   : > { %v3211_v19 = vmul.f32 %v6959_v50, %v3195_v41  ;;  %v3158_v60 = vmin.f32 %v8702_v34, 20.0  ;;  %v8711_v58 = vsel %vm3234_vm12, %v8680_v33, %v3250_v31  ;;  %vm3238_vm1 = vcmp.gt.f32.partialorder %v8702_v34, 20.0 }
 0x59d   : > { %6962 = vrcp.f32 %v3196_v42 }
 0x59e   : > { %v6961_v9 = vpop.eup %6960  ;;  %v3219_v11 = vsub.f32 2.0, %v3211_v19  ;;  %v3170_v3 = vmul.f32 1.442695, %v3158_v60 }
 0x59f   : > { %v3181_v53 = vadd.f32 2.0, %v6961_v9 }
 0x5a0   : > { %v3227_v0 = vmul.f32 %v6959_v50, %v3219_v11  ;;  %6964 = vpow2.f32 %v3170_v3 }
 0x5a1   : > { %v3189_v26 = vmul.f32 %v6961_v9, %v3181_v53  ;;  %v3146_v52 = vpop.f32.mrf.mxu3 }
 0x5a2   : > { %v3251_v25 = vmul.f32 %v3243_v32, %v3227_v0  ;;  %v8707_v4 = vadd.f32 %v8674_v54, %v3146_v52 }
 0x5a3   : > { %v6963_v5 = vpop.eup %6962  ;;  %v3197_v18 = vadd.f32 2.0, %v3189_v26  ;;  %v3245_v47 = vmul.f32 %v3189_v26, %v8698_v62 }
 0x5a4   : > { %v8713_v43 = vsel %vm3235_vm13, %v3137_v15, %v3251_v25  ;;  %v3159_v1 = vmin.f32 %v8707_v4, 20.0  ;;  %v3212_v35 = vmul.f32 %v6963_v5, %v3196_v42  ;;  %vm3239_vm2 = vcmp.gt.f32.partialorder %v8707_v4, 20.0 }
 0x5a5   : > { %v8718_v7 = vpack.c.bf16 %v8713_v43, %v8711_v58  ;;  %6966 = vrcp.f32 %v3197_v18 }
 0x5a6   : > { %v6965_v8 = vpop.eup %6964  ;;  %v3172_v2 = vmul.f32 1.442695, %v3159_v1  ;;  %v3220_v28 = vsub.f32 2.0, %v3212_v35 }
 0x5a7   : > { %v3182_v16 = vadd.f32 2.0, %v6965_v8  ;;  %3346 = vmatmul.bf16.vlgmr.msrb.gmra.mxu0 %v8718_v7 }
 0x5a8   : > { %6968 = vpow2.f32 %v3172_v2  ;;  %v3228_v15 = vmul.f32 %v6963_v5, %v3220_v28 }
 0x5a9   : > { %v3190_v46 = vmul.f32 %v6965_v8, %v3182_v16  ;;  %v3149_v33 = vpop.f32.mrf.mxu3 }
 0x5aa   : > { %v8722_v13 = vadd.f32 %v8674_v54, %v3149_v33  ;;  %v3252_v30 = vmul.f32 %v3244_v48, %v3228_v15  ;;  %v6786_v48 = vld [vmem:[%s9554_s10] ss:$0 sm:$0xff] }
 0x5ab   : > { %v6967_v29 = vpop.eup %6966  ;;  %v3198_v23 = vadd.f32 2.0, %v3190_v46  ;;  %v3246_v44 = vmul.f32 %v3190_v46, %v8702_v34 }
 0x5ac   : > { %v3160_v49 = vmin.f32 %v8722_v13, 20.0  ;;  %v3213_v38 = vmul.f32 %v6967_v29, %v3197_v18  ;;  %v8731_v41 = vsel %vm3236_vm14, %v8694_v27, %v3252_v30  ;;  %vm3240_vm3 = vcmp.gt.f32.partialorder %v8722_v13, 20.0 }
 0x5ad   : > { %6970 = vrcp.f32 %v3198_v23 }
 0x5ae   : > { %v6969_v61 = vpop.eup %6968  ;;  %v3174_v36 = vmul.f32 1.442695, %v3160_v49  ;;  %v3221_v12 = vsub.f32 2.0, %v3213_v38 }
 0x5af   : > { %v3183_v59 = vadd.f32 2.0, %v6969_v61 }
 0x5b0   : > { %6972 = vpow2.f32 %v3174_v36  ;;  %v3229_v51 = vmul.f32 %v6967_v29, %v3221_v12 }
 0x5b1   : > { %v3191_v56 = vmul.f32 %v6969_v61, %v3183_v59  ;;  %v3151_v57 = vpop.f32.mrf.mxu3 }
 0x5b2   : > { %v3152_v14 = vadd.f32 %v8674_v54, %v3151_v57  ;;  %v3253_v21 = vmul.f32 %v3245_v47, %v3229_v51 }
 0x5b3   : > { %v6971_v40 = vpop.eup %6970  ;;  %v3199_v45 = vadd.f32 2.0, %v3191_v56  ;;  %v3247_v9 = vmul.f32 %v3191_v56, %v8707_v4 }
 0x5b4   : > { %v3161_v39 = vmin.f32 %v3152_v14, 20.0  ;;  %v8734_v63 = vsel %vm3237_vm15, %v8698_v62, %v3253_v21  ;;  %v3214_v17 = vmul.f32 %v6971_v40, %v3198_v23  ;;  %vm3241_vm4 = vcmp.gt.f32.partialorder %v3152_v14, 20.0 }
 0x5b5   : > { %6974 = vrcp.f32 %v3199_v45  ;;  %v8738_v37 = vpack.c.bf16 %v8734_v63, %v8731_v41 }
 0x5b6   : > { %v6973_v54 = vpop.eup %6972  ;;  %v3176_v24 = vmul.f32 1.442695, %v3161_v39  ;;  %v3222_v6 = vsub.f32 2.0, %v3214_v17 }
 0x5b7   : > { %v3184_v10 = vadd.f32 2.0, %v6973_v54  ;;  %3351 = vmatmul.bf16.gmra.mxu0 %v8738_v37 }
 0x5b8   : > { %6976 = vpow2.f32 %v3176_v24  ;;  %v3230_v42 = vmul.f32 %v6971_v40, %v3222_v6 }
 0x5b9   : > { %v3192_v20 = vmul.f32 %v6973_v54, %v3184_v10 }
 0x5ba   : > { %v3254_v11 = vmul.f32 %v3246_v44, %v3230_v42 }
 0x5bb   : > { %v6975_v55 = vpop.eup %6974  ;;  %v3200_v27 = vadd.f32 2.0, %v3192_v20  ;;  %v3248_v8 = vmul.f32 %v3192_v20, %v8722_v13 }
 0x5bc   : > { %v3215_v50 = vmul.f32 %v6975_v55, %v3199_v45  ;;  %v8746_v32 = vsel %vm3238_vm1, %v8702_v34, %v3254_v11 }
 0x5bd   : > { %6978 = vrcp.f32 %v3200_v27 }
 0x5be   : > { %v6977_v62 = vpop.eup %6976  ;;  %v3223_v19 = vsub.f32 2.0, %v3215_v50 }
 0x5bf   : > { %v3185_v60 = vadd.f32 2.0, %v6977_v62 }
 0x5c0   : > { %v3231_v22 = vmul.f32 %v6975_v55, %v3223_v19 }
 0x5c1   : > { %v3193_v3 = vmul.f32 %v6977_v62, %v3185_v60 }
 0x5c2   : > { %v3255_v53 = vmul.f32 %v3247_v9, %v3231_v22 }
 0x5c3   : > { %v6979_v31 = vpop.eup %6978  ;;  %v3201_v0 = vadd.f32 2.0, %v3193_v3  ;;  %v3249_v34 = vmul.f32 %v3193_v3, %v3152_v14 }
 0x5c4   : > { %v8749_v26 = vsel %vm3239_vm2, %v8707_v4, %v3255_v53  ;;  %v3216_v52 = vmul.f32 %v6979_v31, %v3200_v27 }
 0x5c5   : > { %6980 = vrcp.f32 %v3201_v0  ;;  %v8753_v25 = vpack.c.bf16 %v8749_v26, %v8746_v32 }
 0x5c6   : > { %v3224_v5 = vsub.f32 2.0, %v3216_v52 }
 0x5c7   : > { %3356 = vmatmul.bf16.gmra.mxu0 %v8753_v25 }
 0x5c8   : > { %v3232_v35 = vmul.f32 %v6979_v31, %v3224_v5 }
 0x5ca   : > { %v3256_v28 = vmul.f32 %v3248_v8, %v3232_v35 }
 0x5cb   : > { %v6981_v18 = vpop.eup %6980 }
 0x5cc   : > { %v3217_v1 = vmul.f32 %v6981_v18, %v3201_v0  ;;  %v8759_v46 = vsel %vm3240_vm3, %v8722_v13, %v3256_v28 }
 0x5ce   : > { %v3225_v2 = vsub.f32 2.0, %v3217_v1 }
 0x5d0   : > { %v3233_v16 = vmul.f32 %v6981_v18, %v3225_v2 }
 0x5d2   : > { %v3257_v4 = vmul.f32 %v3249_v34, %v3233_v16 }
 0x5d4   : > { %v8761_v33 = vsel %vm3241_vm4, %v3152_v14, %v3257_v4 }
 0x5d5   : > { %v8765_v29 = vpack.c.bf16 %v8761_v33, %v8759_v46 }
 0x5d7   : > { %3361 = vmatmul.bf16.gmra.mxu0 %v8765_v29 }
 0x624   : > { %v3347_v23 = vpop.f32.mrf.mxu0 }
 0x625   : > { %v8784_v14 = vadd.f32 %v6786_v48, %v3347_v23 }
 0x627   : > { %v3367_v54 = vmin.f32 %v8784_v14, 20.0  ;;  %vm3447_vm13 = vcmp.gt.f32.partialorder %v8784_v14, 20.0 }
 0x629   : > { %v3375_v27 = vmul.f32 1.442695, %v3367_v54 }
 0x62c   : > { %v3349_v49 = vpop.f32.mrf.mxu0 }
 0x62d   : > { %v8780_v30 = vadd.f32 %v6786_v48, %v3349_v49 }
 0x62f   : > { %v3368_v39 = vmin.f32 %v8780_v30, 20.0  ;;  %vm3448_vm12 = vcmp.gt.f32.partialorder %v8780_v30, 20.0 }
 0x631   : > { %v3377_v20 = vmul.f32 1.442695, %v3368_v39 }
 0x634   : > { %v3352_v38 = vpop.f32.mrf.mxu0 }
 0x635   : > { %v8775_v12 = vadd.f32 %v6786_v48, %v3352_v38 }
 0x637   : > { %v3369_v21 = vmin.f32 %v8775_v12, 20.0  ;;  %vm3449_vm11 = vcmp.gt.f32.partialorder %v8775_v12, 20.0 }
 0x639   : > { %v3379_v24 = vmul.f32 1.442695, %v3369_v21 }
 0x63c   : > { %v3354_v15 = vpop.f32.mrf.mxu0 }
 0x63d   : > { %v8773_v13 = vadd.f32 %v6786_v48, %v3354_v15 }
 0x63f   : > { %v3370_v56 = vmin.f32 %v8773_v13, 20.0  ;;  %vm3450_vm10 = vcmp.gt.f32.partialorder %v8773_v13, 20.0 }
 0x641   : > { %v3381_v17 = vmul.f32 1.442695, %v3370_v56 }
 0x644   : > { %v3357_v61 = vpop.f32.mrf.mxu0 }
 0x645   : > { %v8771_v36 = vadd.f32 %v6786_v48, %v3357_v61 }
 0x647   : > { %v3371_v47 = vmin.f32 %v8771_v36, 20.0  ;;  %vm3451_vm9 = vcmp.gt.f32.partialorder %v8771_v36, 20.0 }
 0x649   : > { %v3383_v40 = vmul.f32 1.442695, %v3371_v47 }
 0x64c   : > { %v3359_v59 = vpop.f32.mrf.mxu0 }
 0x64d   : > { %v8778_v51 = vadd.f32 %v6786_v48, %v3359_v59 }
 0x64f   : > { %v3372_v57 = vmin.f32 %v8778_v51, 20.0  ;;  %vm3452_vm8 = vcmp.gt.f32.partialorder %v8778_v51, 20.0 }
 0x651   : > { %v3385_v45 = vmul.f32 1.442695, %v3372_v57 }
 0x653   : > { %6982 = vpow2.f32 %v3385_v45 }
 0x654   : > { %v3362_v10 = vpop.f32.mrf.mxu0  ;;  %6984 = vpow2.f32 %v3383_v40 }
 0x655   : > { %v8789_v6 = vadd.f32 %v6786_v48, %v3362_v10  ;;  %6986 = vpow2.f32 %v3381_v17 }
 0x656   : > { %6988 = vpow2.f32 %v3379_v24 }
 0x657   : > { %v3373_v55 = vmin.f32 %v8789_v6, 20.0  ;;  %6990 = vpow2.f32 %v3377_v20  ;;  %vm3453_vm6 = vcmp.gt.f32.partialorder %v8789_v6, 20.0 }
 0x659   : > { %v6983_v50 = vpop.eup %6982  ;;  %v3387_v42 = vmul.f32 1.442695, %v3373_v55 }
 0x65a   : > { %v6985_v62 = vpop.eup %6984  ;;  %v3396_v44 = vadd.f32 2.0, %v6983_v50 }
 0x65b   : > { %6992 = vpow2.f32 %v3387_v42  ;;  %v6987_v60 = vpop.eup %6986  ;;  %v3395_v11 = vadd.f32 2.0, %v6985_v62 }
 0x65c   : > { %6994 = vpow2.f32 %v3375_v27  ;;  %v3364_v19 = vpop.f32.mrf.mxu0  ;;  %v6989_v22 = vpop.eup %6988  ;;  %v3404_v53 = vmul.f32 %v6983_v50, %v3396_v44  ;;  %v3394_v0 = vadd.f32 2.0, %v6987_v60 }
 0x65d   : > { %v8792_v9 = vadd.f32 %v6786_v48, %v3364_v19  ;;  %v6991_v31 = vpop.eup %6990  ;;  %v3393_v5 = vadd.f32 2.0, %v6989_v22  ;;  %v3403_v35 = vmul.f32 %v6985_v62, %v3395_v11 }
 0x65e   : > { %v3412_v2 = vadd.f32 2.0, %v3404_v53  ;;  %v3392_v34 = vadd.f32 2.0, %v6991_v31  ;;  %v3402_v28 = vmul.f32 %v6987_v60, %v3394_v0 }
 0x65f   : > { %v3374_v3 = vmin.f32 %v8792_v9, 20.0  ;;  %v8795_v23 = vmul.f32 %v6989_v22, %v3393_v5  ;;  %v3411_v49 = vadd.f32 2.0, %v3403_v35  ;;  %vm3454_vm7 = vcmp.gt.f32.partialorder %v8792_v9, 20.0 }
 0x660   : > { %v8797_v15 = vmul.f32 %v6991_v31, %v3392_v34  ;;  %v3410_v61 = vadd.f32 2.0, %v3402_v28 }
 0x661   : > { %v6993_v52 = vpop.eup %6992  ;;  %v3389_v18 = vmul.f32 1.442695, %v3374_v3  ;;  %v3409_v47 = vadd.f32 2.0, %v8795_v23 }
 0x662   : > { %v6995_v1 = vpop.eup %6994  ;;  %v3397_v8 = vadd.f32 2.0, %v6993_v52  ;;  %v3408_v57 = vadd.f32 2.0, %v8797_v15 }
 0x663   : > { %6996 = vpow2.f32 %v3389_v18  ;;  %v3391_v4 = vadd.f32 2.0, %v6995_v1 }
 0x664   : > { %v3405_v16 = vmul.f32 %v6993_v52, %v3397_v8  ;;  %6998 = vrcp.f32 %v3412_v2  ;;  %v3460_v8 = vmul.f32 %v3404_v53, %v8778_v51 }
 0x665   : > { %v8799_v59 = vmul.f32 %v6995_v1, %v3391_v4 }
 0x666   : > { %v3413_v38 = vadd.f32 2.0, %v3405_v16  ;;  %v3461_v52 = vmul.f32 %v3405_v16, %v8789_v6  ;;  %v3458_v16 = vmul.f32 %v3402_v28, %v8773_v13 }
 0x667   : > { %v3407_v45 = vadd.f32 2.0, %v8799_v59 }
 0x668   : > { %7000 = vrcp.f32 %v3413_v38 }
 0x669   : > { %v6997_v48 = vpop.eup %6996  ;;  %7002 = vrcp.f32 %v3411_v49 }
 0x66a   : > { %v3398_v56 = vadd.f32 2.0, %v6997_v48  ;;  %7004 = vrcp.f32 %v3410_v61  ;;  %v6999_v40 = vpop.eup %6998 }
 0x66b   : > { %7006 = vrcp.f32 %v3409_v47  ;;  %v3428_v10 = vmul.f32 %v6999_v40, %v3412_v2 }
 0x66c   : > { %v3406_v21 = vmul.f32 %v6997_v48, %v3398_v56  ;;  %7008 = vrcp.f32 %v3408_v57 }
 0x66d   : > { %v3436_v62 = vsub.f32 2.0, %v3428_v10 }
 0x66e   : > { %v7001_v39 = vpop.eup %7000  ;;  %v3414_v17 = vadd.f32 2.0, %v3406_v21 }
 0x66f   : > { %v3429_v54 = vmul.f32 %v7001_v39, %v3413_v38  ;;  %v7003_v24 = vpop.eup %7002  ;;  %v3444_v18 = vmul.f32 %v6999_v40, %v3436_v62 }
 0x670   : > { %7010 = vrcp.f32 %v3414_v17  ;;  %v7005_v20 = vpop.eup %7004  ;;  %v3427_v50 = vmul.f32 %v7003_v24, %v3411_v49  ;;  %v3462_v49 = vmul.f32 %v3406_v21, %v8792_v9 }
 0x671   : > { %7012 = vrcp.f32 %v3407_v45  ;;  %v7007_v55 = vpop.eup %7006  ;;  %v3437_v27 = vsub.f32 2.0, %v3429_v54  ;;  %v3426_v44 = vmul.f32 %v7005_v20, %v3410_v61 }
 0x672   : > { %v7009_v42 = vpop.eup %7008  ;;  %v3425_v60 = vmul.f32 %v7007_v55, %v3409_v47  ;;  %v3435_v31 = vsub.f32 2.0, %v3427_v50  ;;  %v3459_v47 = vmul.f32 %v3403_v35, %v8771_v36  ;;  %v3457_v35 = vmul.f32 %v8795_v23, %v8775_v12 }
 0x673   : > { %v3445_v3 = vmul.f32 %v7001_v39, %v3437_v27  ;;  %v3424_v0 = vmul.f32 %v7009_v42, %v3408_v57  ;;  %v3434_v1 = vsub.f32 2.0, %v3426_v44  ;;  %v3468_v39 = vmul.f32 %v3460_v8, %v3444_v18  ;;  %v6668_v44 = vld [vmem:[%s9611_s20 + $0x48] sm:$0xff]  ;;  %v6665_v18 = vld [vmem:[%s9611_s20 + $0x30] sm:$0xff]  ;;  %v6666_v8 = vld [vmem:[%s9611_s20 + $0x38] sm:$0xff] }
 0x674   : > { %v3433_v2 = vsub.f32 2.0, %v3425_v60  ;;  %v3443_v61 = vmul.f32 %v7003_v24, %v3435_v31  ;;  %v3455_v23 = vmul.f32 %v8799_v59, %v8784_v14  ;;  %v6661_v60 = vld [vmem:[%s9611_s20 + $0x10] sm:$0xff]  ;;  %v6663_v31 = vld [vmem:[%s9611_s20 + $0x20] sm:$0xff] }
 0x675   : > { %v3469_v38 = vmul.f32 %v3461_v52, %v3445_v3  ;;  %v3432_v48 = vsub.f32 2.0, %v3424_v0  ;;  %v3442_v57 = vmul.f32 %v7005_v20, %v3434_v1  ;;  %v3476_v24 = vsel %vm3452_vm8, %v8778_v51, %v3468_v39  ;;  %v6672_v3 = vld [vmem:[%s9611_s20 + $0x68] sm:$0xff]  ;;  %v6673_v0 = vld [vmem:[%s9611_s20 + $0x70] sm:$0xff]  ;;  %v6675_v1 = vld [vmem:[%s9611_s20 + $0x80] sm:$0xff] }
 0x676   : > { %v7011_v19 = vpop.eup %7010  ;;  %v3467_v21 = vmul.f32 %v3459_v47, %v3443_v61  ;;  %v6664_v52 = vld [vmem:[%s9611_s20 + $0x28] sm:$0xff] }
 0x677   : > { %v7013_v22 = vpop.eup %7012  ;;  %v3430_v11 = vmul.f32 %v7011_v19, %v3414_v17  ;;  %v3477_v40 = vsel %vm3453_vm6, %v8789_v6, %v3469_v38  ;;  %v3441_v17 = vmul.f32 %v7007_v55, %v3433_v2  ;;  %v3466_v10 = vmul.f32 %v3458_v16, %v3442_v57  ;;  %v6676_v2 = vld [vmem:[%s9611_s20 + $0x88] sm:$0xff] }
 0x678   : > { %v3423_v34 = vmul.f32 %v7013_v22, %v3407_v45  ;;  %v3440_v20 = vmul.f32 %v7009_v42, %v3432_v48  ;;  %v3475_v6 = vsel %vm3451_vm9, %v8771_v36, %v3467_v21  ;;  %v3456_v55 = vmul.f32 %v8797_v15, %v8780_v30 }
 0x679   : > { %v3438_v5 = vsub.f32 2.0, %v3430_v11  ;;  %v3465_v28 = vmul.f32 %v3457_v35, %v3441_v17  ;;  %v3481_v27 = vpack.c.bf16 %v3476_v24, %v3475_v6  ;;  %v3474_v51 = vsel %vm3450_vm10, %v8773_v13, %v3466_v10  ;;  %v6662_v11 = vld [vmem:[%s9611_s20 + $0x18] sm:$0xff]  ;;  %v6701_v10 = vld [vmem:[%s9555_s11 + $0x30] sm:$0xff] }
 0x67a   : > { %v3431_v53 = vsub.f32 2.0, %v3423_v34  ;;  %v3464_v50 = vmul.f32 %v3456_v55, %v3440_v20  ;;  %v6667_v34 = vld [vmem:[%s9611_s20 + $0x40] sm:$0xff]  ;;  %v6678_v24 = vld [vmem:[%s9611_s20 + $0x98] sm:$0xff] }
 0x67b   : > { %v3446_v4 = vmul.f32 %v7011_v19, %v3438_v5  ;;  %v3473_v36 = vsel %vm3449_vm11, %v8775_v12, %v3465_v28  ;;  %v6659_v12 = vld [vmem:[%s9611_s20] sm:$0xff]  ;;  %v6670_v19 = vld [vmem:[%s9611_s20 + $0x58] sm:$0xff] }
 0x67c   : > { %v3480_v62 = vpack.c.bf16 %v3474_v51, %v3473_v36  ;;  %v3472_v15 = vsel %vm3448_vm12, %v8780_v30, %v3464_v50  ;;  %v6669_v30 = vld [vmem:[%s9611_s20 + $0x50] sm:$0xff]  ;;  %v6674_v5 = vld [vmem:[%s9611_s20 + $0x78] sm:$0xff] }
 0x67d   : > { %v3470_v56 = vmul.f32 %v3462_v49, %v3446_v4 }
 0x67f   : > { %v3478_v45 = vsel %vm3454_vm7, %v8792_v9, %v3470_v56  ;;  %v3439_v9 = vmul.f32 %v7013_v22, %v3431_v53  ;;  %v6671_v22 = vld [vmem:[%s9611_s20 + $0x60] sm:$0xff]  ;;  %v6677_v56 = vld [vmem:[%s9611_s20 + $0x90] sm:$0xff] }
 0x680   : > { %v3482_v54 = vpack.c.bf16 %v3478_v45, %v3477_v40  ;;  %v6702_v45 = vld [vmem:[%s9555_s11 + $0x38] sm:$0xff] }
 0x681   : > { %v3463_v42 = vmul.f32 %v3455_v23, %v3439_v9 }
 0x682   : > { %3847 = vmatpush.bf16.msrb.mxu2 %v3482_v54  ;;  %6738 = vmatpush.bf16.msrb.mxu3 %v3482_v54 }
 0x683   : > { %v3471_v59 = vsel %vm3447_vm13, %v8784_v14, %v3463_v42  ;;  %v6660_v14 = vld [vmem:[%s9611_s20 + $0x8] sm:$0xff]  ;;  %v6679_v42 = vld [vmem:[%s9611_s20 + $0xa0] sm:$0xff] }
 0x684   : > { %v3479_v13 = vpack.c.bf16 %v3472_v15, %v3471_v59 }
 0x686   : > { %3848 = vmatpush.bf16.msrb.mxu2 %v3481_v27  ;;  %6739 = vmatpush.bf16.msrb.mxu3 %v3481_v27  ;;  %v6698_v27 = vld [vmem:[%s9555_s11 + $0x18] sm:$0xff] }
 0x687   : > { %4163 = vmatpush.bf16.msra.mxu0 %v6698_v27 }
 0x68a   : > { %3849 = vmatpush.bf16.msrb.mxu2 %v3480_v62  ;;  %6740 = vmatpush.bf16.msrb.mxu3 %v3480_v62  ;;  %v6697_v62 = vld [vmem:[%s9555_s11 + $0x10] sm:$0xff] }
 0x68b   : > { %4164 = vmatpush.bf16.msra.mxu0 %v6697_v62 }
 0x68e   : > { %3850 = vmatpush.bf16.msrb.mxu2 %v3479_v13  ;;  %6741 = vmatpush.bf16.msrb.mxu3 %v3479_v13 }
 0x691   : > { %6294 = vmatmul.msk.bf16.vlgmr.msrb.gmra.mxu3 %vm3112_vm5, %v6668_v44  ;;  %6285 = vmatmul.msk.bf16.vlgmr.msrb.gmra.mxu2 %vm3112_vm5, %v6659_v12 }
 0x692   : > { %4400 = vmatpush.bf16.msra.mxu2 %v6702_v45 }
 0x696   : > { %4401 = vmatpush.bf16.msra.mxu2 %v6701_v10 }
 0x6a1   : > { %6295 = vmatmul.msk.bf16.gmra.mxu3 %vm3112_vm5, %v6669_v30  ;;  %6286 = vmatmul.msk.bf16.gmra.mxu2 %vm3112_vm5, %v6660_v14  ;;  %v6700_v30 = vld [vmem:[%s9555_s11 + $0x28] sm:$0xff] }
 0x6a2   : > { %4314 = vmatpush.bf16.msrb.mxu1 %v6700_v30 }
 0x6b1   : > { %6296 = vmatmul.msk.bf16.gmra.mxu3 %vm3112_vm5, %v6670_v19  ;;  %6287 = vmatmul.msk.bf16.gmra.mxu2 %vm3112_vm5, %v6661_v60 }
 0x6c1   : > { %6297 = vmatmul.msk.bf16.gmra.mxu3 %vm3112_vm5, %v6671_v22  ;;  %6288 = vmatmul.msk.bf16.gmra.mxu2 %vm3112_vm5, %v6662_v11  ;;  %v6680_v11 = vld [vmem:[%s9611_s20 + $0xa8] sm:$0xff] }
 0x6d1   : > { %6298 = vmatmul.msk.bf16.gmra.mxu3 %vm3112_vm5, %v6672_v3  ;;  %6289 = vmatmul.msk.bf16.gmra.mxu2 %vm3112_vm5, %v6663_v31 }
 0x6e1   : > { %6299 = vmatmul.msk.bf16.gmra.mxu3 %vm3112_vm5, %v6673_v0  ;;  %6290 = vmatmul.msk.bf16.gmra.mxu2 %vm3112_vm5, %v6664_v52 }
 0x6f1   : > { %6300 = vmatmul.msk.bf16.gmra.mxu3 %vm3112_vm5, %v6674_v5  ;;  %6291 = vmatmul.msk.bf16.gmra.mxu2 %vm3112_vm5, %v6665_v18 }
 0x701   : > { %6301 = vmatmul.msk.bf16.gmra.mxu3 %vm3112_vm5, %v6675_v1  ;;  %6292 = vmatmul.msk.bf16.gmra.mxu2 %vm3112_vm5, %v6666_v8 }
 0x711   : > { %6302 = vmatmul.msk.bf16.gmra.mxu3 %vm3112_vm5, %v6676_v2  ;;  %6293 = vmatmul.msk.bf16.gmra.mxu2 %vm3112_vm5, %v6667_v34 }
 0x714   : > { %v3897_v4 = vpop.f32.mrf.mxu3  ;;  %v8903_v49 = vpop.f32.mrf.mxu2 }
 0x715   : > { %v4050_v38 = vpack.c.bf16 %v3897_v4, %v3897_v4  ;;  %v6681_v4 = vld [vmem:[%s9611_s20 + $0xb0] sm:$0xff] }
 0x717   : > { %v8910_v39 = vunpack.c.l.b16 %v4050_v38 }
 0x71c   : > { %v3899_v61 = vpop.f32.mrf.mxu3  ;;  %v8905_v48 = vpop.f32.mrf.mxu2 }
 0x71d   : > { %v4051_v47 = vpack.c.bf16 %v3899_v61, %v3899_v61 }
 0x71f   : > { %v8912_v57 = vunpack.c.l.b16 %v4051_v47 }
 0x721   : > { %v4281_v16 = vpack.c.b16 %v8912_v57, %v8910_v39  ;;  %6303 = vmatmul.msk.bf16.gmra.mxu3 %vm3112_vm5, %v6677_v56 }
 0x724   : > { %v3902_v53 = vpop.f32.mrf.mxu3  ;;  %v8917_v40 = vpop.f32.mrf.mxu2 }
 0x725   : > { %v4052_v21 = vpack.c.bf16 %v3902_v53, %v3902_v53 }
 0x727   : > { %v8930_v20 = vunpack.c.l.b16 %v4052_v21 }
 0x72c   : > { %v3904_v17 = vpop.f32.mrf.mxu3  ;;  %v8922_v54 = vpop.f32.mrf.mxu2 }
 0x72d   : > { %v4053_v35 = vpack.c.bf16 %v3904_v17, %v3904_v17 }
 0x72f   : > { %v8932_v6 = vunpack.c.l.b16 %v4053_v35 }
 0x731   : > { %v4282_v28 = vpack.c.b16 %v8932_v6, %v8930_v20  ;;  %6304 = vmatmul.msk.bf16.gmra.mxu3 %vm3112_vm5, %v6678_v24 }
 0x734   : > { %v3907_v9 = vpop.f32.mrf.mxu3  ;;  %v8937_v55 = vpop.f32.mrf.mxu2 }
 0x735   : > { %v4054_v23 = vpack.c.bf16 %v3907_v9, %v3907_v9 }
 0x737   : > { %v8950_v15 = vunpack.c.l.b16 %v4054_v23 }
 0x73c   : > { %v3909_v51 = vpop.f32.mrf.mxu3  ;;  %v8942_v50 = vpop.f32.mrf.mxu2 }
 0x73d   : > { %v4055_v36 = vpack.c.bf16 %v3909_v51, %v3909_v51  ;;  %v6682_v51 = vld [vmem:[%s9611_s20 + $0xb8] sm:$0xff] }
 0x73f   : > { %v8952_v59 = vunpack.c.l.b16 %v4055_v36 }
 0x741   : > { %v4283_v13 = vpack.c.b16 %v8952_v59, %v8950_v15  ;;  %6305 = vmatmul.msk.bf16.gmra.mxu3 %vm3112_vm5, %v6679_v42 }
 0x744   : > { %v3912_v44 = vpop.f32.mrf.mxu3  ;;  %v8957_v12 = vpop.f32.mrf.mxu2 }
 0x745   : > { %v4056_v14 = vpack.c.bf16 %v3912_v44, %v3912_v44 }
 0x747   : > { %v4358_v3 = vunpack.c.l.b16 %v4056_v14 }
 0x74c   : > { %v3914_v19 = vpop.f32.mrf.mxu3  ;;  %v8962_v60 = vpop.f32.mrf.mxu2 }
 0x74d   : > { %v4057_v22 = vpack.c.bf16 %v3914_v19, %v3914_v19 }
 0x74f   : > { %v4359_v31 = vunpack.c.l.b16 %v4057_v22 }
 0x751   : > { %v4366_v0 = vpack.c.b16 %v4359_v31, %v4358_v3  ;;  %6306 = vmatmul.msk.bf16.gmra.mxu3 %vm3112_vm5, %v6680_v11  ;;  %v6696_v31 = vld [vmem:[%s9555_s11 + $0x8] sm:$0xff] }
 0x752   : > { %4236 = vmatpush.bf16.msrb.mxu0 %v6696_v31 }
 0x753   : > { %6377 = vmatmul.msk.bf16.vlgmr.msra.gmra.mxu2 %vm707_vm0, %v4366_v0 }
 0x754   : > { %v3917_v52 = vpop.f32.mrf.mxu3  ;;  %v3872_v5 = vpop.f32.mrf.mxu2 }
 0x755   : > { %v4040_v18 = vpack.c.bf16 %v3872_v5, %v3872_v5  ;;  %v4058_v1 = vpack.c.bf16 %v3917_v52, %v3917_v52 }
 0x757   : > { %v4121_v38 = vunpack.c.l.b16 %v4040_v18  ;;  %v4360_v47 = vunpack.c.l.b16 %v4058_v1  ;;  %v6683_v1 = vld [vmem:[%s9611_s20 + $0xc0] sm:$0xff] }
 0x75c   : > { %v3919_v8 = vpop.f32.mrf.mxu3  ;;  %v3874_v2 = vpop.f32.mrf.mxu2 }
 0x75d   : > { %v4059_v34 = vpack.c.bf16 %v3919_v8, %v3919_v8  ;;  %v4041_v61 = vpack.c.bf16 %v3874_v2, %v3874_v2 }
 0x75f   : > { %v4361_v56 = vunpack.c.l.b16 %v4059_v34  ;;  %v4122_v53 = vunpack.c.l.b16 %v4041_v61  ;;  %v6695_v34 = vld [vmem:[%s9555_s11] sm:$0xff] }
 0x760   : > { %4237 = vmatpush.bf16.msrb.mxu0 %v6695_v34 }
 0x761   : > { %v4367_v45 = vpack.c.b16 %v4361_v56, %v4360_v47  ;;  %6307 = vmatmul.msk.bf16.gmra.mxu3 %vm3112_vm5, %v6681_v4  ;;  %v4129_v21 = vpack.c.b16 %v4122_v53, %v4121_v38  ;;  %v6699_v4 = vld [vmem:[%s9555_s11 + $0x20] sm:$0xff] }
 0x762   : > { %4315 = vmatpush.bf16.msrb.mxu1 %v6699_v4 }
 0x763   : > { %6333 = vmatmul.msk.bf16.vlgmr.msra.gmra.mxu0 %vm707_vm0, %v4129_v21  ;;  %6378 = vmatmul.msk.bf16.gmra.mxu2 %vm707_vm0, %v4367_v45 }
 0x764   : > { %v3922_v17 = vpop.f32.mrf.mxu3  ;;  %v3877_v35 = vpop.f32.mrf.mxu2 }
 0x765   : > { %v4042_v24 = vpack.c.bf16 %v3877_v35, %v3877_v35  ;;  %v4060_v10 = vpack.c.bf16 %v3922_v17, %v3922_v17 }
 0x767   : > { %v4123_v36 = vunpack.c.l.b16 %v4042_v24  ;;  %v4362_v62 = vunpack.c.l.b16 %v4060_v10 }
 0x76c   : > { %v3924_v9 = vpop.f32.mrf.mxu3  ;;  %v3879_v27 = vpop.f32.mrf.mxu2 }
 0x76d   : > { %v4061_v23 = vpack.c.bf16 %v3924_v9, %v3924_v9  ;;  %v4043_v42 = vpack.c.bf16 %v3879_v27, %v3879_v27  ;;  %v6684_v27 = vld [vmem:[%s9611_s20 + $0xc8] sm:$0xff] }
 0x76f   : > { %v4363_v44 = vunpack.c.l.b16 %v4061_v23  ;;  %v4124_v30 = vunpack.c.l.b16 %v4043_v42 }
 0x771   : > { %v4368_v14 = vpack.c.b16 %v4363_v44, %v4362_v62  ;;  %6308 = vmatmul.msk.bf16.gmra.mxu3 %vm3112_vm5, %v6682_v51  ;;  %v4130_v19 = vpack.c.b16 %v4124_v30, %v4123_v36 }
 0x773   : > { %6334 = vmatmul.msk.bf16.gmra.mxu0 %vm707_vm0, %v4130_v19  ;;  %6379 = vmatmul.msk.bf16.gmra.mxu2 %vm707_vm0, %v4368_v14 }
 0x774   : > { %v3927_v22 = vpop.f32.mrf.mxu3  ;;  %v3882_v11 = vpop.f32.mrf.mxu2 }
 0x775   : > { %v4044_v3 = vpack.c.bf16 %v3882_v11, %v3882_v11  ;;  %v4062_v0 = vpack.c.bf16 %v3927_v22, %v3927_v22  ;;  %v4032_v22 = vpack.c.bf16 %v8903_v49, %v8903_v49  ;;  %v4033_v11 = vpack.c.bf16 %v8905_v48, %v8905_v48 }
 0x777   : > { %v4125_v8 = vunpack.c.l.b16 %v4044_v3  ;;  %v4364_v38 = vunpack.c.l.b16 %v4062_v0  ;;  %v4194_v0 = vunpack.c.l.b16 %v4032_v22 }
 0x77c   : > { %v3929_v52 = vpop.f32.mrf.mxu3  ;;  %v3884_v5 = vpop.f32.mrf.mxu2 }
 0x77d   : > { %v4063_v18 = vpack.c.bf16 %v3929_v52, %v3929_v52  ;;  %v4045_v2 = vpack.c.bf16 %v3884_v5, %v3884_v5 }
 0x77f   : > { %v4365_v61 = vunpack.c.l.b16 %v4063_v18  ;;  %v4126_v47 = vunpack.c.l.b16 %v4045_v2  ;;  %v4195_v18 = vunpack.c.l.b16 %v4033_v11 }
 0x781   : > { %v4369_v56 = vpack.c.b16 %v4365_v61, %v4364_v38  ;;  %6309 = vmatmul.msk.bf16.gmra.mxu3 %vm3112_vm5, %v6683_v1  ;;  %v4131_v53 = vpack.c.b16 %v4126_v47, %v4125_v8  ;;  %v6685_v8 = vld [vmem:[%s9611_s20 + $0xd0] sm:$0xff]  ;;  %v4202_v61 = vpack.c.b16 %v4195_v18, %v4194_v0 }
 0x783   : > { %6335 = vmatmul.msk.bf16.gmra.mxu0 %vm707_vm0, %v4131_v53  ;;  %6380 = vmatmul.msk.bf16.gmra.mxu2 %vm707_vm0, %v4369_v56  ;;  %v4034_v53 = vpack.c.bf16 %v8917_v40, %v8917_v40 }
 0x784   : > { %v3932_v45 = vpop.f32.mrf.mxu3  ;;  %v3887_v21 = vpop.f32.mrf.mxu2 }
 0x785   : > { %v4046_v17 = vpack.c.bf16 %v3887_v21, %v3887_v21  ;;  %v4064_v35 = vpack.c.bf16 %v3932_v45, %v3932_v45  ;;  %v4035_v45 = vpack.c.bf16 %v8922_v54, %v8922_v54 }
 0x787   : > { %v4127_v23 = vunpack.c.l.b16 %v4046_v17  ;;  %v8999_v36 = vunpack.c.l.b16 %v4064_v35  ;;  %v4196_v35 = vunpack.c.l.b16 %v4034_v53 }
 0x78c   : > { %v3934_v24 = vpop.f32.mrf.mxu3  ;;  %v3889_v10 = vpop.f32.mrf.mxu2 }
 0x78d   : > { %v4065_v9 = vpack.c.bf16 %v3934_v24, %v3934_v24  ;;  %v4047_v51 = vpack.c.bf16 %v3889_v10, %v3889_v10  ;;  %v4197_v24 = vunpack.c.l.b16 %v4035_v45 }
 0x78f   : > { %v9001_v42 = vunpack.c.l.b16 %v4065_v9  ;;  %v4128_v62 = vunpack.c.l.b16 %v4047_v51  ;;  %v6686_v9 = vld [vmem:[%s9611_s20 + $0xd8] sm:$0xff]  ;;  %v4203_v51 = vpack.c.b16 %v4197_v24, %v4196_v35 }
 0x791   : > { %v4452_v44 = vpack.c.b16 %v9001_v42, %v8999_v36  ;;  %6310 = vmatmul.msk.bf16.gmra.mxu3 %vm3112_vm5, %v6684_v27  ;;  %v4132_v30 = vpack.c.b16 %v4128_v62, %v4127_v23  ;;  %v4036_v62 = vpack.c.bf16 %v8937_v55, %v8937_v55  ;;  %v6687_v55 = vld [vmem:[%s9611_s20 + $0xe0] sm:$0xff]  ;;  %v6690_v36 = vld [vmem:[%s9611_s20 + $0xf8] sm:$0xff] }
 0x792   : > { %v6707_v42 = vld [vmem:[%s9555_s11 + $0x60] sm:$0xff] }
 0x793   : > { %6336 = vmatmul.msk.bf16.gmra.mxu0 %vm707_vm0, %v4132_v30  ;;  %v4037_v30 = vpack.c.bf16 %v8942_v50, %v8942_v50  ;;  %v4198_v39 = vunpack.c.l.b16 %v4036_v62  ;;  %v6703_v50 = vld [vmem:[%s9555_s11 + $0x40] sm:$0xff] }
 0x794   : > { %v3937_v14 = vpop.f32.mrf.mxu3  ;;  %v3892_v19 = vpop.f32.mrf.mxu2 }
 0x795   : > { %v4048_v3 = vpack.c.bf16 %v3892_v19, %v3892_v19  ;;  %v4066_v31 = vpack.c.bf16 %v3937_v14, %v3937_v14  ;;  %v6704_v14 = vld [vmem:[%s9555_s11 + $0x48] sm:$0xff]  ;;  %v6706_v19 = vld [vmem:[%s9555_s11 + $0x58] sm:$0xff]  ;;  %v4199_v57 = vunpack.c.l.b16 %v4037_v30 }
 0x796   : > { %4486 = vmatpush.bf16.msra.mxu0 %v6704_v14  ;;  %4572 = vmatpush.bf16.msra.mxu1 %v6706_v19 }
 0x797   : > { %v4272_v2 = vunpack.c.l.b16 %v4048_v3  ;;  %v9014_v4 = vunpack.c.l.b16 %v4066_v31  ;;  %v6705_v3 = vld [vmem:[%s9555_s11 + $0x50] sm:$0xff] }
 0x79a   : > { %4487 = vmatpush.bf16.msra.mxu0 %v6703_v50  ;;  %4573 = vmatpush.bf16.msra.mxu1 %v6705_v3 }
 0x79c   : > { %v3939_v52 = vpop.f32.mrf.mxu3  ;;  %v3894_v5 = vpop.f32.mrf.mxu2 }
 0x79d   : > { %v4067_v1 = vpack.c.bf16 %v3939_v52, %v3939_v52  ;;  %v4049_v34 = vpack.c.bf16 %v3894_v5, %v3894_v5  ;;  %v4204_v52 = vpack.c.b16 %v4199_v57, %v4198_v39 }
 0x79f   : > { %v9016_v38 = vunpack.c.l.b16 %v4067_v1  ;;  %v4273_v49 = vunpack.c.l.b16 %v4049_v34  ;;  %v4038_v1 = vpack.c.bf16 %v8957_v12, %v8957_v12 }
 0x7a1   : > { %v4453_v48 = vpack.c.b16 %v9016_v38, %v9014_v4  ;;  %6311 = vmatmul.msk.bf16.gmra.mxu3 %vm3112_vm5, %v6685_v8  ;;  %v4280_v47 = vpack.c.b16 %v4273_v49, %v4272_v2  ;;  %v4039_v8 = vpack.c.bf16 %v8962_v60, %v8962_v60  ;;  %v4200_v34 = vunpack.c.l.b16 %v4038_v1  ;;  %v6692_v1 = vld [vmem:[%s9611_s20 + $0x108] sm:$0xff] }
 0x7a3   : > { %6345 = vmatmul.msk.bf16.vlgmr.msrb.gmra.mxu0 %vm707_vm0, %v4202_v61  ;;  %6361 = vmatmul.msk.bf16.vlgmr.msrb.gmra.mxu1 %vm707_vm0, %v4280_v47  ;;  %v4201_v49 = vunpack.c.l.b16 %v4039_v8  ;;  %v6688_v61 = vld [vmem:[%s9611_s20 + $0xe8] sm:$0xff] }
 0x7a4   : > { %v3942_v56 = vpop.f32.mrf.mxu3 }
 0x7a5   : > { %v4068_v21 = vpack.c.bf16 %v3942_v56, %v3942_v56  ;;  %v4205_v47 = vpack.c.b16 %v4201_v49, %v4200_v34  ;;  %v6689_v56 = vld [vmem:[%s9611_s20 + $0xf0] sm:$0xff] }
 0x7a7   : > { %v9030_v27 = vunpack.c.l.b16 %v4068_v21 }
 0x7ac   : > { %v3944_v17 = vpop.f32.mrf.mxu3 }
 0x7ad   : > { %v4069_v10 = vpack.c.bf16 %v3944_v17, %v3944_v17  ;;  %v6708_v17 = vld [vmem:[%s9555_s11 + $0x68] sm:$0xff] }
 0x7ae   : > { %4658 = vmatpush.bf16.msrb.mxu2 %v6708_v17 }
 0x7af   : > { %v9032_v23 = vunpack.c.l.b16 %v4069_v10 }
 0x7b1   : > { %v4454_v40 = vpack.c.b16 %v9032_v23, %v9030_v27  ;;  %6312 = vmatmul.msk.bf16.gmra.mxu3 %vm3112_vm5, %v6686_v9 }
 0x7b2   : > { %4659 = vmatpush.bf16.msrb.mxu2 %v6707_v42 }
 0x7b3   : > { %6346 = vmatmul.msk.bf16.gmra.mxu0 %vm707_vm0, %v4203_v51  ;;  %6362 = vmatmul.msk.bf16.gmra.mxu1 %vm707_vm0, %v4281_v16 }
 0x7b4   : > { %v3947_v54 = vpop.f32.mrf.mxu3 }
 0x7b5   : > { %v4070_v22 = vpack.c.bf16 %v3947_v54, %v3947_v54 }
 0x7b7   : > { %v9061_v31 = vunpack.c.l.b16 %v4070_v22 }
 0x7bc   : > { %v3949_v11 = vpop.f32.mrf.mxu3 }
 0x7bd   : > { %v4071_v16 = vpack.c.bf16 %v3949_v11, %v3949_v11  ;;  %v6691_v11 = vld [vmem:[%s9611_s20 + $0x100] sm:$0xff] }
 0x7bf   : > { %v9063_v0 = vunpack.c.l.b16 %v4071_v16 }
 0x7c1   : > { %v4455_v5 = vpack.c.b16 %v9063_v0, %v9061_v31  ;;  %6313 = vmatmul.msk.bf16.gmra.mxu3 %vm3112_vm5, %v6687_v55 }
 0x7c3   : > { %6347 = vmatmul.msk.bf16.gmra.mxu0 %vm707_vm0, %v4204_v52  ;;  %6363 = vmatmul.msk.bf16.gmra.mxu1 %vm707_vm0, %v4282_v28 }
 0x7c4   : > { %v3952_v18 = vpop.f32.mrf.mxu3 }
 0x7c5   : > { %v4072_v28 = vpack.c.bf16 %v3952_v18, %v3952_v18 }
 0x7c7   : > { %v4530_v53 = vunpack.c.l.b16 %v4072_v28 }
 0x7cc   : > { %v3954_v2 = vpop.f32.mrf.mxu3 }
 0x7cd   : > { %v4073_v6 = vpack.c.bf16 %v3954_v2, %v3954_v2 }
 0x7cf   : > { %v4531_v60 = vunpack.c.l.b16 %v4073_v6 }
 0x7d1   : > { %6314 = vmatmul.msk.bf16.gmra.mxu3 %vm3112_vm5, %v6688_v61  ;;  %v4538_v21 = vpack.c.b16 %v4531_v60, %v4530_v53 }
 0x7d3   : > { %6348 = vmatmul.msk.bf16.gmra.mxu0 %vm707_vm0, %v4205_v47  ;;  %6364 = vmatmul.msk.bf16.gmra.mxu1 %vm707_vm0, %v4283_v13 }
 0x7d4   : > { %v3957_v20 = vpop.f32.mrf.mxu3 }
 0x7d5   : > { %v4074_v35 = vpack.c.bf16 %v3957_v20, %v3957_v20 }
 0x7d6   : > { %v4403_v61 = vpop.f32.mrf.mxu2 }
 0x7dc   : > { %v3959_v12 = vpop.f32.mrf.mxu3 }
 0x7dd   : > { %v4075_v13 = vpack.c.bf16 %v3959_v12, %v3959_v12  ;;  %v6693_v12 = vld [vmem:[%s9611_s20 + $0x110] sm:$0xff] }
 0x7df   : > { %v4533_v10 = vunpack.c.l.b16 %v4075_v13 }
 0x7e0   : > { %v9089_v45 = vpop.f32.mrf.mxu0 }
 0x7e1   : > { %6315 = vmatmul.msk.bf16.gmra.mxu3 %vm3112_vm5, %v6689_v56 }
 0x7e3   : > { %6393 = vmatmul.msk.bf16.vlgmr.msra.gmra.mxu0 %vm707_vm0, %v4452_v44  ;;  %6409 = vmatmul.msk.bf16.vlgmr.msra.gmra.mxu1 %vm707_vm0, %v4538_v21  ;;  %v4532_v44 = vunpack.c.l.b16 %v4074_v35  ;;  %v9150_v21 = vpop.f32.mrf.mxu2 }
 0x7e4   : > { %v3962_v15 = vpop.f32.mrf.mxu3 }
 0x7e5   : > { %v4539_v51 = vpack.c.b16 %v4533_v10, %v4532_v44  ;;  %v4076_v14 = vpack.c.bf16 %v3962_v15, %v3962_v15  ;;  %v6710_v10 = vld [vmem:[%s9555_s11 + $0x78] sm:$0xff] }
 0x7e6   : > { %4744 = vmatpush.bf16.msrb.mxu0 %v6710_v10 }
 0x7e7   : > { %v4534_v39 = vunpack.c.l.b16 %v4076_v14 }
 0x7e8   : > { %v9097_v59 = vpop.f32.mrf.mxu0 }
 0x7eb   : > { %v4408_v42 = vpop.f32.mrf.mxu2 }
 0x7ec   : > { %v3964_v24 = vpop.f32.mrf.mxu3 }
 0x7ed   : > { %v4077_v30 = vpack.c.bf16 %v3964_v24, %v3964_v24 }
 0x7ef   : > { %v4535_v22 = vunpack.c.l.b16 %v4077_v30 }
 0x7f0   : > { %v9108_v9 = vpop.f32.mrf.mxu0 }
 0x7f1   : > { %6316 = vmatmul.msk.bf16.gmra.mxu3 %vm3112_vm5, %v6690_v36  ;;  %v4540_v16 = vpack.c.b16 %v4535_v22, %v4534_v39 }
 0x7f3   : > { %6394 = vmatmul.msk.bf16.gmra.mxu0 %vm707_vm0, %v4453_v48  ;;  %6410 = vmatmul.msk.bf16.gmra.mxu1 %vm707_vm0, %v4539_v51  ;;  %v6694_v51 = vld [vmem:[%s9611_s20 + $0x118] sm:$0xff] }
 0x7f4   : > { %v3967_v54 = vpop.f32.mrf.mxu3 }
 0x7f5   : > { %v4078_v55 = vpack.c.bf16 %v3967_v54, %v3967_v54  ;;  %v6709_v54 = vld [vmem:[%s9555_s11 + $0x70] sm:$0xff] }
 0x7f6   : > { %4745 = vmatpush.bf16.msrb.mxu0 %v6709_v54  ;;  %v6727_v54 = vld [vmem:[%s9560_s16 + $0x30] sm:$0xff] }
 0x7f7   : > { %v4536_v8 = vunpack.c.l.b16 %v4078_v55  ;;  %v9173_v55 = vpop.f32.mrf.mxu2 }
 0x7f8   : > { %v9116_v62 = vpop.f32.mrf.mxu0 }
 0x7fc   : > { %v3969_v19 = vpop.f32.mrf.mxu3 }
 0x7fd   : > { %v4079_v48 = vpack.c.bf16 %v3969_v19, %v3969_v19 }
 0x7ff   : > { %v4537_v52 = vunpack.c.l.b16 %v4079_v48 }
 0x800   : > { %v9121_v57 = vpop.f32.mrf.mxu0 }
 0x801   : > { %6317 = vmatmul.msk.bf16.gmra.mxu3 %vm3112_vm5, %v6691_v11 }
 0x803   : > { %6395 = vmatmul.msk.bf16.gmra.mxu0 %vm707_vm0, %v4454_v40  ;;  %6411 = vmatmul.msk.bf16.gmra.mxu1 %vm707_vm0, %v4540_v16  ;;  %v4541_v40 = vpack.c.b16 %v4537_v52, %v4536_v8 }
 0x804   : > { %v3972_v4 = vpop.f32.mrf.mxu3 }
 0x805   : > { %v4080_v50 = vpack.c.bf16 %v3972_v4, %v3972_v4 }
 0x807   : > { %v4616_v2 = vunpack.c.l.b16 %v4080_v50 }
 0x808   : > { %v9129_v38 = vpop.f32.mrf.mxu0 }
 0x80c   : > { %v3974_v3 = vpop.f32.mrf.mxu3 }
 0x80d   : > { %v4081_v18 = vpack.c.bf16 %v3974_v3, %v3974_v3 }
 0x80f   : > { %v4617_v27 = vunpack.c.l.b16 %v4081_v18 }
 0x810   : > { %v9134_v23 = vpop.f32.mrf.mxu0 }
 0x811   : > { %v4624_v34 = vpack.c.b16 %v4617_v27, %v4616_v2  ;;  %6318 = vmatmul.msk.bf16.gmra.mxu3 %vm3112_vm5, %v6692_v1  ;;  %v4413_v27 = vpop.f32.mrf.mxu2 }
 0x813   : > { %6396 = vmatmul.msk.bf16.gmra.mxu0 %vm707_vm0, %v4455_v5  ;;  %6412 = vmatmul.msk.bf16.gmra.mxu1 %vm707_vm0, %v4541_v40 }
 0x814   : > { %v3977_v49 = vpop.f32.mrf.mxu3  ;;  %6425 = vmatmul.msk.bf16.vlgmr.msrb.gmra.mxu2 %vm707_vm0, %v4624_v34 }
 0x815   : > { %v4082_v20 = vpack.c.bf16 %v3977_v49, %v3977_v49 }
 0x817   : > { %v4618_v60 = vunpack.c.l.b16 %v4082_v20 }
 0x818   : > { %v9143_v47 = vpop.f32.mrf.mxu0 }
 0x81c   : > { %v3979_v6 = vpop.f32.mrf.mxu3 }
 0x81d   : > { %v4083_v28 = vpack.c.bf16 %v3979_v6, %v3979_v6 }
 0x81f   : > { %v4619_v56 = vunpack.c.l.b16 %v4083_v28 }
 0x820   : > { %v4239_v31 = vpop.f32.mrf.mxu0  ;;  %v4317_v0 = vpop.f32.mrf.mxu1 }
 0x821   : > { %v4625_v5 = vpack.c.b16 %v4619_v56, %v4618_v60  ;;  %6319 = vmatmul.msk.bf16.gmra.mxu3 %vm3112_vm5, %v6693_v12  ;;  %v4240_v53 = vadd.f32 %v4239_v31, %v9089_v45  ;;  %v9187_v60 = vpop.f32.mrf.mxu2 }
 0x823   : > { %v4337_v15 = vadd.f32 %v4317_v0, %v4240_v53 }
 0x824   : > { %v3982_v13 = vpop.f32.mrf.mxu3  ;;  %6426 = vmatmul.msk.bf16.gmra.mxu2 %vm707_vm0, %v4625_v5 }
 0x825   : > { %v9153_v17 = vadd.f32 %v4403_v61, %v4337_v15  ;;  %v4084_v36 = vpack.c.bf16 %v3982_v13, %v3982_v13 }
 0x827   : > { %v4620_v30 = vunpack.c.l.b16 %v4084_v36  ;;  %v6728_v36 = vld [vmem:[%s9560_s16 + $0x38] sm:$0xff] }
 0x828   : > { %v9155_v35 = vpop.f32.mrf.mxu0  ;;  %v9157_v24 = vpop.f32.mrf.mxu1  ;;  %5262 = vmatpush.bf16.msra.mxu0 %v6728_v36 }
 0x82c   : > { %v3984_v44 = vpop.f32.mrf.mxu3  ;;  %5263 = vmatpush.bf16.msra.mxu0 %v6727_v54 }
 0x82d   : > { %v4085_v45 = vpack.c.bf16 %v3984_v44, %v3984_v44 }
 0x82f   : > { %v4621_v14 = vunpack.c.l.b16 %v4085_v45  ;;  %v4418_v45 = vpop.f32.mrf.mxu2 }
 0x830   : > { %v4244_v19 = vpop.f32.mrf.mxu0  ;;  %v4322_v22 = vpop.f32.mrf.mxu1 }
 0x831   : > { %v4626_v11 = vpack.c.b16 %v4621_v14, %v4620_v30  ;;  %6320 = vmatmul.msk.bf16.gmra.mxu3 %vm3112_vm5, %v6694_v51  ;;  %v4245_v39 = vadd.f32 %v4244_v19, %v9108_v9  ;;  %v6726_v14 = vld [vmem:[%s9560_s16 + $0x28] sm:$0xff] }
 0x832   : > { %5264 = vmatpush.bf16.msra.mxu0 %v6726_v14 }
 0x833   : > { %v4339_v16 = vadd.f32 %v4322_v22, %v4245_v39  ;;  %v6725_v39 = vld [vmem:[%s9560_s16 + $0x20] sm:$0xff] }
 0x834   : > { %v3987_v4 = vpop.f32.mrf.mxu3  ;;  %6427 = vmatmul.msk.bf16.gmra.mxu2 %vm707_vm0, %v4626_v11 }
 0x835   : > { %v9171_v48 = vadd.f32 %v4408_v42, %v4339_v16  ;;  %v4086_v52 = vpack.c.bf16 %v3987_v4, %v3987_v4 }
 0x836   : > { %5265 = vmatpush.bf16.msra.mxu0 %v6725_v39 }
 0x837   : > { %v4622_v8 = vunpack.c.l.b16 %v4086_v52 }
 0x838   : > { %v9175_v50 = vpop.f32.mrf.mxu0  ;;  %v9177_v3 = vpop.f32.mrf.mxu1 }
 0x83c   : > { %v3989_v18 = vpop.f32.mrf.mxu3 }
 0x83d   : > { %v4087_v1 = vpack.c.bf16 %v3989_v18, %v3989_v18 }
 0x83f   : > { %v4623_v2 = vunpack.c.l.b16 %v4087_v1 }
 0x840   : > { %v4249_v40 = vpop.f32.mrf.mxu0  ;;  %v4327_v9 = vpop.f32.mrf.mxu1 }
 0x841   : > { %v4627_v34 = vpack.c.b16 %v4623_v2, %v4622_v8  ;;  %v4250_v49 = vadd.f32 %v4249_v40, %v9121_v57  ;;  %v6724_v2 = vld [vmem:[%s9560_s16 + $0x18] sm:$0xff] }
 0x842   : > { %5266 = vmatpush.bf16.msra.mxu0 %v6724_v2 }
 0x843   : > { %v4341_v61 = vadd.f32 %v4327_v9, %v4250_v49  ;;  %v6723_v9 = vld [vmem:[%s9560_s16 + $0x10] sm:$0xff] }
 0x844   : > { %v3992_v20 = vpop.f32.mrf.mxu3  ;;  %6428 = vmatmul.msk.bf16.gmra.mxu2 %vm707_vm0, %v4627_v34 }
 0x845   : > { %v9181_v6 = vadd.f32 %v4413_v27, %v4341_v61  ;;  %v4088_v56 = vpack.c.bf16 %v3992_v20, %v3992_v20  ;;  %v6712_v61 = vld [vmem:[%s9555_s11 + $0x88] sm:$0xff] }
 0x846   : > { %5267 = vmatpush.bf16.msra.mxu0 %v6723_v9  ;;  %v6722_v20 = vld [vmem:[%s9560_s16 + $0x8] sm:$0xff]  ;;  %4830 = vmatpush.bf16.msrb.mxu1 %v6712_v61 }
 0x847   : > { %v4702_v5 = vunpack.c.l.b16 %v4088_v56 }
 0x848   : > { %v9183_v28 = vpop.f32.mrf.mxu0  ;;  %v9185_v12 = vpop.f32.mrf.mxu1 }
 0x84a   : > { %5268 = vmatpush.bf16.msra.mxu0 %v6722_v20 }
 0x84c   : > { %v3994_v31 = vpop.f32.mrf.mxu3 }
 0x84d   : > { %v4089_v0 = vpack.c.bf16 %v3994_v31, %v3994_v31 }
 0x84f   : > { %v4703_v53 = vunpack.c.l.b16 %v4089_v0 }
 0x850   : > { %v4254_v15 = vpop.f32.mrf.mxu0  ;;  %v4332_v13 = vpop.f32.mrf.mxu1 }
 0x851   : > { %v4710_v57 = vpack.c.b16 %v4703_v53, %v4702_v5  ;;  %v4255_v10 = vadd.f32 %v4254_v15, %v9134_v23  ;;  %v6711_v53 = vld [vmem:[%s9555_s11 + $0x80] sm:$0xff] }
 0x852   : > { %v6721_v15 = vld [vmem:[%s9560_s16] sm:$0xff]  ;;  %4831 = vmatpush.bf16.msrb.mxu1 %v6711_v53 }
 0x853   : > { %6441 = vmatmul.msk.bf16.vlgmr.msrb.gmra.mxu0 %vm707_vm0, %v4710_v57  ;;  %v4343_v42 = vadd.f32 %v4332_v13, %v4255_v10 }
 0x854   : > { %v3997_v44 = vpop.f32.mrf.mxu3  ;;  %5269 = vmatpush.bf16.msra.mxu0 %v6721_v15 }
 0x855   : > { %v9194_v51 = vadd.f32 %v4418_v45, %v4343_v42  ;;  %v4090_v19 = vpack.c.bf16 %v3997_v44, %v3997_v44 }
 0x857   : > { %v4704_v16 = vunpack.c.l.b16 %v4090_v19 }
 0x858   : > { %v9199_v30 = vpop.f32.mrf.mxu0  ;;  %v9201_v23 = vpop.f32.mrf.mxu1 }
 0x85c   : > { %v3999_v22 = vpop.f32.mrf.mxu3 }
 0x85d   : > { %v4091_v11 = vpack.c.bf16 %v3999_v22, %v3999_v22 }
 0x85f   : > { %v4705_v4 = vunpack.c.l.b16 %v4091_v11 }
 0x860   : > { %v4489_v52 = vpop.f32.mrf.mxu0  ;;  %v4575_v18 = vpop.f32.mrf.mxu1 }
 0x861   : > { %v4711_v1 = vpack.c.b16 %v4705_v4, %v4704_v16  ;;  %v4509_v8 = vadd.f32 %v4489_v52, %v9153_v17 }
 0x863   : > { %6442 = vmatmul.msk.bf16.gmra.mxu0 %vm707_vm0, %v4711_v1  ;;  %v9214_v27 = vadd.f32 %v4575_v18, %v4509_v8 }
 0x864   : > { %v4002_v40 = vpop.f32.mrf.mxu3 }
 0x865   : > { %v4092_v17 = vpack.c.bf16 %v4002_v40, %v4002_v40 }
 0x867   : > { %v4706_v0 = vunpack.c.l.b16 %v4092_v17 }
 0x868   : > { %v9219_v34 = vpop.f32.mrf.mxu0  ;;  %v9221_v49 = vpop.f32.mrf.mxu1 }
 0x86c   : > { %v4004_v56 = vpop.f32.mrf.mxu3 }
 0x86d   : > { %v4093_v31 = vpack.c.bf16 %v4004_v56, %v4004_v56 }
 0x86f   : > { %v4707_v5 = vunpack.c.l.b16 %v4093_v31 }
 0x870   : > { %v4494_v13 = vpop.f32.mrf.mxu0  ;;  %v4580_v57 = vpop.f32.mrf.mxu1 }
 0x871   : > { %v4712_v10 = vpack.c.b16 %v4707_v5, %v4706_v0  ;;  %v4511_v36 = vadd.f32 %v4494_v13, %v9171_v48 }
 0x873   : > { %6443 = vmatmul.msk.bf16.gmra.mxu0 %vm707_vm0, %v4712_v10  ;;  %v9237_v42 = vadd.f32 %v4580_v57, %v4511_v36 }
 0x874   : > { %v4007_v44 = vpop.f32.mrf.mxu3 }
 0x875   : > { %v4094_v14 = vpack.c.bf16 %v4007_v44, %v4007_v44 }
 0x877   : > { %v4708_v11 = vunpack.c.l.b16 %v4094_v14 }
 0x878   : > { %v9239_v45 = vpop.f32.mrf.mxu0  ;;  %v9241_v54 = vpop.f32.mrf.mxu1 }
 0x87c   : > { %v4009_v19 = vpop.f32.mrf.mxu3 }
 0x87d   : > { %v4095_v22 = vpack.c.bf16 %v4009_v19, %v4009_v19 }
 0x87f   : > { %v4709_v39 = vunpack.c.l.b16 %v4095_v22 }
 0x880   : > { %v4499_v16 = vpop.f32.mrf.mxu0  ;;  %v4585_v4 = vpop.f32.mrf.mxu1 }
 0x881   : > { %v4713_v52 = vpack.c.b16 %v4709_v39, %v4708_v11  ;;  %v4513_v18 = vadd.f32 %v4499_v16, %v9181_v6 }
 0x883   : > { %6444 = vmatmul.msk.bf16.gmra.mxu0 %vm707_vm0, %v4713_v52  ;;  %v9245_v48 = vadd.f32 %v4585_v4, %v4513_v18 }
 0x884   : > { %v4012_v1 = vpop.f32.mrf.mxu3 }
 0x885   : > { %v4096_v40 = vpack.c.bf16 %v4012_v1, %v4012_v1 }
 0x887   : > { %v4788_v61 = vunpack.c.l.b16 %v4096_v40 }
 0x888   : > { %v9247_v8 = vpop.f32.mrf.mxu0  ;;  %v9249_v2 = vpop.f32.mrf.mxu1 }
 0x88c   : > { %v4014_v9 = vpop.f32.mrf.mxu3 }
 0x88d   : > { %v4097_v17 = vpack.c.bf16 %v4014_v9, %v4014_v9 }
 0x88f   : > { %v4789_v20 = vunpack.c.l.b16 %v4097_v17 }
 0x890   : > { %v4504_v56 = vpop.f32.mrf.mxu0  ;;  %v4590_v5 = vpop.f32.mrf.mxu1 }
 0x891   : > { %v4796_v31 = vpack.c.b16 %v4789_v20, %v4788_v61  ;;  %v4515_v0 = vadd.f32 %v4504_v56, %v9194_v51 }
 0x893   : > { %6457 = vmatmul.msk.bf16.vlgmr.msrb.gmra.mxu1 %vm707_vm0, %v4796_v31  ;;  %5270 = vmatmul.bf16.vlgmr.msra.gmra.mxu0 %v8718_v7  ;;  %v9254_v6 = vadd.f32 %v4590_v5, %v4515_v0 }
 0x894   : > { %v4017_v53 = vpop.f32.mrf.mxu3 }
 0x895   : > { %v4098_v15 = vpack.c.bf16 %v4017_v53, %v4017_v53 }
 0x897   : > { %v4790_v10 = vunpack.c.l.b16 %v4098_v15 }
 0x898   : > { %v9264_v17 = vpop.f32.mrf.mxu0  ;;  %v9268_v0 = vpop.f32.mrf.mxu1 }
 0x89c   : > { %v4019_v13 = vpop.f32.mrf.mxu3 }
 0x89d   : > { %v4099_v57 = vpack.c.bf16 %v4019_v13, %v4019_v13 }
 0x89f   : > { %v4791_v36 = vunpack.c.l.b16 %v4099_v57  ;;  %v9277_v57 = vld [vmem:[%s9556_s12] ss:$0 sm:$0xff] }
 0x8a1   : > { %v4797_v44 = vpack.c.b16 %v4791_v36, %v4790_v10 }
 0x8a3   : > { %6458 = vmatmul.msk.bf16.gmra.mxu1 %vm707_vm0, %v4797_v44  ;;  %5275 = vmatmul.bf16.gmra.mxu0 %v8738_v37  ;;  %v9262_v37 = vpop.f32.mrf.mxu2 }
 0x8a4   : > { %v4022_v14 = vpop.f32.mrf.mxu3 }
 0x8a5   : > { %v4100_v51 = vpack.c.bf16 %v4022_v14, %v4022_v14 }
 0x8a7   : > { %v4792_v11 = vunpack.c.l.b16 %v4100_v51  ;;  %v6715_v51 = vld [vmem:[%s9557_s13 + $0x10] sm:$0xff] }
 0x8ab   : > { %v4661_v61 = vpop.f32.mrf.mxu2 }
 0x8ac   : > { %v4024_v19 = vpop.f32.mrf.mxu3  ;;  %v4681_v15 = vadd.f32 %v4661_v61, %v9214_v27 }
 0x8ad   : > { %v4101_v22 = vpack.c.bf16 %v4024_v19, %v4024_v19 }
 0x8af   : > { %v4793_v39 = vunpack.c.l.b16 %v4101_v22 }
 0x8b1   : > { %v4798_v7 = vpack.c.b16 %v4793_v39, %v4792_v11 }
 0x8b3   : > { %6459 = vmatmul.msk.bf16.gmra.mxu1 %vm707_vm0, %v4798_v7  ;;  %5280 = vmatmul.bf16.gmra.mxu0 %v8753_v25  ;;  %v4242_v25 = vadd.f32 %v9155_v35, %v9097_v59  ;;  %v4663_v56 = vpop.f32.mrf.mxu2 }
 0x8b4   : > { %v4027_v16 = vpop.f32.mrf.mxu3 }
 0x8b5   : > { %v4102_v4 = vpack.c.bf16 %v4027_v16, %v4027_v16  ;;  %v4338_v5 = vadd.f32 %v9157_v24, %v4242_v25  ;;  %v6716_v24 = vld [vmem:[%s9557_s13 + $0x18] sm:$0xff] }
 0x8b6   : > { %5049 = vmatpush.bf16.msra.mxu2 %v6716_v24 }
 0x8b7   : > { %v4794_v1 = vunpack.c.l.b16 %v4102_v4  ;;  %v4424_v53 = vadd.f32 %v9150_v21, %v4338_v5 }
 0x8ba   : > { %5050 = vmatpush.bf16.msra.mxu2 %v6715_v51 }
 0x8bb   : > { %v4666_v59 = vpop.f32.mrf.mxu2 }
 0x8bc   : > { %v4029_v52 = vpop.f32.mrf.mxu3 }
 0x8bd   : > { %v4103_v18 = vpack.c.bf16 %v4029_v52, %v4029_v52 }
 0x8bf   : > { %v4795_v40 = vunpack.c.l.b16 %v4103_v18  ;;  %v4683_v18 = vadd.f32 %v4666_v59, %v9237_v42 }
 0x8c1   : > { %v4799_v9 = vpack.c.b16 %v4795_v40, %v4794_v1 }
 0x8c3   : > { %6460 = vmatmul.msk.bf16.gmra.mxu1 %vm707_vm0, %v4799_v9  ;;  %5285 = vmatmul.bf16.gmra.mxu0 %v8765_v29  ;;  %v4510_v29 = vadd.f32 %v9219_v34, %v4424_v53  ;;  %v4247_v34 = vadd.f32 %v9175_v50, %v9116_v62  ;;  %v4668_v7 = vpop.f32.mrf.mxu2  ;;  %v6714_v62 = vld [vmem:[%s9557_s13 + $0x8] sm:$0xff] }
 0x8c4   : > { %5051 = vmatpush.bf16.msra.mxu2 %v6714_v62 }
 0x8c5   : > { %v4596_v21 = vadd.f32 %v9221_v49, %v4510_v29  ;;  %v4340_v49 = vadd.f32 %v9177_v3, %v4247_v34  ;;  %v6713_v3 = vld [vmem:[%s9557_s13] sm:$0xff] }
 0x8c7   : > { %v4682_v14 = vadd.f32 %v4663_v56, %v4596_v21  ;;  %v4426_v4 = vadd.f32 %v9173_v55, %v4340_v49 }
 0x8c8   : > { %5052 = vmatpush.bf16.msra.mxu2 %v6713_v3 }
 0x8c9   : > { %v4512_v40 = vadd.f32 %v9239_v45, %v4426_v4 }
 0x8cb   : > { %v4598_v55 = vadd.f32 %v9241_v54, %v4512_v40  ;;  %v4671_v53 = vpop.f32.mrf.mxu2 }
 0x8cd   : > { %v4684_v29 = vadd.f32 %v4668_v7, %v4598_v55 }
 0x8d0   : > { %v4747_v20 = vpop.f32.mrf.mxu0 }
 0x8d1   : > { %v4767_v13 = vadd.f32 %v4747_v20, %v4681_v15  ;;  %v4252_v15 = vadd.f32 %v9183_v28, %v9129_v38 }
 0x8d3   : > { %v4342_v54 = vadd.f32 %v9185_v12, %v4252_v15 }
 0x8d5   : > { %v4428_v28 = vadd.f32 %v9187_v60, %v4342_v54 }
 0x8d7   : > { %v4514_v12 = vadd.f32 %v9247_v8, %v4428_v28 }
 0x8d8   : > { %v4749_v31 = vpop.f32.mrf.mxu0 }
 0x8d9   : > { %v4768_v22 = vadd.f32 %v4749_v31, %v4682_v14  ;;  %v4600_v60 = vadd.f32 %v9249_v2, %v4514_v12 }
 0x8e0   : > { %v4752_v36 = vpop.f32.mrf.mxu0 }
 0x8e1   : > { %v4769_v61 = vadd.f32 %v4752_v36, %v4683_v18 }
 0x8e8   : > { %v4754_v16 = vpop.f32.mrf.mxu0 }
 0x910   : > { %v4833_v10 = vpop.f32.mrf.mxu1 }
 0x911   : > { %v4853_v35 = vadd.f32 %v4833_v10, %v4767_v13  ;;  %v4757_v13 = vpop.f32.mrf.mxu0 }
 0x913   : > { %v9284_v27 = vadd.f32 %v9277_v57, %v4853_v35  ;;  %v4770_v35 = vadd.f32 %v4754_v16, %v4684_v29 }
 0x915   : > { %v4873_v44 = vmin.f32 %v9284_v27, 20.0  ;;  %vm4953_vm0 = vcmp.gt.f32.partialorder %v9284_v27, 20.0 }
 0x917   : > { %v4881_v19 = vmul.f32 1.442695, %v4873_v44 }
 0x918   : > { %v4835_v11 = vpop.f32.mrf.mxu1 }
 0x919   : > { %7014 = vpow2.f32 %v4881_v19  ;;  %v4854_v39 = vadd.f32 %v4835_v11, %v4768_v22  ;;  %v4685_v22 = vadd.f32 %v4671_v53, %v9245_v48  ;;  %v4673_v11 = vpop.f32.mrf.mxu2  ;;  %v4759_v16 = vpop.f32.mrf.mxu0 }
 0x91b   : > { %v9297_v50 = vadd.f32 %v9277_v57, %v4854_v39  ;;  %v4771_v62 = vadd.f32 %v4757_v13, %v4685_v22 }
 0x91d   : > { %v4874_v52 = vmin.f32 %v9297_v50, 20.0  ;;  %vm4954_vm14 = vcmp.gt.f32.partialorder %v9297_v50, 20.0 }
 0x91f   : > { %v7015_v1 = vpop.eup %7014  ;;  %v4883_v9 = vmul.f32 1.442695, %v4874_v52 }
 0x920   : > { %v4897_v20 = vadd.f32 2.0, %v7015_v1  ;;  %v4838_v25 = vpop.f32.mrf.mxu1 }
 0x921   : > { %7016 = vpow2.f32 %v4883_v9  ;;  %v4855_v56 = vadd.f32 %v4838_v25, %v4769_v61  ;;  %v4257_v9 = vadd.f32 %v9199_v30, %v9143_v47 }
 0x922   : > { %v4905_v31 = vmul.f32 %v7015_v1, %v4897_v20 }
 0x923   : > { %v9308_v5 = vadd.f32 %v9277_v57, %v4855_v56  ;;  %v4686_v56 = vadd.f32 %v4673_v11, %v4600_v60 }
 0x924   : > { %v4913_v42 = vadd.f32 2.0, %v4905_v31  ;;  %v4961_v61 = vmul.f32 %v4905_v31, %v9284_v27  ;;  %v4762_v31 = vpop.f32.mrf.mxu0 }
 0x925   : > { %v4875_v45 = vmin.f32 %v9308_v5, 20.0  ;;  %v4772_v15 = vadd.f32 %v4759_v16, %v4686_v56  ;;  %vm4955_vm15 = vcmp.gt.f32.partialorder %v9308_v5, 20.0 }
 0x926   : > { %7018 = vrcp.f32 %v4913_v42 }
 0x927   : > { %v7017_v10 = vpop.eup %7016  ;;  %v4885_v59 = vmul.f32 1.442695, %v4875_v45  ;;  %v4344_v45 = vadd.f32 %v9201_v23, %v4257_v9 }
 0x928   : > { %v4898_v36 = vadd.f32 2.0, %v7017_v10  ;;  %v4840_v24 = vpop.f32.mrf.mxu1 }
 0x929   : > { %7020 = vpow2.f32 %v4885_v59  ;;  %v4856_v21 = vadd.f32 %v4840_v24, %v4770_v35  ;;  %v4430_v23 = vadd.f32 %v9262_v37, %v4344_v45 }
 0x92a   : > { %v4906_v34 = vmul.f32 %v7017_v10, %v4898_v36  ;;  %v4676_v10 = vpop.f32.mrf.mxu2 }
 0x92b   : > { %v9315_v44 = vadd.f32 %v9277_v57, %v4856_v21  ;;  %v4516_v11 = vadd.f32 %v9264_v17, %v4430_v23 }
 0x92c   : > { %v7019_v14 = vpop.eup %7018  ;;  %v4914_v38 = vadd.f32 2.0, %v4906_v34  ;;  %v4962_v47 = vmul.f32 %v4906_v34, %v9297_v50  ;;  %v4764_v17 = vpop.f32.mrf.mxu0 }
 0x92d   : > { %v4929_v51 = vmul.f32 %v7019_v14, %v4913_v42  ;;  %v4876_v19 = vmin.f32 %v9315_v44, 20.0  ;;  %vm4956_vm1 = vcmp.gt.f32.partialorder %v9315_v44, 20.0 }
 0x92e   : > { %7022 = vrcp.f32 %v4914_v38 }
 0x92f   : > { %v7021_v49 = vpop.eup %7020  ;;  %v4937_v39 = vsub.f32 2.0, %v4929_v51  ;;  %v4887_v7 = vmul.f32 1.442695, %v4876_v19  ;;  %v4687_v51 = vadd.f32 %v4676_v10, %v9254_v6 }
 0x930   : > { %v4899_v4 = vadd.f32 2.0, %v7021_v49  ;;  %v4843_v52 = vpop.f32.mrf.mxu1 }
 0x931   : > { %7024 = vpow2.f32 %v4887_v7  ;;  %v4857_v18 = vadd.f32 %v4843_v52, %v4771_v62  ;;  %v4945_v1 = vmul.f32 %v7019_v14, %v4937_v39  ;;  %v4773_v12 = vadd.f32 %v4762_v31, %v4687_v51 }
 0x932   : > { %v4907_v3 = vmul.f32 %v7021_v49, %v4899_v4  ;;  %v4678_v6 = vpop.f32.mrf.mxu2 }
 0x933   : > { %v9323_v40 = vadd.f32 %v9277_v57, %v4857_v18  ;;  %v4969_v42 = vmul.f32 %v4961_v61, %v4945_v1 }
 0x934   : > { %v7023_v48 = vpop.eup %7022  ;;  %v4915_v8 = vadd.f32 2.0, %v4907_v3  ;;  %v4963_v60 = vmul.f32 %v4907_v3, %v9308_v5 }
 0x935   : > { %v4930_v20 = vmul.f32 %v7023_v48, %v4914_v38  ;;  %v4877_v25 = vmin.f32 %v9323_v40, 20.0  ;;  %v4977_v36 = vsel %vm4953_vm0, %v9284_v27, %v4969_v42  ;;  %vm4957_vm2 = vcmp.gt.f32.partialorder %v9323_v40, 20.0 }
 0x936   : > { %7026 = vrcp.f32 %v4915_v8  ;;  %v4985_v19 = vadd.f32 %v4977_v36, %v8711_v58  ;;  %v4602_v58 = vadd.f32 %v9268_v0, %v4516_v11 }
 0x937   : > { %v7025_v55 = vpop.eup %7024  ;;  %v4938_v53 = vsub.f32 2.0, %v4930_v20  ;;  %v4889_v2 = vmul.f32 1.442695, %v4877_v25 }
 0x938   : > { %v4900_v29 = vadd.f32 2.0, %v7025_v55  ;;  %v4845_v13 = vpop.f32.mrf.mxu1  ;;  %v4688_v9 = vadd.f32 %v4678_v6, %v4602_v58 }
 0x939   : > { %v4946_v59 = vmul.f32 %v7023_v48, %v4938_v53  ;;  %7028 = vpow2.f32 %v4889_v2  ;;  %v4858_v30 = vadd.f32 %v4845_v13, %v4772_v15 }
 0x93a   : > { %v4908_v35 = vmul.f32 %v7025_v55, %v4900_v29  ;;  %v4774_v56 = vadd.f32 %v4764_v17, %v4688_v9 }
 0x93b   : > { %v4970_v24 = vmul.f32 %v4962_v47, %v4946_v59  ;;  %v9334_v54 = vadd.f32 %v9277_v57, %v4858_v30 }
 0x93c   : > { %v7027_v21 = vpop.eup %7026  ;;  %v4916_v14 = vadd.f32 2.0, %v4908_v35  ;;  %v4964_v53 = vmul.f32 %v4908_v35, %v9315_v44 }
 0x93d   : > { %v4978_v34 = vsel %vm4954_vm14, %v9297_v50, %v4970_v24  ;;  %v4931_v38 = vmul.f32 %v7027_v21, %v4915_v8  ;;  %v4878_v28 = vmin.f32 %v9334_v54, 20.0  ;;  %vm4958_vm3 = vcmp.gt.f32.partialorder %v9334_v54, 20.0 }
 0x93e   : > { %v4986_v27 = vadd.f32 %v4978_v34, %v8713_v43  ;;  %7030 = vrcp.f32 %v4916_v14 }
 0x93f   : > { %v7029_v22 = vpop.eup %7028  ;;  %v4939_v49 = vsub.f32 2.0, %v4931_v38  ;;  %v4891_v37 = vmul.f32 1.442695, %v4878_v28 }
 0x940   : > { %v4993_v39 = vpack.c.bf16 %v4986_v27, %v4985_v19  ;;  %v4901_v7 = vadd.f32 2.0, %v7029_v22  ;;  %v4848_v62 = vpop.f32.mrf.mxu1 }
 0x941   : > { %7032 = vpow2.f32 %v4891_v37  ;;  %v4859_v50 = vadd.f32 %v4848_v62, %v4773_v12  ;;  %v4947_v4 = vmul.f32 %v7027_v21, %v4939_v49 }
 0x942   : > { %v4909_v16 = vmul.f32 %v7029_v22, %v4901_v7  ;;  %6477 = vmatmul.msk.bf16.vlgmr.msra.gmra.mxu2 %vm3112_vm5, %v4993_v39 }
 0x943   : > { %v9347_v43 = vadd.f32 %v9277_v57, %v4859_v50  ;;  %v4971_v61 = vmul.f32 %v4963_v60, %v4947_v4 }
 0x944   : > { %v7031_v52 = vpop.eup %7030  ;;  %v4917_v18 = vadd.f32 2.0, %v4909_v16  ;;  %v4965_v28 = vmul.f32 %v4909_v16, %v9323_v40 }
 0x945   : > { %v4932_v1 = vmul.f32 %v7031_v52, %v4916_v14  ;;  %v4879_v48 = vmin.f32 %v9347_v43, 20.0  ;;  %v4979_v29 = vsel %vm4955_vm15, %v9308_v5, %v4971_v61  ;;  %vm4959_vm4 = vcmp.gt.f32.partialorder %v9347_v43, 20.0 }
 0x946   : > { %7034 = vrcp.f32 %v4917_v18  ;;  %v4987_v31 = vadd.f32 %v4979_v29, %v8731_v41 }
 0x947   : > { %v7033_v8 = vpop.eup %7032  ;;  %v4940_v20 = vsub.f32 2.0, %v4932_v1  ;;  %v4893_v25 = vmul.f32 1.442695, %v4879_v48 }
 0x948   : > { %v4902_v0 = vadd.f32 2.0, %v7033_v8  ;;  %v4850_v55 = vpop.f32.mrf.mxu1 }
 0x949   : > { %v4948_v42 = vmul.f32 %v7031_v52, %v4940_v20  ;;  %7036 = vpow2.f32 %v4893_v25  ;;  %v4860_v2 = vadd.f32 %v4850_v55, %v4774_v56  ;;  %v9378_v20 = vld [vmem:[%s9558_s14] ss:$0 sm:$0xff]  ;;  %v6720_v25 = vld [vmem:[%s9559_s15 + $0x18] sm:$0xff]  ;;  %v6718_v55 = vld [vmem:[%s9559_s15 + $0x8] sm:$0xff] }
 0x94a   : > { %v4910_v3 = vmul.f32 %v7033_v8, %v4902_v0  ;;  %5331 = vmatpush.bf16.msra.mxu1 %v6720_v25 }
 0x94b   : > { %v4972_v15 = vmul.f32 %v4964_v53, %v4948_v42  ;;  %v4872_v45 = vadd.f32 %v9277_v57, %v4860_v2  ;;  %v6717_v2 = vld [vmem:[%s9559_s15] sm:$0xff] }
 0x94c   : > { %v7035_v13 = vpop.eup %7034  ;;  %v4918_v10 = vadd.f32 2.0, %v4910_v3  ;;  %v4966_v22 = vmul.f32 %v4910_v3, %v9334_v54 }
 0x94d   : > { %v4933_v59 = vmul.f32 %v7035_v13, %v4917_v18  ;;  %v4880_v47 = vmin.f32 %v4872_v45, 20.0  ;;  %v4980_v30 = vsel %vm4956_vm1, %v9315_v44, %v4972_v15  ;;  %vm4960_vm6 = vcmp.gt.f32.partialorder %v4872_v45, 20.0 }
 0x94e   : > { %7038 = vrcp.f32 %v4918_v10  ;;  %v4988_v35 = vadd.f32 %v4980_v30, %v8734_v63 }
 0x94f   : > { %v7037_v36 = vpop.eup %7036  ;;  %v4941_v24 = vsub.f32 2.0, %v4933_v59  ;;  %v4895_v21 = vmul.f32 1.442695, %v4880_v47 }
 0x950   : > { %v4903_v23 = vadd.f32 2.0, %v7037_v36  ;;  %v4994_v57 = vpack.c.bf16 %v4988_v35, %v4987_v31 }
 0x951   : > { %7040 = vpow2.f32 %v4895_v21  ;;  %v4949_v14 = vmul.f32 %v7035_v13, %v4941_v24 }
 0x952   : > { %v4911_v5 = vmul.f32 %v7037_v36, %v4903_v23  ;;  %6478 = vmatmul.msk.bf16.gmra.mxu2 %vm3112_vm5, %v4994_v57 }
 0x953   : > { %v4973_v41 = vmul.f32 %v4965_v28, %v4949_v14 }
 0x954   : > { %v7039_v34 = vpop.eup %7038  ;;  %v4919_v38 = vadd.f32 2.0, %v4911_v5 }
 0x955   : > { %v4934_v44 = vmul.f32 %v7039_v34, %v4918_v10  ;;  %v4981_v37 = vsel %vm4957_vm2, %v9323_v40, %v4973_v41  ;;  %v4967_v40 = vmul.f32 %v4911_v5, %v9347_v43 }
 0x956   : > { %7042 = vrcp.f32 %v4919_v38  ;;  %v4989_v50 = vadd.f32 %v4981_v37, %v8746_v32 }
 0x957   : > { %v7041_v51 = vpop.eup %7040  ;;  %v4942_v19 = vsub.f32 2.0, %v4934_v44 }
 0x958   : > { %v4904_v63 = vadd.f32 2.0, %v7041_v51 }
 0x959   : > { %v4950_v27 = vmul.f32 %v7039_v34, %v4942_v19 }
 0x95a   : > { %v4912_v11 = vmul.f32 %v7041_v51, %v4904_v63 }
 0x95b   : > { %v4974_v49 = vmul.f32 %v4966_v22, %v4950_v27 }
 0x95c   : > { %v7043_v12 = vpop.eup %7042  ;;  %v4920_v39 = vadd.f32 2.0, %v4912_v11  ;;  %v4968_v48 = vmul.f32 %v4912_v11, %v4872_v45 }
 0x95d   : > { %v4935_v7 = vmul.f32 %v7043_v12, %v4919_v38  ;;  %v4982_v62 = vsel %vm4958_vm3, %v9334_v54, %v4974_v49 }
 0x95e   : > { %7044 = vrcp.f32 %v4920_v39  ;;  %v4990_v16 = vadd.f32 %v4982_v62, %v8749_v26 }
 0x95f   : > { %v4943_v6 = vsub.f32 2.0, %v4935_v7 }
 0x960   : > { %v4995_v58 = vpack.c.bf16 %v4990_v16, %v4989_v50 }
 0x961   : > { %v4951_v4 = vmul.f32 %v7043_v12, %v4943_v6 }
 0x962   : > { %6479 = vmatmul.msk.bf16.gmra.mxu2 %vm3112_vm5, %v4995_v58 }
 0x963   : > { %v4975_v18 = vmul.f32 %v4967_v40, %v4951_v4 }
 0x964   : > { %v7045_v52 = vpop.eup %7044 }
 0x965   : > { %v4936_v17 = vmul.f32 %v7045_v52, %v4920_v39  ;;  %v4983_v32 = vsel %vm4959_vm4, %v9347_v43, %v4975_v18 }
 0x966   : > { %v4991_v9 = vadd.f32 %v4983_v32, %v8759_v46  ;;  %v6719_v46 = vld [vmem:[%s9559_s15 + $0x10] sm:$0xff] }
 0x967   : > { %v4944_v60 = vsub.f32 2.0, %v4936_v17  ;;  %5332 = vmatpush.bf16.msra.mxu1 %v6719_v46 }
 0x969   : > { %v4952_v1 = vmul.f32 %v7045_v52, %v4944_v60 }
 0x96b   : > { %v4976_v54 = vmul.f32 %v4968_v48, %v4952_v1  ;;  %5333 = vmatpush.bf16.msra.mxu1 %v6718_v55 }
 0x96d   : > { %v4984_v26 = vsel %vm4960_vm6, %v4872_v45, %v4976_v54 }
 0x96e   : > { %v4992_v8 = vadd.f32 %v4984_v26, %v8761_v33 }
 0x96f   : > { %5334 = vmatpush.bf16.msra.mxu1 %v6717_v2 }
 0x970   : > { %v4996_v61 = vpack.c.bf16 %v4992_v8, %v4991_v9 }
 0x972   : > { %6480 = vmatmul.msk.bf16.gmra.mxu2 %vm3112_vm5, %v4996_v61 }
 0x9c5   : > { %v5054_v56 = vpop.f32.mrf.mxu2 }
 0x9c6   : > { %v9384_v43 = vadd.f32 %v9378_v20, %v5054_v56 }
 0x9c8   : > { %v5074_v33 = vmin.f32 %v9384_v43, 20.0  ;;  %vm5154_vm7 = vcmp.gt.f32.partialorder %v9384_v43, 20.0 }
 0x9ca   : > { %v5082_v0 = vmul.f32 1.442695, %v5074_v33 }
 0x9cc   : > { %7046 = vpow2.f32 %v5082_v0 }
 0x9cd   : > { %v5056_v42 = vpop.f32.mrf.mxu2 }
 0x9ce   : > { %v5057_v53 = vadd.f32 %v9378_v20, %v5056_v42 }
 0x9d0   : > { %v5075_v3 = vmin.f32 %v5057_v53, 20.0  ;;  %vm5155_vm8 = vcmp.gt.f32.partialorder %v5057_v53, 20.0 }
 0x9d2   : > { %v7047_v15 = vpop.eup %7046  ;;  %v5084_v45 = vmul.f32 1.442695, %v5075_v3 }
 0x9d3   : > { %v5098_v29 = vadd.f32 2.0, %v7047_v15 }
 0x9d4   : > { %7048 = vpow2.f32 %v5084_v45 }
 0x9d5   : > { %v5106_v13 = vmul.f32 %v7047_v15, %v5098_v29  ;;  %v5059_v10 = vpop.f32.mrf.mxu2 }
 0x9d6   : > { %v9398_v59 = vadd.f32 %v9378_v20, %v5059_v10 }
 0x9d7   : > { %v5114_v47 = vadd.f32 2.0, %v5106_v13  ;;  %v5162_v39 = vmul.f32 %v5106_v13, %v9384_v43 }
 0x9d8   : > { %v5076_v30 = vmin.f32 %v9398_v59, 20.0  ;;  %vm5156_vm9 = vcmp.gt.f32.partialorder %v9398_v59, 20.0 }
 0x9d9   : > { %7050 = vrcp.f32 %v5114_v47 }
 0x9da   : > { %v7049_v31 = vpop.eup %7048  ;;  %v5086_v35 = vmul.f32 1.442695, %v5076_v30 }
 0x9db   : > { %v5099_v36 = vadd.f32 2.0, %v7049_v31 }
 0x9dc   : > { %7052 = vpow2.f32 %v5086_v35 }
 0x9dd   : > { %v5107_v24 = vmul.f32 %v7049_v31, %v5099_v36  ;;  %v5061_v21 = vpop.f32.mrf.mxu2 }
 0x9de   : > { %v9402_v23 = vadd.f32 %v9378_v20, %v5061_v21 }
 0x9df   : > { %v7051_v57 = vpop.eup %7050  ;;  %v5115_v5 = vadd.f32 2.0, %v5107_v24  ;;  %v5163_v58 = vmul.f32 %v5107_v24, %v5057_v53 }
 0x9e0   : > { %v5130_v14 = vmul.f32 %v7051_v57, %v5114_v47  ;;  %v5077_v34 = vmin.f32 %v9402_v23, 20.0  ;;  %vm5157_vm10 = vcmp.gt.f32.partialorder %v9402_v23, 20.0 }
 0x9e1   : > { %7054 = vrcp.f32 %v5115_v5 }
 0x9e2   : > { %v7053_v38 = vpop.eup %7052  ;;  %v5088_v28 = vmul.f32 1.442695, %v5077_v34  ;;  %v5138_v51 = vsub.f32 2.0, %v5130_v14 }
 0x9e3   : > { %v5100_v44 = vadd.f32 2.0, %v7053_v38 }
 0x9e4   : > { %7056 = vpow2.f32 %v5088_v28  ;;  %v5146_v11 = vmul.f32 %v7051_v57, %v5138_v51 }
 0x9e5   : > { %v5108_v41 = vmul.f32 %v7053_v38, %v5100_v44  ;;  %v5064_v19 = vpop.f32.mrf.mxu2 }
 0x9e6   : > { %v9406_v63 = vadd.f32 %v9378_v20, %v5064_v19  ;;  %v5170_v16 = vmul.f32 %v5162_v39, %v5146_v11 }
 0x9e7   : > { %v7055_v27 = vpop.eup %7054  ;;  %v5116_v22 = vadd.f32 2.0, %v5108_v41  ;;  %v5164_v3 = vmul.f32 %v5108_v41, %v9398_v59 }
 0x9e8   : > { %v5131_v49 = vmul.f32 %v7055_v27, %v5115_v5  ;;  %v5078_v37 = vmin.f32 %v9406_v63, 20.0  ;;  %v5178_v1 = vsel %vm5154_vm7, %v9384_v43, %v5170_v16  ;;  %vm5158_vm11 = vcmp.gt.f32.partialorder %v9406_v63, 20.0 }
 0x9e9   : > { %7058 = vrcp.f32 %v5116_v22 }
 0x9ea   : > { %v7057_v12 = vpop.eup %7056  ;;  %v5139_v7 = vsub.f32 2.0, %v5131_v49  ;;  %v5090_v62 = vmul.f32 1.442695, %v5078_v37 }
 0x9eb   : > { %v5101_v50 = vadd.f32 2.0, %v7057_v12 }
 0x9ec   : > { %v5147_v6 = vmul.f32 %v7055_v27, %v5139_v7  ;;  %7060 = vpow2.f32 %v5090_v62 }
 0x9ed   : > { %v5109_v4 = vmul.f32 %v7057_v12, %v5101_v50  ;;  %v5066_v52 = vpop.f32.mrf.mxu2 }
 0x9ee   : > { %v5171_v40 = vmul.f32 %v5163_v58, %v5147_v6  ;;  %v9411_v17 = vadd.f32 %v9378_v20, %v5066_v52 }
 0x9ef   : > { %v7059_v18 = vpop.eup %7058  ;;  %v5117_v60 = vadd.f32 2.0, %v5109_v4  ;;  %v5165_v47 = vmul.f32 %v5109_v4, %v9402_v23 }
 0x9f0   : > { %v5179_v48 = vsel %vm5155_vm8, %v5057_v53, %v5171_v40  ;;  %v5132_v54 = vmul.f32 %v7059_v18, %v5116_v22  ;;  %v5079_v32 = vmin.f32 %v9411_v17, 20.0  ;;  %vm5159_vm12 = vcmp.gt.f32.partialorder %v9411_v17, 20.0 }
 0x9f1   : > { %v5186_v26 = vpack.c.bf16 %v5179_v48, %v5178_v1  ;;  %7062 = vrcp.f32 %v5117_v60 }
 0x9f2   : > { %v7061_v9 = vpop.eup %7060  ;;  %v5092_v8 = vmul.f32 1.442695, %v5079_v32  ;;  %v5140_v25 = vsub.f32 2.0, %v5132_v54 }
 0x9f3   : > { %v5102_v61 = vadd.f32 2.0, %v7061_v9  ;;  %6529 = vmatmul.msk.bf16.vlgmr.msra.gmra.mxu1 %vm3112_vm5, %v5186_v26 }
 0x9f4   : > { %7064 = vpow2.f32 %v5092_v8  ;;  %v5148_v55 = vmul.f32 %v7059_v18, %v5140_v25 }
 0x9f5   : > { %v5110_v56 = vmul.f32 %v7061_v9, %v5102_v61  ;;  %v5069_v46 = vpop.f32.mrf.mxu2 }
 0x9f6   : > { %v9418_v33 = vadd.f32 %v9378_v20, %v5069_v46  ;;  %v5172_v13 = vmul.f32 %v5164_v3, %v5148_v55 }
 0x9f7   : > { %v7063_v0 = vpop.eup %7062  ;;  %v5118_v43 = vadd.f32 2.0, %v5110_v56 }
 0x9f8   : > { %v5133_v42 = vmul.f32 %v7063_v0, %v5117_v60  ;;  %v5080_v53 = vmin.f32 %v9418_v33, 20.0  ;;  %v5180_v14 = vsel %vm5156_vm9, %v9398_v59, %v5172_v13  ;;  %v5166_v59 = vmul.f32 %v5110_v56, %v9406_v63  ;;  %v5271_v56 = vpop.f32.mrf.mxu0 }
 0x9f9   : > { %7066 = vrcp.f32 %v5118_v43  ;;  %vm5160_vm13 = vcmp.gt.f32.partialorder %v9418_v33, 20.0 }
 0x9fa   : > { %v7065_v2 = vpop.eup %7064  ;;  %v5141_v15 = vsub.f32 2.0, %v5133_v42  ;;  %v5094_v45 = vmul.f32 1.442695, %v5080_v53 }
 0x9fb   : > { %v5103_v29 = vadd.f32 2.0, %v7065_v2 }
 0x9fc   : > { %v5149_v10 = vmul.f32 %v7063_v0, %v5141_v15  ;;  %7068 = vpow2.f32 %v5094_v45  ;;  %v9443_v0 = vld [vmem:[%s9561_s17] ss:$0 sm:$0xff] }
 0x9fd   : > { %v5111_v30 = vmul.f32 %v7065_v2, %v5103_v29  ;;  %v5071_v31 = vpop.f32.mrf.mxu2 }
 0x9fe   : > { %v5173_v35 = vmul.f32 %v5165_v47, %v5149_v10  ;;  %v5072_v36 = vadd.f32 %v9378_v20, %v5071_v31 }
 0x9ff   : > { %v7067_v24 = vpop.eup %7066  ;;  %v5119_v21 = vadd.f32 2.0, %v5111_v30  ;;  %v5167_v7 = vmul.f32 %v5111_v30, %v9411_v17 }
 0xa00   : > { %v5134_v57 = vmul.f32 %v7067_v24, %v5118_v43  ;;  %v5081_v5 = vmin.f32 %v5072_v36, 20.0  ;;  %v5181_v34 = vsel %vm5157_vm10, %v9402_v23, %v5173_v35  ;;  %vm5161_vm0 = vcmp.gt.f32.partialorder %v5072_v36, 20.0  ;;  %v5273_v46 = vpop.f32.mrf.mxu0 }
 0xa01   : > { %7070 = vrcp.f32 %v5119_v21  ;;  %v5187_v38 = vpack.c.bf16 %v5181_v34, %v5180_v14 }
 0xa02   : > { %v7069_v28 = vpop.eup %7068  ;;  %v5096_v44 = vmul.f32 1.442695, %v5081_v5  ;;  %v5142_v20 = vsub.f32 2.0, %v5134_v57 }
 0xa03   : > { %v5104_v51 = vadd.f32 2.0, %v7069_v28  ;;  %6530 = vmatmul.msk.bf16.gmra.mxu1 %vm3112_vm5, %v5187_v38 }
 0xa04   : > { %7072 = vpow2.f32 %v5096_v44  ;;  %v5150_v22 = vmul.f32 %v7067_v24, %v5142_v20 }
 0xa05   : > { %v5112_v41 = vmul.f32 %v7069_v28, %v5104_v51 }
 0xa06   : > { %v5174_v12 = vmul.f32 %v5166_v59, %v5150_v22 }
 0xa07   : > { %v7071_v19 = vpop.eup %7070  ;;  %v5120_v27 = vadd.f32 2.0, %v5112_v41  ;;  %v5168_v54 = vmul.f32 %v5112_v41, %v9418_v33 }
 0xa08   : > { %v5135_v11 = vmul.f32 %v7071_v19, %v5119_v21  ;;  %v5182_v4 = vsel %vm5158_vm11, %v9406_v63, %v5174_v12  ;;  %v5276_v2 = vpop.f32.mrf.mxu0 }
 0xa09   : > { %7074 = vrcp.f32 %v5120_v27 }
 0xa0a   : > { %v7073_v49 = vpop.eup %7072  ;;  %v5143_v37 = vsub.f32 2.0, %v5135_v11 }
 0xa0b   : > { %v5105_v23 = vadd.f32 2.0, %v7073_v49 }
 0xa0c   : > { %v5151_v39 = vmul.f32 %v7071_v19, %v5143_v37 }
 0xa0d   : > { %v5113_v62 = vmul.f32 %v7073_v49, %v5105_v23 }
 0xa0e   : > { %v5175_v50 = vmul.f32 %v5167_v7, %v5151_v39 }
 0xa0f   : > { %v7075_v16 = vpop.eup %7074  ;;  %v5121_v6 = vadd.f32 2.0, %v5113_v62  ;;  %v5169_v8 = vmul.f32 %v5113_v62, %v5072_v36 }
 0xa10   : > { %v5136_v58 = vmul.f32 %v7075_v16, %v5120_v27  ;;  %v5183_v52 = vsel %vm5159_vm12, %v9411_v17, %v5175_v50  ;;  %v5278_v47 = vpop.f32.mrf.mxu0 }
 0xa11   : > { %7076 = vrcp.f32 %v5121_v6  ;;  %v5188_v40 = vpack.c.bf16 %v5183_v52, %v5182_v4 }
 0xa12   : > { %v5144_v18 = vsub.f32 2.0, %v5136_v58 }
 0xa13   : > { %6531 = vmatmul.msk.bf16.gmra.mxu1 %vm3112_vm5, %v5188_v40 }
 0xa14   : > { %v5152_v1 = vmul.f32 %v7075_v16, %v5144_v18 }
 0xa16   : > { %v5176_v26 = vmul.f32 %v5168_v54, %v5152_v1 }
 0xa17   : > { %v7077_v60 = vpop.eup %7076 }
 0xa18   : > { %v5137_v48 = vmul.f32 %v7077_v60, %v5121_v6  ;;  %v5184_v63 = vsel %vm5160_vm13, %v9418_v33, %v5176_v26  ;;  %v5281_v44 = vpop.f32.mrf.mxu0 }
 0xa1a   : > { %v5145_v32 = vsub.f32 2.0, %v5137_v48 }
 0xa1c   : > { %v5153_v9 = vmul.f32 %v7077_v60, %v5145_v32 }
 0xa1e   : > { %v5177_v61 = vmul.f32 %v5169_v8, %v5153_v9 }
 0xa20   : > { %v5185_v17 = vsel %vm5161_vm0, %v5072_v36, %v5177_v61  ;;  %v5283_v58 = vpop.f32.mrf.mxu0 }
 0xa21   : > { %v5189_v25 = vpack.c.bf16 %v5185_v17, %v5184_v63 }
 0xa23   : > { %6532 = vmatmul.msk.bf16.gmra.mxu1 %vm3112_vm5, %v5189_v25 }
 0xa70   : > { %v5336_v43 = vpop.f32.mrf.mxu1 }
 0xa71   : > { %v5337_v55 = vadd.f32 %v5336_v43, %v5271_v56 }
 0xa73   : > { %v5360_v42 = vadd.f32 %v9443_v0, %v5337_v55 }
 0xa75   : > { %v5368_v53 = vmin.f32 %v5360_v42, 20.0  ;;  %vm5448_vm14 = vcmp.gt.f32.partialorder %v5360_v42, 20.0 }
 0xa77   : > { %v5376_v3 = vmul.f32 1.442695, %v5368_v53 }
 0xa78   : > { %v5338_v15 = vpop.f32.mrf.mxu1 }
 0xa79   : > { %7078 = vpow2.f32 %v5376_v3  ;;  %v5339_v33 = vadd.f32 %v5338_v15, %v5273_v46 }
 0xa7b   : > { %v9447_v45 = vadd.f32 %v9443_v0, %v5339_v33 }
 0xa7d   : > { %v5369_v29 = vmin.f32 %v9447_v45, 20.0  ;;  %vm5449_vm15 = vcmp.gt.f32.partialorder %v9447_v45, 20.0 }
 0xa7f   : > { %v7079_v13 = vpop.eup %7078  ;;  %v5378_v10 = vmul.f32 1.442695, %v5369_v29 }
 0xa80   : > { %v5392_v30 = vadd.f32 2.0, %v7079_v13  ;;  %v5341_v31 = vpop.f32.mrf.mxu1 }
 0xa81   : > { %7080 = vpow2.f32 %v5378_v10  ;;  %v5342_v35 = vadd.f32 %v5341_v31, %v5276_v2 }
 0xa82   : > { %v5400_v36 = vmul.f32 %v7079_v13, %v5392_v30 }
 0xa83   : > { %v9451_v24 = vadd.f32 %v9443_v0, %v5342_v35 }
 0xa84   : > { %v5408_v21 = vadd.f32 2.0, %v5400_v36  ;;  %v5456_v39 = vmul.f32 %v5400_v36, %v5360_v42 }
 0xa85   : > { %v5370_v57 = vmin.f32 %v9451_v24, 20.0  ;;  %vm5450_vm1 = vcmp.gt.f32.partialorder %v9451_v24, 20.0 }
 0xa86   : > { %7082 = vrcp.f32 %v5408_v21 }
 0xa87   : > { %v7081_v5 = vpop.eup %7080  ;;  %v5380_v14 = vmul.f32 1.442695, %v5370_v57 }
 0xa88   : > { %v5393_v34 = vadd.f32 2.0, %v7081_v5  ;;  %v5343_v38 = vpop.f32.mrf.mxu1 }
 0xa89   : > { %7084 = vpow2.f32 %v5380_v14  ;;  %v5344_v28 = vadd.f32 %v5343_v38, %v5278_v47 }
 0xa8a   : > { %v5401_v51 = vmul.f32 %v7081_v5, %v5393_v34 }
 0xa8b   : > { %v9455_v20 = vadd.f32 %v9443_v0, %v5344_v28 }
 0xa8c   : > { %v7083_v41 = vpop.eup %7082  ;;  %v5409_v19 = vadd.f32 2.0, %v5401_v51  ;;  %v5457_v9 = vmul.f32 %v5401_v51, %v9447_v45 }
 0xa8d   : > { %v5424_v27 = vmul.f32 %v7083_v41, %v5408_v21  ;;  %v5371_v22 = vmin.f32 %v9455_v20, 20.0  ;;  %vm5451_vm2 = vcmp.gt.f32.partialorder %v9455_v20, 20.0 }
 0xa8e   : > { %7086 = vrcp.f32 %v5409_v19 }
 0xa8f   : > { %v7085_v11 = vpop.eup %7084  ;;  %v5432_v49 = vsub.f32 2.0, %v5424_v27  ;;  %v5382_v59 = vmul.f32 1.442695, %v5371_v22 }
 0xa90   : > { %v5394_v37 = vadd.f32 2.0, %v7085_v11  ;;  %v5346_v23 = vpop.f32.mrf.mxu1 }
 0xa91   : > { %v5440_v12 = vmul.f32 %v7083_v41, %v5432_v49  ;;  %7088 = vpow2.f32 %v5382_v59  ;;  %v5347_v7 = vadd.f32 %v5346_v23, %v5281_v44 }
 0xa92   : > { %v5402_v62 = vmul.f32 %v7085_v11, %v5394_v37 }
 0xa93   : > { %v5464_v50 = vmul.f32 %v5456_v39, %v5440_v12  ;;  %v9462_v16 = vadd.f32 %v9443_v0, %v5347_v7 }
 0xa94   : > { %v7087_v6 = vpop.eup %7086  ;;  %v5410_v4 = vadd.f32 2.0, %v5402_v62  ;;  %v5458_v13 = vmul.f32 %v5402_v62, %v9451_v24 }
 0xa95   : > { %v5472_v52 = vsel %vm5448_vm14, %v5360_v42, %v5464_v50  ;;  %v5425_v40 = vmul.f32 %v7087_v6, %v5409_v19  ;;  %v5372_v18 = vmin.f32 %v9462_v16, 20.0  ;;  %v5286_v42 = vpop.f32.mrf.mxu0  ;;  %vm5452_vm3 = vcmp.gt.f32.partialorder %v9462_v16, 20.0 }
 0xa96   : > { %5480 = vst.msk [vmem:[%s9465_s3] sm:$0xff] %vm3112_vm5, %v5472_v52  ;;  %7090 = vrcp.f32 %v5410_v4 }
 0xa97   : > { %v7089_v60 = vpop.eup %7088  ;;  %v5433_v1 = vsub.f32 2.0, %v5425_v40  ;;  %v5384_v48 = vmul.f32 1.442695, %v5372_v18 }
 0xa98   : > { %v5395_v54 = vadd.f32 2.0, %v7089_v60  ;;  %v5348_v32 = vpop.f32.mrf.mxu1 }
 0xa99   : > { %v5441_v26 = vmul.f32 %v7087_v6, %v5433_v1  ;;  %7092 = vpow2.f32 %v5384_v48  ;;  %v5349_v8 = vadd.f32 %v5348_v32, %v5283_v58 }
 0xa9a   : > { %v5403_v61 = vmul.f32 %v7089_v60, %v5395_v54 }
 0xa9b   : > { %v5465_v63 = vmul.f32 %v5457_v9, %v5441_v26  ;;  %v9471_v17 = vadd.f32 %v9443_v0, %v5349_v8 }
 0xa9c   : > { %v7091_v25 = vpop.eup %7090  ;;  %v5411_v56 = vadd.f32 2.0, %v5403_v61  ;;  %v5459_v41 = vmul.f32 %v5403_v61, %v9455_v20 }
 0xa9d   : > { %v5473_v46 = vsel %vm5449_vm15, %v9447_v45, %v5465_v63  ;;  %v5426_v43 = vmul.f32 %v7091_v25, %v5410_v4  ;;  %v5373_v55 = vmin.f32 %v9471_v17, 20.0  ;;  %v5288_v38 = vpop.f32.mrf.mxu0  ;;  %vm5453_vm4 = vcmp.gt.f32.partialorder %v9471_v17, 20.0 }
 0xa9e   : > { %5481 = vst.msk [vmem:[%s9465_s3 + $0x8] sm:$0xff] %vm3112_vm5, %v5473_v46  ;;  %7094 = vrcp.f32 %v5411_v56 }
 0xa9f   : > { %v7093_v53 = vpop.eup %7092  ;;  %v5434_v2 = vsub.f32 2.0, %v5426_v43  ;;  %v5386_v3 = vmul.f32 1.442695, %v5373_v55 }
 0xaa0   : > { %v5396_v15 = vadd.f32 2.0, %v7093_v53  ;;  %v5351_v33 = vpop.f32.mrf.mxu1 }
 0xaa1   : > { %v5442_v29 = vmul.f32 %v7091_v25, %v5434_v2  ;;  %7096 = vpow2.f32 %v5386_v3  ;;  %v5352_v10 = vadd.f32 %v5351_v33, %v5286_v42 }
 0xaa2   : > { %v5404_v47 = vmul.f32 %v7093_v53, %v5396_v15 }
 0xaa3   : > { %v5466_v45 = vmul.f32 %v5458_v13, %v5442_v29  ;;  %v9480_v30 = vadd.f32 %v9443_v0, %v5352_v10 }
 0xaa4   : > { %v7095_v31 = vpop.eup %7094  ;;  %v5412_v35 = vadd.f32 2.0, %v5404_v47  ;;  %v5460_v6 = vmul.f32 %v5404_v47, %v9462_v16 }
 0xaa5   : > { %v5474_v36 = vsel %vm5450_vm1, %v9451_v24, %v5466_v45  ;;  %v5427_v21 = vmul.f32 %v7095_v31, %v5411_v56  ;;  %v5374_v57 = vmin.f32 %v9480_v30, 20.0  ;;  %vm5454_vm6 = vcmp.gt.f32.partialorder %v9480_v30, 20.0 }
 0xaa6   : > { %5482 = vst.msk [vmem:[%s9465_s3 + $0x10] sm:$0xff] %vm3112_vm5, %v5474_v36  ;;  %7098 = vrcp.f32 %v5412_v35 }
 0xaa7   : > { %v7097_v5 = vpop.eup %7096  ;;  %v5435_v14 = vsub.f32 2.0, %v5427_v21  ;;  %v5388_v34 = vmul.f32 1.442695, %v5374_v57 }
 0xaa8   : > { %v5397_v28 = vadd.f32 2.0, %v7097_v5  ;;  %v5353_v44 = vpop.f32.mrf.mxu1 }
 0xaa9   : > { %v5443_v51 = vmul.f32 %v7095_v31, %v5435_v14  ;;  %7100 = vpow2.f32 %v5388_v34  ;;  %v5354_v19 = vadd.f32 %v5353_v44, %v5288_v38 }
 0xaaa   : > { %v5405_v27 = vmul.f32 %v7097_v5, %v5397_v28 }
 0xaab   : > { %v5467_v24 = vmul.f32 %v5459_v41, %v5443_v51  ;;  %v5367_v22 = vadd.f32 %v9443_v0, %v5354_v19 }
 0xaac   : > { %v7099_v11 = vpop.eup %7098  ;;  %v5413_v49 = vadd.f32 2.0, %v5405_v27  ;;  %v5461_v54 = vmul.f32 %v5405_v27, %v9471_v17 }
 0xaad   : > { %v5475_v59 = vsel %vm5451_vm2, %v9455_v20, %v5467_v24  ;;  %v5428_v37 = vmul.f32 %v7099_v11, %v5412_v35  ;;  %v5375_v23 = vmin.f32 %v5367_v22, 20.0  ;;  %vm5455_vm7 = vcmp.gt.f32.partialorder %v5367_v22, 20.0 }
 0xaae   : > { %5483 = vst.msk [vmem:[%s9465_s3 + $0x18] sm:$0xff] %vm3112_vm5, %v5475_v59  ;;  %7102 = vrcp.f32 %v5413_v49 }
 0xaaf   : > { %v7101_v12 = vpop.eup %7100  ;;  %v5436_v39 = vsub.f32 2.0, %v5428_v37  ;;  %v5390_v7 = vmul.f32 1.442695, %v5375_v23 }
 0xab0   : > { %v5398_v62 = vadd.f32 2.0, %v7101_v12 }
 0xab1   : > { %v5444_v50 = vmul.f32 %v7099_v11, %v5436_v39  ;;  %7104 = vpow2.f32 %v5390_v7 }
 0xab2   : > { %v5406_v0 = vmul.f32 %v7101_v12, %v5398_v62 }
 0xab3   : > { %v5468_v58 = vmul.f32 %v5460_v6, %v5444_v50 }
 0xab4   : > { %v7103_v4 = vpop.eup %7102  ;;  %v5414_v20 = vadd.f32 2.0, %v5406_v0  ;;  %v5462_v56 = vmul.f32 %v5406_v0, %v9480_v30 }
 0xab5   : > { %v5476_v52 = vsel %vm5452_vm3, %v9462_v16, %v5468_v58  ;;  %v5429_v40 = vmul.f32 %v7103_v4, %v5413_v49 }
 0xab6   : > { %5484 = vst.msk [vmem:[%s9465_s3 + $0x20] sm:$0xff] %vm3112_vm5, %v5476_v52  ;;  %7106 = vrcp.f32 %v5414_v20 }
 0xab7   : > { %v7105_v18 = vpop.eup %7104  ;;  %v5437_v60 = vsub.f32 2.0, %v5429_v40 }
 0xab8   : > { %v5399_v1 = vadd.f32 2.0, %v7105_v18 }
 0xab9   : > { %v5445_v48 = vmul.f32 %v7103_v4, %v5437_v60 }
 0xaba   : > { %v5407_v32 = vmul.f32 %v7105_v18, %v5399_v1 }
 0xabb   : > { %v5469_v26 = vmul.f32 %v5461_v54, %v5445_v48 }
 0xabc   : > { %v7107_v9 = vpop.eup %7106  ;;  %v5415_v8 = vadd.f32 2.0, %v5407_v32  ;;  %v5463_v2 = vmul.f32 %v5407_v32, %v5367_v22 }
 0xabd   : > { %v5477_v16 = vsel %vm5453_vm4, %v9471_v17, %v5469_v26  ;;  %v5430_v61 = vmul.f32 %v7107_v9, %v5414_v20 }
 0xabe   : > { %5485 = vst.msk [vmem:[%s9465_s3 + $0x28] sm:$0xff] %vm3112_vm5, %v5477_v16  ;;  %7108 = vrcp.f32 %v5415_v8 }
 0xabf   : > { %v5438_v63 = vsub.f32 2.0, %v5430_v61 }
 0xac1   : > { %v5446_v25 = vmul.f32 %v7107_v9, %v5438_v63 }
 0xac3   : > { %v5470_v46 = vmul.f32 %v5462_v56, %v5446_v25 }
 0xac4   : > { %v7109_v43 = vpop.eup %7108 }
 0xac5   : > { %v5478_v55 = vsel %vm5454_vm6, %v9480_v30, %v5470_v46  ;;  %v5431_v42 = vmul.f32 %v7109_v43, %v5415_v8 }
 0xac6   : > { %5486 = vst.msk [vmem:[%s9465_s3 + $0x30] sm:$0xff] %vm3112_vm5, %v5478_v55 }
 0xac7   : > { %v5439_v17 = vsub.f32 2.0, %v5431_v42 }
 0xac9   : > { %v5447_v53 = vmul.f32 %v7109_v43, %v5439_v17 }
 0xacb   : > { %v5471_v3 = vmul.f32 %v5463_v2, %v5447_v53 }
 0xacd   : > { %v5479_v15 = vsel %vm5455_vm7, %v5367_v22, %v5471_v3 }
 0xace   : > { %5487 = vst.msk [vmem:[%s9465_s3 + $0x38] sm:$0xff] %vm3112_vm5, %v5479_v15 }
 0xacf   : > { %7137 = shalt.err (!%p7134_p3)
}
 0xad0   : > { %s7174_s29 = smov 128   ;;  %s7175_s3 = smov 8  }
 0xad1   : > { %6742 = dma.vmem_to_hbm [thread:$0]  (%p7309_p5), %s5502_s25, 1024, %s5504_s26, %s5489_s0, %s7174_s29, %s7174_s29, %s7175_s3  }
 0xad2 PF: > { %s9612_s5 = sld [smem:[#allocation5_spill]]  ;;  %p6748_p4 = scmp.ge.s32.totalorder %s7172_s30, 2 }
 0xad4   : > { %p6745_p7 = pnand %p6748_p4, %p7313_p6 }
 0xad6   : > { %p6746_p8 = pneg %p6745_p7 }
 0xad8   : > { %s5518_s1 = sand.u32 1, %s9612_s5  }
 0xad9   : > { %s5519_s22 = scalar_lea.sflag [#allocation3], %s5518_s1 }
 0xada   : > { %7155 = dma.done.wait (%p6746_p8), %s5519_s22, 1024  }
 0xadb   : > { %7157 = vsyncadd (%p6746_p8), %s5519_s22, 4294966272  ;;  %s9614_s30 = sld [smem:[#allocation7_spill]]  ;;  %s9617_s27 = smov %s7164_s28 }
 0xadc   : > { %s9615_s19 = sld [smem:[#allocation6_spill]] }
 0xadd   : > { %s9616_s29 = sld [smem:[#allocation8_spill]] }
 0xae1   : > { %p28_p9 = scmp.ge.s32.totalorder %s9614_s30, 4  }
 0xae2   : > { %s9618_s28 = smov %s9615_s19 }
 0xae3   :  { %30 = sbr.rel (!%p28_p9) target bundleno = 11 (0xb), region = 143 }
 0xae8   :  { %5525 = vsyncpa [#allocation3], 1 }
 0xae9   :  { %5527 = vsyncpa [#allocation3 + $0x1], 1 }

</bundles_post_ra>
